<compile_context>
chip_gen: v5e
topology: v5e:2x2
jax: 0.10.0
libtpu: 0.0.40
codegen_flags: <defaults>
</compile_context>

<pallas_src>
import functools

import jax
import jax.numpy as jnp
from jax.experimental import pallas as pl
from jax.experimental.pallas import tpu as pltpu

EPS = 1e-5
LANE = 128


def _round_up(v, m):
    return (v + m - 1) // m * m


def _pad_axis(a, axis, new_size):
    if a.shape[axis] == new_size:
        return a
    cfg = [(0, 0)] * a.ndim
    cfg[axis] = (0, new_size - a.shape[axis])
    return jnp.pad(a, cfg)


# ---------------------------------------------------------------------------
# Phase A: per-tile BatchNorm partial statistics (parallel grid, raw channels)
# ---------------------------------------------------------------------------
def _make_bn_stats_kernel(C):
    def kernel(x_ref, out_ref):
        x = x_ref[0].astype(jnp.float32)                              # (th, W, C)
        s = jnp.sum(jnp.sum(x, axis=0), axis=0, keepdims=True)        # (1, C)
        ss = jnp.sum(jnp.sum(x * x, axis=0), axis=0, keepdims=True)   # (1, C)
        out_ref[...] = jnp.concatenate([s, ss], axis=0).reshape(1, 1, 2, C)
    return kernel


def bn_partial_stats(x, rows_per_tile):
    """x: (N, H, W, C) NHWC.  Returns (N, n_h, 2, C) per-tile [sum, sumsq]."""
    N, H, W, C = x.shape
    th = rows_per_tile
    assert H % th == 0, (H, th)
    n_h = H // th
    return pl.pallas_call(
        _make_bn_stats_kernel(C),
        out_shape=jax.ShapeDtypeStruct((N, n_h, 2, C), jnp.float32),
        grid=(N, n_h),
        in_specs=[pl.BlockSpec((1, th, W, C), lambda n, i: (n, i, 0, 0))],
        out_specs=pl.BlockSpec((1, 1, 2, C), lambda n, i: (n, i, 0, 0)),
        compiler_params=pltpu.CompilerParams(
            dimension_semantics=("parallel", "parallel")),
    )(x)


def _bn_scale_shift(s, ss, gamma, beta, count):
    mean = s / count
    var = jnp.maximum(ss / count - mean * mean, 0.0)   # biased var (PyTorch fwd)
    inv = jax.lax.rsqrt(var + EPS)
    scale = gamma * inv
    shift = beta - mean * scale
    return scale.astype(jnp.float32), shift.astype(jnp.float32)


# ---------------------------------------------------------------------------
# Phase B: fused BN-apply + ReLU + 3x3 conv (+bias) (+BN2 partial stats)
# ---------------------------------------------------------------------------
def _make_fused_conv_kernel(th, W, Cin, Fp, *, has_bias, emit_stats, mxu_dtype):
    lane_aligned = (Cin % LANE) == 0

    def kernel(x_ref, top_ref, bot_ref, scale_ref, shift_ref, w_ref, *rest):
        ri = 0
        bias_ref = None
        if has_bias:
            bias_ref = rest[ri]; ri += 1
        o_ref = rest[ri]; ri += 1
        stats_ref = None
        if emit_stats:
            stats_ref = rest[ri]; ri += 1
        buf_ref = rest[ri]                 # VMEM scratch (th+2, W, 3*Cin) mxu_dtype

        i = pl.program_id(1)
        n_h = pl.num_programs(1)

        scale = scale_ref[...].reshape(1, 1, Cin)
        shift = shift_ref[...].reshape(1, 1, Cin)

        def bn_relu(v):                    # BN/ReLU math stays f32 on the VPU
            return jnp.maximum(v.astype(jnp.float32) * scale + shift, 0.0)

        # Halo rows outside the image are zeroed AFTER BN+ReLU (the conv
        # zero-pads the post-activation tensor); single cast to mxu_dtype here.
        top_keep = (i > 0).astype(jnp.float32)
        bot_keep = (i < n_h - 1).astype(jnp.float32)
        y_top = (bn_relu(top_ref[0]) * top_keep).astype(mxu_dtype)    # (1,  W, Cin)
        y_mid = bn_relu(x_ref[0]).astype(mxu_dtype)                   # (th, W, Cin)
        y_bot = (bn_relu(bot_ref[0]) * bot_keep).astype(mxu_dtype)    # (1,  W, Cin)
        y_all = jnp.concatenate([y_top, y_mid, y_bot], axis=0)        # (th+2, W, Cin)

        # Column-shifted copies (kw = 0 / 2 taps); their zero columns realize
        # the horizontal conv padding.  kw is folded into the channel (K) dim.
        zc = jnp.zeros((th + 2, 1, Cin), y_all.dtype)
        left = jnp.concatenate([zc, y_all[:, :W - 1, :]], axis=1)     # x[.., c-1]
        right = jnp.concatenate([y_all[:, 1:, :], zc], axis=1)        # x[.., c+1]
        if lane_aligned:
            buf_ref[:, :, 0:Cin] = left
            buf_ref[:, :, Cin:2 * Cin] = y_all
            buf_ref[:, :, 2 * Cin:3 * Cin] = right
        else:
            # Small-Cin path: one full lane-packed store.
            buf_ref[...] = jnp.concatenate([left, y_all, right], axis=-1)

        # 3x3 conv = 3 MXU matmuls with K = 3*Cin, chained f32 accumulation.
        acc = jnp.zeros((th * W, Fp), jnp.float32)
        for kh in range(3):
            a = buf_ref[kh:kh + th].reshape(th * W, 3 * Cin)
            acc = acc + jnp.dot(a, w_ref[kh],
                                preferred_element_type=jnp.float32)

        if has_bias:
            acc = acc + bias_ref[...]
        out = acc.astype(o_ref.dtype)
        o_ref[...] = out.reshape(1, th, W, Fp)

        if emit_stats:
            # BN2 partial stats from the values actually stored (so the applied
            # mean/var exactly match the data the next stage normalizes).
            y32 = out.astype(jnp.float32)
            s = jnp.sum(y32, axis=0, keepdims=True)                   # (1, Fp)
            ss = jnp.sum(y32 * y32, axis=0, keepdims=True)            # (1, Fp)
            stats_ref[...] = jnp.concatenate([s, ss], axis=0).reshape(1, 1, 2, Fp)

    return kernel


def fused_bn_relu_conv3x3(x, scale, shift, w3, bias, *, rows_per_tile,
                          emit_stats, out_dtype, mxu_dtype):
    """y = conv3x3(relu(x * scale + shift)) [+ bias]; NHWC, lane-dense Fp out."""
    N, H, W, Cin = x.shape
    Fp = w3.shape[-1]
    th = rows_per_tile
    assert H % th == 0, (H, th)
    assert W % 8 == 0 and Fp % LANE == 0
    n_h = H // th

    kernel = _make_fused_conv_kernel(
        th, W, Cin, Fp, has_bias=bias is not None,
        emit_stats=emit_stats, mxu_dtype=mxu_dtype)

    in_specs = [
        # main tile: output rows [i*th, (i+1)*th)
        pl.BlockSpec((1, th, W, Cin), lambda n, i: (n, i, 0, 0)),
        # halo row above / below (clamped; zeroed in-kernel at image edges)
        pl.BlockSpec((1, 1, W, Cin),
                     lambda n, i: (n, jnp.maximum(i * th - 1, 0), 0, 0)),
        pl.BlockSpec((1, 1, W, Cin),
                     lambda n, i: (n, jnp.minimum(i * th + th, H - 1), 0, 0)),
        pl.BlockSpec((1, Cin), lambda n, i: (0, 0)),         # BN scale (resident)
        pl.BlockSpec((1, Cin), lambda n, i: (0, 0)),         # BN shift (resident)
        pl.BlockSpec((3, 3 * Cin, Fp), lambda n, i: (0, 0, 0)),  # weights (resident)
    ]
    args = [x, x, x, scale, shift, w3]
    if bias is not None:
        in_specs.append(pl.BlockSpec((1, Fp), lambda n, i: (0, 0)))
        args.append(bias)

    y_struct = jax.ShapeDtypeStruct((N, H, W, Fp), out_dtype)
    y_spec = pl.BlockSpec((1, th, W, Fp), lambda n, i: (n, i, 0, 0))
    if emit_stats:
        out_shape = (y_struct,
                     jax.ShapeDtypeStruct((N, n_h, 2, Fp), jnp.float32))
        out_specs = (y_spec,
                     pl.BlockSpec((1, 1, 2, Fp), lambda n, i: (n, i, 0, 0)))
    else:
        out_shape = y_struct
        out_specs = y_spec

    out_isize = jnp.dtype(out_dtype).itemsize
    cost = pl.CostEstimate(
        flops=2 * N * H * W * 9 * Cin * Fp,
        transcendentals=0,
        bytes_accessed=int(x.size * x.dtype.itemsize
                           + w3.size * w3.dtype.itemsize
                           + N * H * W * Fp * out_isize))

    return pl.pallas_call(
        kernel,
        out_shape=out_shape,
        grid=(N, n_h),
        in_specs=in_specs,
        out_specs=out_specs,
        scratch_shapes=[pltpu.VMEM((th + 2, W, 3 * Cin), mxu_dtype)],
        compiler_params=pltpu.CompilerParams(
            dimension_semantics=("parallel", "parallel"),
            vmem_limit_bytes=48 * 1024 * 1024),
        cost_estimate=cost,
    )(*args)


# ---------------------------------------------------------------------------
# Glue (layout plumbing only)
# ---------------------------------------------------------------------------
def _prep_conv_weight(w_oihw, cin_p, cout_p, dtype):
    """(Cout, Cin, 3, 3) -> (3, 3*cin_p, cout_p) with K ordered as (kw, ci)."""
    Cout, Cin, KH, KW = w_oihw.shape
    w = jnp.transpose(w_oihw, (2, 3, 1, 0))                # (KH, KW, Cin, Cout)
    w = _pad_axis(_pad_axis(w, 2, cin_p), 3, cout_p)
    return w.reshape(KH, KW * cin_p, cout_p).astype(dtype)


def _pick_rows_per_tile(H, W, max_positions=8192):
    best = 1
    for d in range(1, H + 1):
        if H % d == 0 and d * W <= max_positions:
            best = d
    return best


def resnet_v2_block_nhwc(x_nhwc, params, *, mxu_dtype=jnp.bfloat16,
                         rows_per_tile=None):
    N, H, W, C = x_nhwc.shape
    F = params["conv1_w"].shape[0]
    Fp = _round_up(F, LANE)
    th = rows_per_tile if rows_per_tile is not None else _pick_rows_per_tile(H, W)
    M = N * H * W

    x = x_nhwc.astype(jnp.float32)     # raw C channels: no HBM-side channel pad

    g1 = params["bn1_gamma"].reshape(1, C).astype(jnp.float32)
    b1 = params["bn1_beta"].reshape(1, C).astype(jnp.float32)
    g2 = _pad_axis(params["bn2_gamma"].reshape(1, F).astype(jnp.float32), 1, Fp)
    b2 = _pad_axis(params["bn2_beta"].reshape(1, F).astype(jnp.float32), 1, Fp)
    w1 = _prep_conv_weight(params["conv1_w"], C, Fp, mxu_dtype)
    w2 = _prep_conv_weight(params["conv2_w"], Fp, Fp, mxu_dtype)
    bias2 = _pad_axis(params["conv2_b"].reshape(1, F).astype(jnp.float32), 1, Fp)

    # BN1: parallel per-tile partial stats over the raw input, reduced here.
    stats1 = bn_partial_stats(x, th)
    s1 = jnp.sum(stats1[:, :, 0, :], axis=(0, 1)).reshape(1, C)
    ss1 = jnp.sum(stats1[:, :, 1, :], axis=(0, 1)).reshape(1, C)
    scale1, shift1 = _bn_scale_shift(s1, ss1, g1, b1, M)

    # Stage 1: BN1+ReLU fused into conv1 (no bias); epilogue emits BN2 partials.
    y1, stats2 = fused_bn_relu_conv3x3(
        x, scale1, shift1, w1, None, rows_per_tile=th, emit_stats=True,
        out_dtype=mxu_dtype, mxu_dtype=mxu_dtype)
    s2 = jnp.sum(stats2[:, :, 0, :], axis=(0, 1)).reshape(1, Fp)
    ss2 = jnp.sum(stats2[:, :, 1, :], axis=(0, 1)).reshape(1, Fp)
    scale2, shift2 = _bn_scale_shift(s2, ss2, g2, b2, M)

    # Stage 2: BN2+ReLU fused into conv2 (+bias).
    out = fused_bn_relu_conv3x3(
        y1, scale2, shift2, w2, bias2, rows_per_tile=th, emit_stats=False,
        out_dtype=jnp.float32, mxu_dtype=mxu_dtype)
    return out[:, :, :, :F]


def resnet_v2_block(x_nchw, params, *, mxu_dtype=jnp.bfloat16,
                    rows_per_tile=None):
    # NCHW wrapper only for PyTorch API parity; when chaining blocks call
    # resnet_v2_block_nhwc directly (keeps the lane-dense NHWC tensor and
    # avoids two layout transposes + the channel slice per block).
    x = jnp.transpose(x_nchw, (0, 2, 3, 1))
    y = resnet_v2_block_nhwc(x, params, mxu_dtype=mxu_dtype,
                             rows_per_tile=rows_per_tile)
    return jnp.transpose(y, (0, 3, 1, 2))


# ---------------------------------------------------------------------------
# Pure-JAX reference (for correctness check only)
# ---------------------------------------------------------------------------
def reference_block(x, params):
    def bn_train(v, g, b):
        mean = jnp.mean(v, axis=(0, 2, 3), keepdims=True)
        var = jnp.mean((v - mean) ** 2, axis=(0, 2, 3), keepdims=True)
        return (v - mean) * jax.lax.rsqrt(var + EPS) * g.reshape(1, -1, 1, 1) \
               + b.reshape(1, -1, 1, 1)

    def conv(v, w, b=None):
        o = jax.lax.conv_general_dilated(
            v, w, window_strides=(1, 1), padding=((1, 1), (1, 1)),
            dimension_numbers=("NCHW", "OIHW", "NCHW"))
        if b is not None:
            o = o + b.reshape(1, -1, 1, 1)
        return o

    v = jax.nn.relu(bn_train(x, params["bn1_gamma"], params["bn1_beta"]))
    v = conv(v, params["conv1_w"])
    v = jax.nn.relu(bn_train(v, params["bn2_gamma"], params["bn2_beta"]))
    v = conv(v, params["conv2_w"], params["conv2_b"])
    return v


# ---------------------------------------------------------------------------
if __name__ == "__main__":
    N, C, H, W = 2, 8, 16, 16
    F = C  # module is only well-formed when in_channels == nfilters

    key = jax.random.PRNGKey(0)
    ks = jax.random.split(key, 8)
    params = {
        "bn1_gamma": (1.0 + 0.1 * jax.random.normal(ks[0], (C,))).astype(jnp.float32),
        "bn1_beta": (0.1 * jax.random.normal(ks[1], (C,))).astype(jnp.float32),
        "conv1_w": (0.1 * jax.random.normal(ks[2], (F, C, 3, 3))).astype(jnp.float32),
        "bn2_gamma": (1.0 + 0.1 * jax.random.normal(ks[3], (F,))).astype(jnp.float32),
        "bn2_beta": (0.1 * jax.random.normal(ks[4], (F,))).astype(jnp.float32),
        "conv2_w": (0.1 * jax.random.normal(ks[5], (F, F, 3, 3))).astype(jnp.float32),
        "conv2_b": (0.1 * jax.random.normal(ks[6], (F,))).astype(jnp.float32),
    }
    x = jax.random.normal(ks[7], (N, C, H, W), dtype=jnp.float32)

    ref = reference_block(x, params)

    # bf16-MXU production path (default tile = whole image here); loose
    # tolerance due to bf16 rounding of dot inputs (acc and BN math stay f32).
    fwd_bf16 = jax.jit(functools.partial(resnet_v2_block, mxu_dtype=jnp.bfloat16))
    out_bf16 = jax.block_until_ready(fwd_bf16(x, params))
    assert out_bf16.shape == (N, F, H, W), out_bf16.shape
    assert jnp.allclose(out_bf16, ref, rtol=5e-2, atol=5e-2), \
        float(jnp.max(jnp.abs(out_bf16 - ref)))

    # f32 path with multiple h-tiles (exercises the halo logic): tight check.
    fwd_f32 = jax.jit(functools.partial(
        resnet_v2_block, mxu_dtype=jnp.float32, rows_per_tile=4))
    out_f32 = jax.block_until_ready(fwd_f32(x, params))
    assert jnp.allclose(out_f32, ref, rtol=1e-3, atol=1e-3), \
        float(jnp.max(jnp.abs(out_f32 - ref)))

    print("KERNEL_OK")
</pallas_src>

<mosaic_0001>
module attributes {stable_mosaic.version = 11 : i64} {
  func.func @kernel(%arg0: i32, %arg1: i32, %arg2: memref<1x16x16x8xf32, #tpu.memory_space<vmem>>, %arg3: memref<1x1x2x8xf32, #tpu.memory_space<vmem>>) attributes {dimension_semantics = [#tpu.dimension_semantics<parallel>, #tpu.dimension_semantics<parallel>], iteration_bounds = array<i64: 2, 1>, scalar_prefetch = 0 : i64, scratch_operands = 0 : i64, tpu.core_type = #tpu.core_type<tc>, window_params = [{transform_indices = @transform_0, window_bounds = array<i64: 1, 16, 16, 8>}, {transform_indices = @transform_1, window_bounds = array<i64: 1, 1, 2, 8>}]} {
    %c0 = arith.constant 0 : index
    %c0_0 = arith.constant 0 : index
    %c0_1 = arith.constant 0 : index
    %c0_2 = arith.constant 0 : index
    %0 = vector.load %arg2[%c0, %c0_0, %c0_1, %c0_2] : memref<1x16x16x8xf32, #tpu.memory_space<vmem>>, vector<1x16x16x8xf32>
    %1 = vector.shape_cast %0 : vector<1x16x16x8xf32> to vector<16x16x8xf32>
    %cst = arith.constant dense<0.000000e+00> : vector<16x8xf32>
    %2 = vector.multi_reduction <add>, %1, %cst [0] : vector<16x16x8xf32> to vector<16x8xf32>
    %cst_3 = arith.constant dense<0.000000e+00> : vector<8xf32>
    %3 = vector.multi_reduction <add>, %2, %cst_3 [0] : vector<16x8xf32> to vector<8xf32>
    %4 = vector.shape_cast %3 : vector<8xf32> to vector<1x8xf32>
    %5 = arith.mulf %1, %1 : vector<16x16x8xf32>
    %cst_4 = arith.constant dense<0.000000e+00> : vector<16x8xf32>
    %6 = vector.multi_reduction <add>, %5, %cst_4 [0] : vector<16x16x8xf32> to vector<16x8xf32>
    %cst_5 = arith.constant dense<0.000000e+00> : vector<8xf32>
    %7 = vector.multi_reduction <add>, %6, %cst_5 [0] : vector<16x8xf32> to vector<8xf32>
    %8 = vector.shape_cast %7 : vector<8xf32> to vector<1x8xf32>
    %9 = tpu.concatenate %4, %8 in 0 : vector<1x8xf32>, vector<1x8xf32> -> vector<2x8xf32>
    %10 = vector.shape_cast %9 : vector<2x8xf32> to vector<1x1x2x8xf32>
    %c0_6 = arith.constant 0 : index
    %c0_7 = arith.constant 0 : index
    %c0_8 = arith.constant 0 : index
    %c0_9 = arith.constant 0 : index
    %11 = vector.load %arg3[%c0_6, %c0_7, %c0_8, %c0_9] : memref<1x1x2x8xf32, #tpu.memory_space<vmem>>, vector<1x1x2x8xf32>
    tpu.vector_store %arg3[%c0_6, %c0_7, %c0_8, %c0_9], %10 {strides = array<i32>} : memref<1x1x2x8xf32, #tpu.memory_space<vmem>>, vector<1x1x2x8xf32>,
    return
  }
  func.func @transform_0(%arg0: i32, %arg1: i32) -> (i32, i32, i32, i32) {
    %c0_i32 = arith.constant 0 : i32
    %c0_i32_0 = arith.constant 0 : i32
    %c0_i32_1 = arith.constant 0 : i32
    return %arg0, %arg1, %c0_i32, %c0_i32_0 : i32, i32, i32, i32
  }
  func.func @transform_1(%arg0: i32, %arg1: i32) -> (i32, i32, i32, i32) {
    %c0_i32 = arith.constant 0 : i32
    %c0_i32_0 = arith.constant 0 : i32
    %c0_i32_1 = arith.constant 0 : i32
    return %arg0, %arg1, %c0_i32, %c0_i32_0 : i32, i32, i32, i32
  }
}

module attributes {stable_mosaic.version = 11 : i64} {
  func.func @kernel(%arg0: i32, %arg1: i32, %arg2: memref<1x16x16x8xf32, #tpu.memory_space<vmem>>, %arg3: memref<1x1x16x8xf32, #tpu.memory_space<vmem>>, %arg4: memref<1x1x16x8xf32, #tpu.memory_space<vmem>>, %arg5: memref<1x8xf32, #tpu.memory_space<vmem>>, %arg6: memref<1x8xf32, #tpu.memory_space<vmem>>, %arg7: memref<3x24x128xbf16, #tpu.memory_space<vmem>>, %arg8: memref<1x16x16x128xbf16, #tpu.memory_space<vmem>>, %arg9: memref<1x1x2x128xf32, #tpu.memory_space<vmem>>, %arg10: memref<18x16x24xbf16, #tpu.memory_space<vmem>>) attributes {dimension_semantics = [#tpu.dimension_semantics<parallel>, #tpu.dimension_semantics<parallel>], iteration_bounds = array<i64: 2, 1>, scalar_prefetch = 0 : i64, scratch_operands = 1 : i64, tpu.core_type = #tpu.core_type<tc>, window_params = [{transform_indices = @transform_0, window_bounds = array<i64: 1, 16, 16, 8>}, {transform_indices = @transform_1, window_bounds = array<i64: 1, 1, 16, 8>}, {transform_indices = @transform_2, window_bounds = array<i64: 1, 1, 16, 8>}, {pipeline_mode = #tpu.pipeline_mode<synchronous>, transform_indices = @transform_3, window_bounds = array<i64: 1, 8>}, {pipeline_mode = #tpu.pipeline_mode<synchronous>, transform_indices = @transform_4, window_bounds = array<i64: 1, 8>}, {pipeline_mode = #tpu.pipeline_mode<synchronous>, transform_indices = @transform_5, window_bounds = array<i64: 3, 24, 128>}, {transform_indices = @transform_6, window_bounds = array<i64: 1, 16, 16, 128>}, {transform_indices = @transform_7, window_bounds = array<i64: 1, 1, 2, 128>}]} {
    %c0 = arith.constant 0 : index
    %c0_0 = arith.constant 0 : index
    %0 = vector.load %arg5[%c0, %c0_0] : memref<1x8xf32, #tpu.memory_space<vmem>>, vector<1x8xf32>
    %1 = vector.shape_cast %0 : vector<1x8xf32> to vector<1x1x8xf32>
    %c0_1 = arith.constant 0 : index
    %c0_2 = arith.constant 0 : index
    %2 = vector.load %arg6[%c0_1, %c0_2] : memref<1x8xf32, #tpu.memory_space<vmem>>, vector<1x8xf32>
    %3 = vector.shape_cast %2 : vector<1x8xf32> to vector<1x1x8xf32>
    %c0_i32 = arith.constant 0 : i32
    %4 = arith.cmpi sgt, %arg1, %c0_i32 : i32
    %5 = arith.extui %4 : i1 to i32
    %6 = arith.sitofp %5 : i32 to f32
    %c0_i32_3 = arith.constant 0 : i32
    %7 = arith.cmpi slt, %arg1, %c0_i32_3 : i32
    %8 = arith.extui %7 : i1 to i32
    %9 = arith.sitofp %8 : i32 to f32
    %c0_4 = arith.constant 0 : index
    %c0_5 = arith.constant 0 : index
    %c0_6 = arith.constant 0 : index
    %c0_7 = arith.constant 0 : index
    %10 = vector.load %arg3[%c0_4, %c0_5, %c0_6, %c0_7] : memref<1x1x16x8xf32, #tpu.memory_space<vmem>>, vector<1x1x16x8xf32>
    %11 = vector.shape_cast %10 : vector<1x1x16x8xf32> to vector<1x16x8xf32>
    %12 = vector.broadcast %1 : vector<1x1x8xf32> to vector<1x16x8xf32>
    %13 = arith.mulf %11, %12 : vector<1x16x8xf32>
    %14 = vector.broadcast %3 : vector<1x1x8xf32> to vector<1x16x8xf32>
    %15 = arith.addf %13, %14 : vector<1x16x8xf32>
    %cst = arith.constant 0.000000e+00 : f32
    %16 = vector.broadcast %cst : f32 to vector<1x16x8xf32>
    %17 = arith.maximumf %15, %16 : vector<1x16x8xf32>
    %18 = vector.broadcast %6 : f32 to vector<1x16x8xf32>
    %19 = arith.mulf %17, %18 : vector<1x16x8xf32>
    %20 = arith.truncf %19 : vector<1x16x8xf32> to vector<1x16x8xbf16>
    %c0_8 = arith.constant 0 : index
    %c0_9 = arith.constant 0 : index
    %c0_10 = arith.constant 0 : index
    %c0_11 = arith.constant 0 : index
    %21 = vector.load %arg2[%c0_8, %c0_9, %c0_10, %c0_11] : memref<1x16x16x8xf32, #tpu.memory_space<vmem>>, vector<1x16x16x8xf32>
    %22 = vector.shape_cast %21 : vector<1x16x16x8xf32> to vector<16x16x8xf32>
    %23 = vector.broadcast %1 : vector<1x1x8xf32> to vector<16x16x8xf32>
    %24 = arith.mulf %22, %23 : vector<16x16x8xf32>
    %25 = vector.broadcast %3 : vector<1x1x8xf32> to vector<16x16x8xf32>
    %26 = arith.addf %24, %25 : vector<16x16x8xf32>
    %cst_12 = arith.constant 0.000000e+00 : f32
    %27 = vector.broadcast %cst_12 : f32 to vector<16x16x8xf32>
    %28 = arith.maximumf %26, %27 : vector<16x16x8xf32>
    %29 = arith.truncf %28 : vector<16x16x8xf32> to vector<16x16x8xbf16>
    %c0_13 = arith.constant 0 : index
    %c0_14 = arith.constant 0 : index
    %c0_15 = arith.constant 0 : index
    %c0_16 = arith.constant 0 : index
    %30 = vector.load %arg4[%c0_13, %c0_14, %c0_15, %c0_16] : memref<1x1x16x8xf32, #tpu.memory_space<vmem>>, vector<1x1x16x8xf32>
    %31 = vector.shape_cast %30 : vector<1x1x16x8xf32> to vector<1x16x8xf32>
    %32 = vector.broadcast %1 : vector<1x1x8xf32> to vector<1x16x8xf32>
    %33 = arith.mulf %31, %32 : vector<1x16x8xf32>
    %34 = vector.broadcast %3 : vector<1x1x8xf32> to vector<1x16x8xf32>
    %35 = arith.addf %33, %34 : vector<1x16x8xf32>
    %cst_17 = arith.constant 0.000000e+00 : f32
    %36 = vector.broadcast %cst_17 : f32 to vector<1x16x8xf32>
    %37 = arith.maximumf %35, %36 : vector<1x16x8xf32>
    %38 = vector.broadcast %9 : f32 to vector<1x16x8xf32>
    %39 = arith.mulf %37, %38 : vector<1x16x8xf32>
    %40 = arith.truncf %39 : vector<1x16x8xf32> to vector<1x16x8xbf16>
    %41 = tpu.concatenate %20, %29, %40 in 0 : vector<1x16x8xbf16>, vector<16x16x8xbf16>, vector<1x16x8xbf16> -> vector<18x16x8xbf16>
    %cst_18 = arith.constant 0.000000e+00 : bf16
    %42 = vector.broadcast %cst_18 : bf16 to vector<18x1x8xbf16>
    %43 = vector.extract_strided_slice %41 {offsets = [0, 0, 0], sizes = [18, 15, 8], strides = [1, 1, 1]} : vector<18x16x8xbf16> to vector<18x15x8xbf16>
    %44 = tpu.concatenate %42, %43 in 1 : vector<18x1x8xbf16>, vector<18x15x8xbf16> -> vector<18x16x8xbf16>
    %45 = vector.extract_strided_slice %41 {offsets = [0, 1, 0], sizes = [18, 15, 8], strides = [1, 1, 1]} : vector<18x16x8xbf16> to vector<18x15x8xbf16>
    %46 = tpu.concatenate %45, %42 in 1 : vector<18x15x8xbf16>, vector<18x1x8xbf16> -> vector<18x16x8xbf16>
    %47 = tpu.concatenate %44, %41, %46 in 2 : vector<18x16x8xbf16>, vector<18x16x8xbf16>, vector<18x16x8xbf16> -> vector<18x16x24xbf16>
    %c0_19 = arith.constant 0 : index
    %c0_20 = arith.constant 0 : index
    %c0_21 = arith.constant 0 : index
    %48 = vector.load %arg10[%c0_19, %c0_20, %c0_21] : memref<18x16x24xbf16, #tpu.memory_space<vmem>>, vector<18x16x24xbf16>
    tpu.vector_store %arg10[%c0_19, %c0_20, %c0_21], %47 {strides = array<i32>} : memref<18x16x24xbf16, #tpu.memory_space<vmem>>, vector<18x16x24xbf16>,
    %cst_22 = arith.constant 0.000000e+00 : f32
    %49 = vector.broadcast %cst_22 : f32 to vector<256x128xf32>
    %c0_23 = arith.constant 0 : index
    %c0_24 = arith.constant 0 : index
    %c0_25 = arith.constant 0 : index
    %50 = vector.load %arg10[%c0_23, %c0_24, %c0_25] : memref<18x16x24xbf16, #tpu.memory_space<vmem>>, vector<16x16x24xbf16>
    %51 = vector.shape_cast %50 : vector<16x16x24xbf16> to vector<256x24xbf16>
    %c0_26 = arith.constant 0 : index
    %c0_27 = arith.constant 0 : index
    %c0_28 = arith.constant 0 : index
    %52 = vector.load %arg7[%c0_26, %c0_27, %c0_28] : memref<3x24x128xbf16, #tpu.memory_space<vmem>>, vector<1x24x128xbf16>
    %53 = vector.shape_cast %52 : vector<1x24x128xbf16> to vector<24x128xbf16>
    %cst_29 = arith.constant dense<0.000000e+00> : vector<256x128xf32>
    %54 = tpu.matmul %51, %53, %cst_29 {dimension_numbers = #tpu.dot_dimension_numbers<[1], [0], [0], [1], [0, 0, 1, 1], [], []>} : vector<256x24xbf16>, vector<24x128xbf16>, vector<256x128xf32> -> vector<256x128xf32>
    %55 = arith.addf %49, %54 : vector<256x128xf32>
    %c1 = arith.constant 1 : index
    %c0_30 = arith.constant 0 : index
    %c0_31 = arith.constant 0 : index
    %56 = vector.load %arg10[%c1, %c0_30, %c0_31] : memref<18x16x24xbf16, #tpu.memory_space<vmem>>, vector<16x16x24xbf16>
    %57 = vector.shape_cast %56 : vector<16x16x24xbf16> to vector<256x24xbf16>
    %c1_32 = arith.constant 1 : index
    %c0_33 = arith.constant 0 : index
    %c0_34 = arith.constant 0 : index
    %58 = vector.load %arg7[%c1_32, %c0_33, %c0_34] : memref<3x24x128xbf16, #tpu.memory_space<vmem>>, vector<1x24x128xbf16>
    %59 = vector.shape_cast %58 : vector<1x24x128xbf16> to vector<24x128xbf16>
    %cst_35 = arith.constant dense<0.000000e+00> : vector<256x128xf32>
    %60 = tpu.matmul %57, %59, %cst_35 {dimension_numbers = #tpu.dot_dimension_numbers<[1], [0], [0], [1], [0, 0, 1, 1], [], []>} : vector<256x24xbf16>, vector<24x128xbf16>, vector<256x128xf32> -> vector<256x128xf32>
    %61 = arith.addf %55, %60 : vector<256x128xf32>
    %c2 = arith.constant 2 : index
    %c0_36 = arith.constant 0 : index
    %c0_37 = arith.constant 0 : index
    %62 = vector.load %arg10[%c2, %c0_36, %c0_37] : memref<18x16x24xbf16, #tpu.memory_space<vmem>>, vector<16x16x24xbf16>
    %63 = vector.shape_cast %62 : vector<16x16x24xbf16> to vector<256x24xbf16>
    %c2_38 = arith.constant 2 : index
    %c0_39 = arith.constant 0 : index
    %c0_40 = arith.constant 0 : index
    %64 = vector.load %arg7[%c2_38, %c0_39, %c0_40] : memref<3x24x128xbf16, #tpu.memory_space<vmem>>, vector<1x24x128xbf16>
    %65 = vector.shape_cast %64 : vector<1x24x128xbf16> to vector<24x128xbf16>
    %cst_41 = arith.constant dense<0.000000e+00> : vector<256x128xf32>
    %66 = tpu.matmul %63, %65, %cst_41 {dimension_numbers = #tpu.dot_dimension_numbers<[1], [0], [0], [1], [0, 0, 1, 1], [], []>} : vector<256x24xbf16>, vector<24x128xbf16>, vector<256x128xf32> -> vector<256x128xf32>
    %67 = arith.addf %61, %66 : vector<256x128xf32>
    %68 = arith.truncf %67 : vector<256x128xf32> to vector<256x128xbf16>
    %69 = vector.shape_cast %68 : vector<256x128xbf16> to vector<1x16x16x128xbf16>
    %c0_42 = arith.constant 0 : index
    %c0_43 = arith.constant 0 : index
    %c0_44 = arith.constant 0 : index
    %c0_45 = arith.constant 0 : index
    %70 = vector.load %arg8[%c0_42, %c0_43, %c0_44, %c0_45] : memref<1x16x16x128xbf16, #tpu.memory_space<vmem>>, vector<1x16x16x128xbf16>
    tpu.vector_store %arg8[%c0_42, %c0_43, %c0_44, %c0_45], %69 {strides = array<i32>} : memref<1x16x16x128xbf16, #tpu.memory_space<vmem>>, vector<1x16x16x128xbf16>,
    %71 = arith.extf %68 : vector<256x128xbf16> to vector<256x128xf32>
    %cst_46 = arith.constant dense<0.000000e+00> : vector<128xf32>
    %72 = vector.multi_reduction <add>, %71, %cst_46 [0] : vector<256x128xf32> to vector<128xf32>
    %73 = vector.shape_cast %72 : vector<128xf32> to vector<1x128xf32>
    %74 = arith.mulf %71, %71 : vector<256x128xf32>
    %cst_47 = arith.constant dense<0.000000e+00> : vector<128xf32>
    %75 = vector.multi_reduction <add>, %74, %cst_47 [0] : vector<256x128xf32> to vector<128xf32>
    %76 = vector.shape_cast %75 : vector<128xf32> to vector<1x128xf32>
    %77 = tpu.concatenate %73, %76 in 0 : vector<1x128xf32>, vector<1x128xf32> -> vector<2x128xf32>
    %78 = vector.shape_cast %77 : vector<2x128xf32> to vector<1x1x2x128xf32>
    %c0_48 = arith.constant 0 : index
    %c0_49 = arith.constant 0 : index
    %c0_50 = arith.constant 0 : index
    %c0_51 = arith.constant 0 : index
    %79 = vector.load %arg9[%c0_48, %c0_49, %c0_50, %c0_51] : memref<1x1x2x128xf32, #tpu.memory_space<vmem>>, vector<1x1x2x128xf32>
    tpu.vector_store %arg9[%c0_48, %c0_49, %c0_50, %c0_51], %78 {strides = array<i32>} : memref<1x1x2x128xf32, #tpu.memory_space<vmem>>, vector<1x1x2x128xf32>,
    return
  }
  func.func @transform_0(%arg0: i32, %arg1: i32) -> (i32, i32, i32, i32) {
    %c0_i32 = arith.constant 0 : i32
    %c0_i32_0 = arith.constant 0 : i32
    %c0_i32_1 = arith.constant 0 : i32
    return %arg0, %arg1, %c0_i32, %c0_i32_0 : i32, i32, i32, i32
  }
  func.func @transform_1(%arg0: i32, %arg1: i32) -> (i32, i32, i32, i32) {
    %c16_i32 = arith.constant 16 : i32
    %0 = arith.muli %arg1, %c16_i32 : i32
    %c1_i32 = arith.constant 1 : i32
    %1 = arith.subi %0, %c1_i32 : i32
    %c0_i32 = arith.constant 0 : i32
    %2 = arith.maxsi %1, %c0_i32 : i32
    %c0_i32_0 = arith.constant 0 : i32
    %c0_i32_1 = arith.constant 0 : i32
    %c0_i32_2 = arith.constant 0 : i32
    return %arg0, %2, %c0_i32_0, %c0_i32_1 : i32, i32, i32, i32
  }
  func.func @transform_2(%arg0: i32, %arg1: i32) -> (i32, i32, i32, i32) {
    %c16_i32 = arith.constant 16 : i32
    %0 = arith.muli %arg1, %c16_i32 : i32
    %c16_i32_0 = arith.constant 16 : i32
    %1 = arith.addi %0, %c16_i32_0 : i32
    %c15_i32 = arith.constant 15 : i32
    %2 = arith.minsi %1, %c15_i32 : i32
    %c0_i32 = arith.constant 0 : i32
    %c0_i32_1 = arith.constant 0 : i32
    %c0_i32_2 = arith.constant 0 : i32
    return %arg0, %2, %c0_i32, %c0_i32_1 : i32, i32, i32, i32
  }
  func.func @transform_3(%arg0: i32, %arg1: i32) -> (i32, i32) {
    %c0_i32 = arith.constant 0 : i32
    %c0_i32_0 = arith.constant 0 : i32
    %c0_i32_1 = arith.constant 0 : i32
    return %c0_i32, %c0_i32_0 : i32, i32
  }
  func.func @transform_4(%arg0: i32, %arg1: i32) -> (i32, i32) {
    %c0_i32 = arith.constant 0 : i32
    %c0_i32_0 = arith.constant 0 : i32
    %c0_i32_1 = arith.constant 0 : i32
    return %c0_i32, %c0_i32_0 : i32, i32
  }
  func.func @transform_5(%arg0: i32, %arg1: i32) -> (i32, i32, i32) {
    %c0_i32 = arith.constant 0 : i32
    %c0_i32_0 = arith.constant 0 : i32
    %c0_i32_1 = arith.constant 0 : i32
    %c0_i32_2 = arith.constant 0 : i32
    return %c0_i32, %c0_i32_0, %c0_i32_1 : i32, i32, i32
  }
  func.func @transform_6(%arg0: i32, %arg1: i32) -> (i32, i32, i32, i32) {
    %c0_i32 = arith.constant 0 : i32
    %c0_i32_0 = arith.constant 0 : i32
    %c0_i32_1 = arith.constant 0 : i32
    return %arg0, %arg1, %c0_i32, %c0_i32_0 : i32, i32, i32, i32
  }
  func.func @transform_7(%arg0: i32, %arg1: i32) -> (i32, i32, i32, i32) {
    %c0_i32 = arith.constant 0 : i32
    %c0_i32_0 = arith.constant 0 : i32
    %c0_i32_1 = arith.constant 0 : i32
    return %arg0, %arg1, %c0_i32, %c0_i32_0 : i32, i32, i32, i32
  }
}

module attributes {stable_mosaic.version = 11 : i64} {
  func.func @kernel(%arg0: i32, %arg1: i32, %arg2: memref<1x16x16x128xbf16, #tpu.memory_space<vmem>>, %arg3: memref<1x1x16x128xbf16, #tpu.memory_space<vmem>>, %arg4: memref<1x1x16x128xbf16, #tpu.memory_space<vmem>>, %arg5: memref<1x128xf32, #tpu.memory_space<vmem>>, %arg6: memref<1x128xf32, #tpu.memory_space<vmem>>, %arg7: memref<3x384x128xbf16, #tpu.memory_space<vmem>>, %arg8: memref<1x128xf32, #tpu.memory_space<vmem>>, %arg9: memref<1x16x16x128xf32, #tpu.memory_space<vmem>>, %arg10: memref<18x16x384xbf16, #tpu.memory_space<vmem>>) attributes {dimension_semantics = [#tpu.dimension_semantics<parallel>, #tpu.dimension_semantics<parallel>], iteration_bounds = array<i64: 2, 1>, scalar_prefetch = 0 : i64, scratch_operands = 1 : i64, tpu.core_type = #tpu.core_type<tc>, window_params = [{transform_indices = @transform_0, window_bounds = array<i64: 1, 16, 16, 128>}, {transform_indices = @transform_1, window_bounds = array<i64: 1, 1, 16, 128>}, {transform_indices = @transform_2, window_bounds = array<i64: 1, 1, 16, 128>}, {pipeline_mode = #tpu.pipeline_mode<synchronous>, transform_indices = @transform_3, window_bounds = array<i64: 1, 128>}, {pipeline_mode = #tpu.pipeline_mode<synchronous>, transform_indices = @transform_4, window_bounds = array<i64: 1, 128>}, {pipeline_mode = #tpu.pipeline_mode<synchronous>, transform_indices = @transform_5, window_bounds = array<i64: 3, 384, 128>}, {pipeline_mode = #tpu.pipeline_mode<synchronous>, transform_indices = @transform_6, window_bounds = array<i64: 1, 128>}, {transform_indices = @transform_7, window_bounds = array<i64: 1, 16, 16, 128>}]} {
    %c0 = arith.constant 0 : index
    %c0_0 = arith.constant 0 : index
    %0 = vector.load %arg5[%c0, %c0_0] : memref<1x128xf32, #tpu.memory_space<vmem>>, vector<1x128xf32>
    %1 = vector.shape_cast %0 : vector<1x128xf32> to vector<1x1x128xf32>
    %c0_1 = arith.constant 0 : index
    %c0_2 = arith.constant 0 : index
    %2 = vector.load %arg6[%c0_1, %c0_2] : memref<1x128xf32, #tpu.memory_space<vmem>>, vector<1x128xf32>
    %3 = vector.shape_cast %2 : vector<1x128xf32> to vector<1x1x128xf32>
    %c0_i32 = arith.constant 0 : i32
    %4 = arith.cmpi sgt, %arg1, %c0_i32 : i32
    %5 = arith.extui %4 : i1 to i32
    %6 = arith.sitofp %5 : i32 to f32
    %c0_i32_3 = arith.constant 0 : i32
    %7 = arith.cmpi slt, %arg1, %c0_i32_3 : i32
    %8 = arith.extui %7 : i1 to i32
    %9 = arith.sitofp %8 : i32 to f32
    %c0_4 = arith.constant 0 : index
    %c0_5 = arith.constant 0 : index
    %c0_6 = arith.constant 0 : index
    %c0_7 = arith.constant 0 : index
    %10 = vector.load %arg3[%c0_4, %c0_5, %c0_6, %c0_7] : memref<1x1x16x128xbf16, #tpu.memory_space<vmem>>, vector<1x1x16x128xbf16>
    %11 = vector.shape_cast %10 : vector<1x1x16x128xbf16> to vector<1x16x128xbf16>
    %12 = arith.extf %11 : vector<1x16x128xbf16> to vector<1x16x128xf32>
    %13 = vector.broadcast %1 : vector<1x1x128xf32> to vector<1x16x128xf32>
    %14 = arith.mulf %12, %13 : vector<1x16x128xf32>
    %15 = vector.broadcast %3 : vector<1x1x128xf32> to vector<1x16x128xf32>
    %16 = arith.addf %14, %15 : vector<1x16x128xf32>
    %cst = arith.constant 0.000000e+00 : f32
    %17 = vector.broadcast %cst : f32 to vector<1x16x128xf32>
    %18 = arith.maximumf %16, %17 : vector<1x16x128xf32>
    %19 = vector.broadcast %6 : f32 to vector<1x16x128xf32>
    %20 = arith.mulf %18, %19 : vector<1x16x128xf32>
    %21 = arith.truncf %20 : vector<1x16x128xf32> to vector<1x16x128xbf16>
    %c0_8 = arith.constant 0 : index
    %c0_9 = arith.constant 0 : index
    %c0_10 = arith.constant 0 : index
    %c0_11 = arith.constant 0 : index
    %22 = vector.load %arg2[%c0_8, %c0_9, %c0_10, %c0_11] : memref<1x16x16x128xbf16, #tpu.memory_space<vmem>>, vector<1x16x16x128xbf16>
    %23 = vector.shape_cast %22 : vector<1x16x16x128xbf16> to vector<16x16x128xbf16>
    %24 = arith.extf %23 : vector<16x16x128xbf16> to vector<16x16x128xf32>
    %25 = vector.broadcast %1 : vector<1x1x128xf32> to vector<16x16x128xf32>
    %26 = arith.mulf %24, %25 : vector<16x16x128xf32>
    %27 = vector.broadcast %3 : vector<1x1x128xf32> to vector<16x16x128xf32>
    %28 = arith.addf %26, %27 : vector<16x16x128xf32>
    %cst_12 = arith.constant 0.000000e+00 : f32
    %29 = vector.broadcast %cst_12 : f32 to vector<16x16x128xf32>
    %30 = arith.maximumf %28, %29 : vector<16x16x128xf32>
    %31 = arith.truncf %30 : vector<16x16x128xf32> to vector<16x16x128xbf16>
    %c0_13 = arith.constant 0 : index
    %c0_14 = arith.constant 0 : index
    %c0_15 = arith.constant 0 : index
    %c0_16 = arith.constant 0 : index
    %32 = vector.load %arg4[%c0_13, %c0_14, %c0_15, %c0_16] : memref<1x1x16x128xbf16, #tpu.memory_space<vmem>>, vector<1x1x16x128xbf16>
    %33 = vector.shape_cast %32 : vector<1x1x16x128xbf16> to vector<1x16x128xbf16>
    %34 = arith.extf %33 : vector<1x16x128xbf16> to vector<1x16x128xf32>
    %35 = vector.broadcast %1 : vector<1x1x128xf32> to vector<1x16x128xf32>
    %36 = arith.mulf %34, %35 : vector<1x16x128xf32>
    %37 = vector.broadcast %3 : vector<1x1x128xf32> to vector<1x16x128xf32>
    %38 = arith.addf %36, %37 : vector<1x16x128xf32>
    %cst_17 = arith.constant 0.000000e+00 : f32
    %39 = vector.broadcast %cst_17 : f32 to vector<1x16x128xf32>
    %40 = arith.maximumf %38, %39 : vector<1x16x128xf32>
    %41 = vector.broadcast %9 : f32 to vector<1x16x128xf32>
    %42 = arith.mulf %40, %41 : vector<1x16x128xf32>
    %43 = arith.truncf %42 : vector<1x16x128xf32> to vector<1x16x128xbf16>
    %44 = tpu.concatenate %21, %31, %43 in 0 : vector<1x16x128xbf16>, vector<16x16x128xbf16>, vector<1x16x128xbf16> -> vector<18x16x128xbf16>
    %cst_18 = arith.constant 0.000000e+00 : bf16
    %45 = vector.broadcast %cst_18 : bf16 to vector<18x1x128xbf16>
    %46 = vector.extract_strided_slice %44 {offsets = [0, 0, 0], sizes = [18, 15, 128], strides = [1, 1, 1]} : vector<18x16x128xbf16> to vector<18x15x128xbf16>
    %47 = tpu.concatenate %45, %46 in 1 : vector<18x1x128xbf16>, vector<18x15x128xbf16> -> vector<18x16x128xbf16>
    %48 = vector.extract_strided_slice %44 {offsets = [0, 1, 0], sizes = [18, 15, 128], strides = [1, 1, 1]} : vector<18x16x128xbf16> to vector<18x15x128xbf16>
    %49 = tpu.concatenate %48, %45 in 1 : vector<18x15x128xbf16>, vector<18x1x128xbf16> -> vector<18x16x128xbf16>
    %c0_19 = arith.constant 0 : index
    %c0_20 = arith.constant 0 : index
    %c0_21 = arith.constant 0 : index
    %50 = vector.load %arg10[%c0_19, %c0_20, %c0_21] : memref<18x16x384xbf16, #tpu.memory_space<vmem>>, vector<18x16x128xbf16>
    tpu.vector_store %arg10[%c0_19, %c0_20, %c0_21], %47 {strides = array<i32>} : memref<18x16x384xbf16, #tpu.memory_space<vmem>>, vector<18x16x128xbf16>,
    %c0_22 = arith.constant 0 : index
    %c0_23 = arith.constant 0 : index
    %c128 = arith.constant 128 : index
    %51 = vector.load %arg10[%c0_22, %c0_23, %c128] : memref<18x16x384xbf16, #tpu.memory_space<vmem>>, vector<18x16x128xbf16>
    tpu.vector_store %arg10[%c0_22, %c0_23, %c128], %44 {strides = array<i32>} : memref<18x16x384xbf16, #tpu.memory_space<vmem>>, vector<18x16x128xbf16>,
    %c0_24 = arith.constant 0 : index
    %c0_25 = arith.constant 0 : index
    %c256 = arith.constant 256 : index
    %52 = vector.load %arg10[%c0_24, %c0_25, %c256] : memref<18x16x384xbf16, #tpu.memory_space<vmem>>, vector<18x16x128xbf16>
    tpu.vector_store %arg10[%c0_24, %c0_25, %c256], %49 {strides = array<i32>} : memref<18x16x384xbf16, #tpu.memory_space<vmem>>, vector<18x16x128xbf16>,
    %cst_26 = arith.constant 0.000000e+00 : f32
    %53 = vector.broadcast %cst_26 : f32 to vector<256x128xf32>
    %c0_27 = arith.constant 0 : index
    %c0_28 = arith.constant 0 : index
    %c0_29 = arith.constant 0 : index
    %54 = vector.load %arg10[%c0_27, %c0_28, %c0_29] : memref<18x16x384xbf16, #tpu.memory_space<vmem>>, vector<16x16x384xbf16>
    %55 = vector.shape_cast %54 : vector<16x16x384xbf16> to vector<256x384xbf16>
    %c0_30 = arith.constant 0 : index
    %c0_31 = arith.constant 0 : index
    %c0_32 = arith.constant 0 : index
    %56 = vector.load %arg7[%c0_30, %c0_31, %c0_32] : memref<3x384x128xbf16, #tpu.memory_space<vmem>>, vector<1x384x128xbf16>
    %57 = vector.shape_cast %56 : vector<1x384x128xbf16> to vector<384x128xbf16>
    %cst_33 = arith.constant dense<0.000000e+00> : vector<256x128xf32>
    %58 = tpu.matmul %55, %57, %cst_33 {dimension_numbers = #tpu.dot_dimension_numbers<[1], [0], [0], [1], [0, 0, 1, 1], [], []>} : vector<256x384xbf16>, vector<384x128xbf16>, vector<256x128xf32> -> vector<256x128xf32>
    %59 = arith.addf %53, %58 : vector<256x128xf32>
    %c1 = arith.constant 1 : index
    %c0_34 = arith.constant 0 : index
    %c0_35 = arith.constant 0 : index
    %60 = vector.load %arg10[%c1, %c0_34, %c0_35] : memref<18x16x384xbf16, #tpu.memory_space<vmem>>, vector<16x16x384xbf16>
    %61 = vector.shape_cast %60 : vector<16x16x384xbf16> to vector<256x384xbf16>
    %c1_36 = arith.constant 1 : index
    %c0_37 = arith.constant 0 : index
    %c0_38 = arith.constant 0 : index
    %62 = vector.load %arg7[%c1_36, %c0_37, %c0_38] : memref<3x384x128xbf16, #tpu.memory_space<vmem>>, vector<1x384x128xbf16>
    %63 = vector.shape_cast %62 : vector<1x384x128xbf16> to vector<384x128xbf16>
    %cst_39 = arith.constant dense<0.000000e+00> : vector<256x128xf32>
    %64 = tpu.matmul %61, %63, %cst_39 {dimension_numbers = #tpu.dot_dimension_numbers<[1], [0], [0], [1], [0, 0, 1, 1], [], []>} : vector<256x384xbf16>, vector<384x128xbf16>, vector<256x128xf32> -> vector<256x128xf32>
    %65 = arith.addf %59, %64 : vector<256x128xf32>
    %c2 = arith.constant 2 : index
    %c0_40 = arith.constant 0 : index
    %c0_41 = arith.constant 0 : index
    %66 = vector.load %arg10[%c2, %c0_40, %c0_41] : memref<18x16x384xbf16, #tpu.memory_space<vmem>>, vector<16x16x384xbf16>
    %67 = vector.shape_cast %66 : vector<16x16x384xbf16> to vector<256x384xbf16>
    %c2_42 = arith.constant 2 : index
    %c0_43 = arith.constant 0 : index
    %c0_44 = arith.constant 0 : index
    %68 = vector.load %arg7[%c2_42, %c0_43, %c0_44] : memref<3x384x128xbf16, #tpu.memory_space<vmem>>, vector<1x384x128xbf16>
    %69 = vector.shape_cast %68 : vector<1x384x128xbf16> to vector<384x128xbf16>
    %cst_45 = arith.constant dense<0.000000e+00> : vector<256x128xf32>
    %70 = tpu.matmul %67, %69, %cst_45 {dimension_numbers = #tpu.dot_dimension_numbers<[1], [0], [0], [1], [0, 0, 1, 1], [], []>} : vector<256x384xbf16>, vector<384x128xbf16>, vector<256x128xf32> -> vector<256x128xf32>
    %71 = arith.addf %65, %70 : vector<256x128xf32>
    %c0_46 = arith.constant 0 : index
    %c0_47 = arith.constant 0 : index
    %72 = vector.load %arg8[%c0_46, %c0_47] : memref<1x128xf32, #tpu.memory_space<vmem>>, vector<1x128xf32>
    %73 = vector.broadcast %72 : vector<1x128xf32> to vector<256x128xf32>
    %74 = arith.addf %71, %73 : vector<256x128xf32>
    %75 = vector.shape_cast %74 : vector<256x128xf32> to vector<1x16x16x128xf32>
    %c0_48 = arith.constant 0 : index
    %c0_49 = arith.constant 0 : index
    %c0_50 = arith.constant 0 : index
    %c0_51 = arith.constant 0 : index
    %76 = vector.load %arg9[%c0_48, %c0_49, %c0_50, %c0_51] : memref<1x16x16x128xf32, #tpu.memory_space<vmem>>, vector<1x16x16x128xf32>
    tpu.vector_store %arg9[%c0_48, %c0_49, %c0_50, %c0_51], %75 {strides = array<i32>} : memref<1x16x16x128xf32, #tpu.memory_space<vmem>>, vector<1x16x16x128xf32>,
    return
  }
  func.func @transform_0(%arg0: i32, %arg1: i32) -> (i32, i32, i32, i32) {
    %c0_i32 = arith.constant 0 : i32
    %c0_i32_0 = arith.constant 0 : i32
    %c0_i32_1 = arith.constant 0 : i32
    return %arg0, %arg1, %c0_i32, %c0_i32_0 : i32, i32, i32, i32
  }
  func.func @transform_1(%arg0: i32, %arg1: i32) -> (i32, i32, i32, i32) {
    %c16_i32 = arith.constant 16 : i32
    %0 = arith.muli %arg1, %c16_i32 : i32
    %c1_i32 = arith.constant 1 : i32
    %1 = arith.subi %0, %c1_i32 : i32
    %c0_i32 = arith.constant 0 : i32
    %2 = arith.maxsi %1, %c0_i32 : i32
    %c0_i32_0 = arith.constant 0 : i32
    %c0_i32_1 = arith.constant 0 : i32
    %c0_i32_2 = arith.constant 0 : i32
    return %arg0, %2, %c0_i32_0, %c0_i32_1 : i32, i32, i32, i32
  }
  func.func @transform_2(%arg0: i32, %arg1: i32) -> (i32, i32, i32, i32) {
    %c16_i32 = arith.constant 16 : i32
    %0 = arith.muli %arg1, %c16_i32 : i32
    %c16_i32_0 = arith.constant 16 : i32
    %1 = arith.addi %0, %c16_i32_0 : i32
    %c15_i32 = arith.constant 15 : i32
    %2 = arith.minsi %1, %c15_i32 : i32
    %c0_i32 = arith.constant 0 : i32
    %c0_i32_1 = arith.constant 0 : i32
    %c0_i32_2 = arith.constant 0 : i32
    return %arg0, %2, %c0_i32, %c0_i32_1 : i32, i32, i32, i32
  }
  func.func @transform_3(%arg0: i32, %arg1: i32) -> (i32, i32) {
    %c0_i32 = arith.constant 0 : i32
    %c0_i32_0 = arith.constant 0 : i32
    %c0_i32_1 = arith.constant 0 : i32
    return %c0_i32, %c0_i32_0 : i32, i32
  }
  func.func @transform_4(%arg0: i32, %arg1: i32) -> (i32, i32) {
    %c0_i32 = arith.constant 0 : i32
    %c0_i32_0 = arith.constant 0 : i32
    %c0_i32_1 = arith.constant 0 : i32
    return %c0_i32, %c0_i32_0 : i32, i32
  }
  func.func @transform_5(%arg0: i32, %arg1: i32) -> (i32, i32, i32) {
    %c0_i32 = arith.constant 0 : i32
    %c0_i32_0 = arith.constant 0 : i32
    %c0_i32_1 = arith.constant 0 : i32
    %c0_i32_2 = arith.constant 0 : i32
    return %c0_i32, %c0_i32_0, %c0_i32_1 : i32, i32, i32
  }
  func.func @transform_6(%arg0: i32, %arg1: i32) -> (i32, i32) {
    %c0_i32 = arith.constant 0 : i32
    %c0_i32_0 = arith.constant 0 : i32
    %c0_i32_1 = arith.constant 0 : i32
    return %c0_i32, %c0_i32_0 : i32, i32
  }
  func.func @transform_7(%arg0: i32, %arg1: i32) -> (i32, i32, i32, i32) {
    %c0_i32 = arith.constant 0 : i32
    %c0_i32_0 = arith.constant 0 : i32
    %c0_i32_1 = arith.constant 0 : i32
    return %arg0, %arg1, %c0_i32, %c0_i32_0 : i32, i32, i32, i32
  }
}

</mosaic_0001>

<bundles_post_ra>
// kernel: resnet_v2_block.3
= control target key start
LH: loop header
LB: loop body
LE: loop exit
PB: predicated region body
PF: predicated region fallthrough
CT: control target
= control target key end

     0   :  { %s514_s6 = smov 0   ;;  %s516_s7 = smov 0   ;;  %s778_s0 = inlined_call_operand.vmem [shape: f32[2,16,16,8], index: 0, kind: input, shape index: {}]   ;;  %s779_s1 = inlined_call_operand.vmem [shape: f32[2,1,2,8], index: 1, kind: output, shape index: {}]  }
   0x1   :  { %s518_s8 = smov 0  }
   0x2 LB: > { %s23_s9 = sadd.s32 1, %s498_s7  ;;  %p449_p0 = scmp.ge.s32.totalorder %s502_s8, 1  ;;  %s502_s8 = sphi %s518_s8, %s11_s8   ;;  %s498_s7 = sphi %s516_s7, %s781_s7   ;;  %s494_s6 = sphi %s514_s6, %s780_s6  }
   0x3   : > { %p25_p1 = scmp.ge.s32.totalorder %s23_s9, 2  ;;  %p109_p2 = scmp.lt.s32.totalorder %s502_s8, 3 }
   0x5   : > { %s783_s9 = smov (%p25_p1, %s23_s9), 0  ;;  %p110_p3 = pnand %p449_p0, %p109_p2 }
   0x6   : > { %p137_p4 = scmp.lt.s32.totalorder (!%p110_p3), %s494_s6, 1 }
   0x7   : > { %113 = sbr.rel (%p110_p3) target bundleno = 82 (0x52), region = 24 }
   0xc   : > { %s785_s6 = smov (!%p137_p4, %s494_s6), 1  ;;  %vm186_vm0 = vcmask 64512   ;;  %vm361_vm1 = vcmask 1040384   ;;  %vm363_vm2 = vcmask 58368  }
   0xd   : > { %s455_s10 = sshll.u32 %s785_s6, 8  ;;  %s452_s14 = sshll.u32 %s785_s6, 1 }
   0xe   : > { %s538_s13 = scalar_lea.vmem %s778_s0, %s455_s10  ;;  %s153_s17 = scalar_lea.vmem %s779_s1, %s452_s14 }
   0xf   : > { %v154_v0 = vld [vmem:[%s538_s13] sm:$0xff]  ;;  %v542_v1 = vld [vmem:[%s538_s13 + $0x8] sm:$0xff]  ;;  %v156_v2 = vld [vmem:[%s538_s13 + $0x10] sm:$0xff] }
  0x10   : > { %v546_v3 = vld [vmem:[%s538_s13 + $0x18] sm:$0xff]  ;;  %v158_v4 = vld [vmem:[%s538_s13 + $0x20] sm:$0xff]  ;;  %v550_v5 = vld [vmem:[%s538_s13 + $0x28] sm:$0xff]  ;;  %v187_v6 = vsel %vm186_vm0, %v154_v0, 0.0  ;;  %v188_v7 = vsel %vm186_vm0, %v156_v2, 0.0  ;;  %v218_v8 = vsel %vm186_vm0, %v542_v1, 0.0  ;;  %v258_v59 = vmul.f32 %v154_v0, %v154_v0 }
  0x11   : > { %v160_v9 = vld [vmem:[%s538_s13 + $0x30] sm:$0xff]  ;;  %v189_v10 = vadd.f32 %v188_v7, %v187_v6  ;;  %v190_v11 = vsel %vm186_vm0, %v158_v4, 0.0  ;;  %v219_v12 = vsel %vm186_vm0, %v546_v3, 0.0  ;;  %v221_v13 = vsel %vm186_vm0, %v550_v5, 0.0  ;;  %v563_v14 = vld [vmem:[%s538_s13 + $0x38] sm:$0xff]  ;;  %v162_v17 = vld [vmem:[%s538_s13 + $0x40] sm:$0xff] }
  0x12   : > { %v192_v15 = vsel %vm186_vm0, %v160_v9, 0.0  ;;  %v220_v16 = vadd.f32 %v219_v12, %v218_v8  ;;  %v223_v19 = vsel %vm186_vm0, %v563_v14, 0.0  ;;  %v570_v20 = vld [vmem:[%s538_s13 + $0x48] sm:$0xff]  ;;  %v194_v21 = vsel %vm186_vm0, %v162_v17, 0.0  ;;  %v574_v23 = vld [vmem:[%s538_s13 + $0x50] sm:$0xff]  ;;  %v579_v26 = vld [vmem:[%s538_s13 + $0x58] sm:$0xff] }
  0x13   : > { %v191_v18 = vadd.f32 %v190_v11, %v189_v10  ;;  %v225_v25 = vsel %vm186_vm0, %v570_v20, 0.0  ;;  %v196_v27 = vsel %vm186_vm0, %v574_v23, 0.0  ;;  %v584_v29 = vld [vmem:[%s538_s13 + $0x60] sm:$0xff]  ;;  %v227_v31 = vsel %vm186_vm0, %v579_v26, 0.0  ;;  %v589_v32 = vld [vmem:[%s538_s13 + $0x68] sm:$0xff]  ;;  %v594_v35 = vld [vmem:[%s538_s13 + $0x70] sm:$0xff] }
  0x14   : > { %v222_v22 = vadd.f32 %v221_v13, %v220_v16  ;;  %v198_v33 = vsel %vm186_vm0, %v584_v29, 0.0  ;;  %v229_v37 = vsel %vm186_vm0, %v589_v32, 0.0  ;;  %v599_v38 = vld [vmem:[%s538_s13 + $0x78] sm:$0xff]  ;;  %v200_v39 = vsel %vm186_vm0, %v594_v35, 0.0  ;;  %v604_v41 = vld [vmem:[%s538_s13 + $0x80] sm:$0xff]  ;;  %v609_v44 = vld [vmem:[%s538_s13 + $0x88] sm:$0xff] }
  0x15   : > { %v193_v24 = vadd.f32 %v192_v15, %v191_v18  ;;  %v231_v43 = vsel %vm186_vm0, %v599_v38, 0.0  ;;  %v202_v45 = vsel %vm186_vm0, %v604_v41, 0.0  ;;  %v614_v47 = vld [vmem:[%s538_s13 + $0x90] sm:$0xff]  ;;  %v233_v49 = vsel %vm186_vm0, %v609_v44, 0.0  ;;  %v619_v50 = vld [vmem:[%s538_s13 + $0x98] sm:$0xff]  ;;  %v624_v53 = vld [vmem:[%s538_s13 + $0xa0] sm:$0xff] }
  0x16   : > { %v224_v28 = vadd.f32 %v223_v19, %v222_v22  ;;  %v204_v51 = vsel %vm186_vm0, %v614_v47, 0.0  ;;  %v235_v55 = vsel %vm186_vm0, %v619_v50, 0.0  ;;  %v629_v56 = vld [vmem:[%s538_s13 + $0xa8] sm:$0xff]  ;;  %v206_v57 = vsel %vm186_vm0, %v624_v53, 0.0  ;;  %v636_v6 = vld [vmem:[%s538_s13 + $0xb0] sm:$0xff]  ;;  %v639_v7 = vld [vmem:[%s538_s13 + $0xb8] sm:$0xff] }
  0x17   : > { %v195_v30 = vadd.f32 %v194_v21, %v193_v24  ;;  %v237_v61 = vsel %vm186_vm0, %v629_v56, 0.0  ;;  %v260_v62 = vmul.f32 %v156_v2, %v156_v2  ;;  %v262_v63 = vmul.f32 %v158_v4, %v158_v4  ;;  %v642_v10 = vld [vmem:[%s538_s13 + $0xc0] sm:$0xff]  ;;  %v651_v15 = vld [vmem:[%s538_s13 + $0xc8] sm:$0xff] }
  0x18   : > { %v226_v34 = vadd.f32 %v225_v25, %v224_v28  ;;  %v208_v12 = vsel %vm186_vm0, %v636_v6, 0.0  ;;  %v239_v0 = vsel %vm186_vm0, %v639_v7, 0.0  ;;  %v264_v13 = vmul.f32 %v160_v9, %v160_v9  ;;  %v662_v28 = vld [vmem:[%s538_s13 + $0xe0] sm:$0xff] }
  0x19   : > { %v197_v36 = vadd.f32 %v196_v27, %v195_v30  ;;  %v210_v2 = vsel %vm186_vm0, %v642_v10, 0.0  ;;  %v266_v16 = vmul.f32 %v162_v17, %v162_v17  ;;  %v290_v18 = vsel %vm186_vm0, %v258_v59, 0.0  ;;  %v659_v27 = vld [vmem:[%s538_s13 + $0xd0] sm:$0xff] }
  0x1a   : > { %v228_v40 = vadd.f32 %v227_v31, %v226_v34  ;;  %v291_v19 = vsel %vm186_vm0, %v260_v62, 0.0  ;;  %v293_v21 = vsel %vm186_vm0, %v262_v63, 0.0  ;;  %v241_v25 = vsel %vm186_vm0, %v651_v15, 0.0  ;;  %v672_v34 = vld [vmem:[%s538_s13 + $0xd8] sm:$0xff] }
  0x1b   : > { %v199_v42 = vadd.f32 %v198_v33, %v197_v36  ;;  %v292_v9 = vadd.f32 %v291_v19, %v290_v18  ;;  %v259_v30 = vmul.f32 %v542_v1, %v542_v1  ;;  %v261_v17 = vmul.f32 %v546_v3, %v546_v3 }
  0x1c   : > { %v230_v46 = vadd.f32 %v229_v37, %v228_v40  ;;  %v268_v31 = vmul.f32 %v574_v23, %v574_v23  ;;  %v295_v33 = vsel %vm186_vm0, %v264_v13, 0.0  ;;  %v212_v36 = vsel %vm186_vm0, %v659_v27, 0.0 }
  0x1d   : > { %v201_v48 = vadd.f32 %v200_v39, %v199_v42  ;;  %v214_v37 = vsel %vm186_vm0, %v662_v28, 0.0  ;;  %v263_v1 = vmul.f32 %v550_v5, %v550_v5  ;;  %v294_v39 = vadd.f32 %v293_v21, %v292_v9 }
  0x1e   : > { %v232_v52 = vadd.f32 %v231_v43, %v230_v46  ;;  %v243_v3 = vsel %vm186_vm0, %v672_v34, 0.0  ;;  %v265_v23 = vmul.f32 %v563_v14, %v563_v14  ;;  %v270_v40 = vmul.f32 %v584_v29, %v584_v29 }
  0x1f   : > { %v203_v54 = vadd.f32 %v202_v45, %v201_v48  ;;  %v297_v42 = vsel %vm186_vm0, %v266_v16, 0.0  ;;  %v267_v46 = vmul.f32 %v570_v20, %v570_v20  ;;  %v296_v48 = vadd.f32 %v295_v33, %v294_v39 }
  0x20   : > { %v234_v58 = vadd.f32 %v233_v49, %v232_v52  ;;  %v690_v49 = vld [vmem:[%s538_s13 + $0xe8] sm:$0xff]  ;;  %v272_v5 = vmul.f32 %v594_v35, %v594_v35  ;;  %v321_v14 = vsel %vm186_vm0, %v259_v30, 0.0  ;;  %v322_v29 = vsel %vm186_vm0, %v261_v17, 0.0 }
  0x21   : > { %v205_v60 = vadd.f32 %v204_v51, %v203_v54  ;;  %v299_v51 = vsel %vm186_vm0, %v268_v31, 0.0  ;;  %v245_v52 = vsel %vm186_vm0, %v690_v49, 0.0  ;;  %v298_v54 = vadd.f32 %v297_v42, %v296_v48 }
  0x22   : > { %v236_v8 = vadd.f32 %v235_v55, %v234_v58  ;;  %v323_v55 = vadd.f32 %v322_v29, %v321_v14  ;;  %v324_v20 = vsel %vm186_vm0, %v263_v1, 0.0  ;;  %v274_v35 = vmul.f32 %v604_v41, %v604_v41 }
  0x23   : > { %v207_v11 = vadd.f32 %v206_v57, %v205_v60  ;;  %v269_v57 = vmul.f32 %v579_v26, %v579_v26  ;;  %v301_v58 = vsel %vm186_vm0, %v270_v40, 0.0  ;;  %v326_v59 = vsel %vm186_vm0, %v265_v23, 0.0 }
  0x24   : > { %v238_v4 = vadd.f32 %v237_v61, %v236_v8  ;;  %v300_v62 = vadd.f32 %v299_v51, %v298_v54  ;;  %v325_v63 = vadd.f32 %v324_v20, %v323_v55  ;;  %v184_v8 = vld [vmem:[%s538_s13 + $0xf0] sm:$0xff]  ;;  %v303_v26 = vsel %vm186_vm0, %v272_v5, 0.0 }
  0x25   : > { %v209_v22 = vadd.f32 %v208_v12, %v207_v11  ;;  %v185_v11 = vld [vmem:[%s538_s13 + $0xf8] sm:$0xff]  ;;  %v271_v12 = vmul.f32 %v589_v32, %v589_v32  ;;  %v328_v41 = vsel %vm186_vm0, %v267_v46, 0.0  ;;  %v216_v13 = vsel %vm186_vm0, %v184_v8, 0.0 }
  0x26   : > { %v240_v24 = vadd.f32 %v239_v0, %v238_v4  ;;  %v276_v0 = vmul.f32 %v614_v47, %v614_v47  ;;  %v302_v4 = vadd.f32 %v301_v58, %v300_v62  ;;  %v327_v16 = vadd.f32 %v326_v59, %v325_v63 }
  0x27   : > { %v211_v43 = vadd.f32 %v210_v2, %v209_v22  ;;  %v247_v2 = vsel %vm186_vm0, %v185_v11, 0.0  ;;  %v273_v18 = vmul.f32 %v599_v38, %v599_v38  ;;  %v278_v19 = vmul.f32 %v624_v53, %v624_v53 }
  0x28   : > { %v242_v45 = vadd.f32 %v241_v25, %v240_v24  ;;  %v305_v32 = vsel %vm186_vm0, %v274_v35, 0.0  ;;  %v330_v47 = vsel %vm186_vm0, %v269_v57, 0.0  ;;  %v304_v24 = vadd.f32 %v303_v26, %v302_v4 }
  0x29   : > { %v213_v60 = vadd.f32 %v212_v36, %v211_v43  ;;  %v329_v25 = vadd.f32 %v328_v41, %v327_v16  ;;  %v275_v9 = vmul.f32 %v609_v44, %v609_v44  ;;  %v280_v30 = vmul.f32 %v636_v6, %v636_v6 }
  0x2a   : > { %v244_v61 = vadd.f32 %v243_v3, %v242_v45  ;;  %v307_v17 = vsel %vm186_vm0, %v276_v0, 0.0  ;;  %v332_v38 = vsel %vm186_vm0, %v271_v12, 0.0  ;;  %v306_v31 = vadd.f32 %v305_v32, %v304_v24 }
  0x2b   : > { %v215_v21 = vadd.f32 %v214_v37, %v213_v60  ;;  %v331_v53 = vadd.f32 %v330_v47, %v329_v25  ;;  %v277_v33 = vmul.f32 %v619_v50, %v619_v50  ;;  %v282_v36 = vmul.f32 %v642_v10, %v642_v10 }
  0x2c   : > { %v246_v22 = vadd.f32 %v245_v52, %v244_v61  ;;  %v309_v37 = vsel %vm186_vm0, %v278_v19, 0.0  ;;  %v334_v1 = vsel %vm186_vm0, %v273_v18, 0.0  ;;  %v308_v3 = vadd.f32 %v307_v17, %v306_v31 }
  0x2d   : > { %v217_v44 = vadd.f32 %v216_v13, %v215_v21  ;;  %v333_v6 = vadd.f32 %v332_v38, %v331_v53  ;;  %v279_v23 = vmul.f32 %v629_v56, %v629_v56  ;;  %v284_v40 = vmul.f32 %v659_v27, %v659_v27 }
  0x2e   : > { %v248_v39 = vadd.f32 %v247_v2, %v246_v22  ;;  %v311_v42 = vsel %vm186_vm0, %v280_v30, 0.0  ;;  %v336_v50 = vsel %vm186_vm0, %v275_v9, 0.0  ;;  %v310_v43 = vadd.f32 %v309_v37, %v308_v3 }
  0x2f   : > { %v335_v10 = vadd.f32 %v334_v1, %v333_v6  ;;  %v281_v45 = vmul.f32 %v639_v7, %v639_v7  ;;  %v286_v46 = vmul.f32 %v662_v28, %v662_v28  ;;  %v313_v48 = vsel %vm186_vm0, %v282_v36, 0.0 }
  0x30   : > { %v338_v5 = vsel %vm186_vm0, %v277_v33, 0.0  ;;  %v249_v56 = vsel %vm186_vm0, %v217_v44, 0.0  ;;  %v250_v27 = vsel %vm186_vm0, %v248_v39, 0.0  ;;  %v312_v51 = vadd.f32 %v311_v42, %v310_v43 }
  0x31   : > { %v337_v14 = vadd.f32 %v336_v50, %v335_v10  ;;  %v283_v29 = vmul.f32 %v651_v15, %v651_v15  ;;  %v315_v52 = vsel %vm186_vm0, %v284_v40, 0.0  ;;  %v340_v7 = vsel %vm186_vm0, %v279_v23, 0.0 }
  0x32   : > { %v285_v28 = vmul.f32 %v672_v34, %v672_v34  ;;  %v314_v54 = vadd.f32 %v313_v48, %v312_v51  ;;  %v251_v20 = vadd.f32 %v250_v27, %v249_v56  ;;  %v288_v57 = vmul.f32 %v184_v8, %v184_v8 }
  0x33   : > { %v339_v55 = vadd.f32 %v338_v5, %v337_v14  ;;  %v317_v35 = vsel %vm186_vm0, %v286_v46, 0.0  ;;  %v342_v58 = vsel %vm186_vm0, %v281_v45, 0.0  ;;  %v287_v15 = vmul.f32 %v690_v49, %v690_v49 }
  0x34   : > { %v316_v59 = vadd.f32 %v315_v52, %v314_v54  ;;  %v344_v61 = vsel %vm186_vm0, %v283_v29, 0.0  ;;  %v252_v12 = vrot.slane %v251_v20, 4  ;;  %v289_v0 = vmul.f32 %v185_v11, %v185_v11 }
  0x35   : > { %v341_v60 = vadd.f32 %v340_v7, %v339_v55  ;;  %v319_v34 = vsel %vm186_vm0, %v288_v57, 0.0  ;;  %v346_v26 = vsel %vm186_vm0, %v285_v28, 0.0  ;;  %v348_v41 = vsel %vm186_vm0, %v287_v15, 0.0 }
  0x36   : > { %v318_v62 = vadd.f32 %v317_v35, %v316_v59  ;;  %v253_v4 = vadd.f32 %v252_v12, %v251_v20  ;;  %v350_v16 = vsel %vm186_vm0, %v289_v0, 0.0 }
  0x37   : > { %v343_v63 = vadd.f32 %v342_v58, %v341_v60 }
  0x38   : > { %v320_v13 = vadd.f32 %v319_v34, %v318_v62  ;;  %v254_v32 = vrot.slane %v253_v4, 2 }
  0x39   : > { %v345_v8 = vadd.f32 %v344_v61, %v343_v63 }
  0x3a   : > { %v352_v19 = vsel %vm186_vm0, %v320_v13, 0.0  ;;  %v255_v21 = vadd.f32 %v254_v32, %v253_v4 }
  0x3b   : > { %v347_v2 = vadd.f32 %v346_v26, %v345_v8 }
  0x3c   : > { %v256_v25 = vrot.slane %v255_v21, 1 }
  0x3d   : > { %v349_v49 = vadd.f32 %v348_v41, %v347_v2 }
  0x3e   : > { %v257_v17 = vadd.f32 %v256_v25, %v255_v21 }
  0x3f   : > { %v351_v18 = vadd.f32 %v350_v16, %v349_v49 }
  0x41   : > { %v353_v11 = vsel %vm186_vm0, %v351_v18, 0.0 }
  0x42   : > { %v354_v47 = vadd.f32 %v353_v11, %v352_v19 }
  0x44   : > { %v355_v22 = vrot.slane %v354_v47, 4 }
  0x46   : > { %v356_v24 = vadd.f32 %v355_v22, %v354_v47 }
  0x48   : > { %v357_v9 = vrot.slane %v356_v24, 2 }
  0x4a   : > { %v358_v30 = vadd.f32 %v357_v9, %v356_v24 }
  0x4c   : > { %v359_v38 = vrot.slane %v358_v30, 1 }
  0x4e   : > { %v360_v31 = vadd.f32 %v359_v38, %v358_v30 }
  0x50   : > { %v362_v53 = vsel %vm361_vm1, %v257_v17, %v360_v31 }
  0x51   : > { %364 = vst.msk [vmem:[%s153_s17] sm:$0x3] %vm363_vm2, %v362_v53 }
  0x52 PF: > { %s11_s8 = sadd.s32 1, %s502_s8   ;;  %s780_s6 = smov %s498_s7 }
  0x53   : > { %p8_p5 = scmp.ge.s32.totalorder %s11_s8, 4   ;;  %s781_s7 = smov %s783_s9 }
  0x55   :  { %10 = sbr.rel (!%p8_p5) target bundleno = 2 (0x2), region = 54 }

// kernel: resnet_v2_block.4
= control target key start
LH: loop header
LB: loop body
LE: loop exit
PB: predicated region body
PF: predicated region fallthrough
CT: control target
= control target key end

     0   :  { %s3083_s24 = smov 0   ;;  %s3085_s25 = smov 0   ;;  %s3845_s0 = inlined_call_operand.vmem [shape: f32[2,16,16,8], index: 0, kind: input, shape index: {}, may-alias: {0,1,2}]   ;;  %s3846_s1 = inlined_call_operand.vmem [shape: f32[2,16,16,8], index: 1, kind: input, shape index: {}, may-alias: {0,1,2}]   ;;  %s3847_s2 = inlined_call_operand.vmem [shape: f32[2,16,16,8], index: 2, kind: input, shape index: {}, may-alias: {0,1,2}]   ;;  %s3848_s3 = inlined_call_operand.vmem [shape: f32[1,8], index: 3, kind: input, shape index: {}]   ;;  %s3849_s4 = inlined_call_operand.vmem [shape: f32[1,8], index: 4, kind: input, shape index: {}]   ;;  %s3850_s5 = inlined_call_operand.vmem [shape: bf16[3,24,128], index: 5, kind: input, shape index: {}]   ;;  %s3851_s6 = inlined_call_operand.vmem [shape: bf16[2,16,16,128], index: 6, kind: output, shape index: {0}]   ;;  %s3852_s7 = inlined_call_operand.vmem [shape: f32[2,1,2,128], index: 7, kind: output, shape index: {1}]  }
   0x1   :  { %s3087_s26 = smov 0  }
   0x2 LB: > { %s30_s27 = sadd.s32 1, %s3035_s25  ;;  %p2560_p0 = scmp.ge.s32.totalorder %s3039_s26, 1  ;;  %s3039_s26 = sphi %s3087_s26, %s18_s26   ;;  %s3035_s25 = sphi %s3085_s25, %s3864_s25   ;;  %s3031_s24 = sphi %s3083_s24, %s3863_s24  }
   0x3   : > { %p32_p1 = scmp.ge.s32.totalorder %s30_s27, 2  ;;  %p328_p2 = scmp.lt.s32.totalorder %s3039_s26, 3 }
   0x5   : > { %s3866_s27 = smov (%p32_p1, %s30_s27), 0  ;;  %p329_p3 = pnand %p2560_p0, %p328_p2 }
   0x6   : > { %p404_p4 = scmp.lt.s32.totalorder (!%p329_p3), %s3031_s24, 1  ;;  %s3041_s16 = smov (!%p329_p3), 8  }
   0x7   : > { %332 = sbr.rel (%p329_p3) target bundleno = 521 (0x209), region = 44  ;;  %s3042_s17 = smov (!%p329_p3), 16  }
   0xc   : > { %s3868_s24 = smov (!%p404_p4, %s3031_s24), 1  ;;  %v3106_v0 = vld [vmem:[%s3848_s3] ss:$0 sm:$0xff]  ;;  %vm976_vm0 = vcmask 1047552   ;;  %vm977_vm1 = vsmask.f32 7424 }
   0xd   : > { %s3109_s30 = sshll.u32 %s3868_s24, 8  ;;  %v3120_v1 = vld [vmem:[%s3849_s4] ss:$0 sm:$0xff]  ;;  %vm3173_vm2 = vmand %vm976_vm0, %vm977_vm1  ;;  %vm1552_vm3 = vcmask 1043456   ;;  %vm901_vm4 = vcmask 1040384   ;;  %vm1142_vm7 = vcmask 130048  }
   0xe   : > { %s3115_s10 = scalar_lea.vmem %s3845_s0, %s3109_s30  ;;  %s426_s15 = scalar_lea.vmem %s3846_s1, %s3109_s30  ;;  %vm902_vm5 = vsmask.f32 256  ;;  %vm1087_vm8 = vcmask 64512   ;;  %vm1305_vm9 = vcmask 191488   ;;  %vm1503_vm10 = vcmask 195584  }
   0xf   : > { %v496_v2 = vld [vmem:[%s3115_s10 + $0x10] sm:$0xff]  ;;  %v497_v3 = vld [vmem:[%s3115_s10 + $0x18] sm:$0xff]  ;;  %v475_v4 = vld [vmem:[%s426_s15] sm:$0xff]  ;;  %s2569_s21 = sshll.u32 %s3868_s24, 1 }
  0x10   : > { %v528_v5 = vmul.f32 %v3106_v0, %v496_v2  ;;  %v529_v6 = vmul.f32 %v3106_v0, %v497_v3  ;;  %v476_v7 = vld [vmem:[%s426_s15 + $0x8] sm:$0xff]  ;;  %v480_v8 = vmul.f32 %v3106_v0, %v475_v4  ;;  %v494_v9 = vld [vmem:[%s3115_s10] sm:$0xff]  ;;  %v500_v48 = vld [vmem:[%s3115_s10 + $0x30] sm:$0xff]  ;;  %s465_s28 = scalar_lea.vmem %s3852_s7, %s2569_s21 }
  0x11   : > { %v495_v10 = vld [vmem:[%s3115_s10 + $0x8] sm:$0xff]  ;;  %v481_v11 = vmul.f32 %v3106_v0, %v476_v7  ;;  %v526_v12 = vmul.f32 %v3106_v0, %v494_v9  ;;  %v498_v14 = vld [vmem:[%s3115_s10 + $0x20] sm:$0xff]  ;;  %v501_v53 = vld [vmem:[%s3115_s10 + $0x38] sm:$0xff]  ;;  %v532_v61 = vmul.f32 %v3106_v0, %v500_v48 }
  0x12   : > { %v527_v13 = vmul.f32 %v3106_v0, %v495_v10  ;;  %v499_v15 = vld [vmem:[%s3115_s10 + $0x28] sm:$0xff]  ;;  %v560_v16 = vadd.f32 %v3120_v1, %v528_v5  ;;  %v561_v17 = vadd.f32 %v3120_v1, %v529_v6  ;;  %v485_v18 = vadd.f32 %v3120_v1, %v480_v8  ;;  %v518_v40 = vld [vmem:[%s3115_s10 + $0xc0] sm:$0xff]  ;;  %vm3475_vm6 = vmand %vm901_vm4, %vm902_vm5 }
  0x13   : > { %v530_v19 = vmul.f32 %v3106_v0, %v498_v14  ;;  %v486_v20 = vadd.f32 %v3120_v1, %v481_v11  ;;  %v558_v21 = vadd.f32 %v3120_v1, %v526_v12  ;;  %v531_v23 = vmul.f32 %v3106_v0, %v499_v15  ;;  %v519_v45 = vld [vmem:[%s3115_s10 + $0xc8] sm:$0xff] }
  0x14   : > { %v559_v22 = vadd.f32 %v3120_v1, %v527_v13  ;;  %v592_v24 = vmax.f32 %v560_v16, 0.0  ;;  %v593_v25 = vmax.f32 %v561_v17, 0.0  ;;  %v487_v26 = vmax.f32 %v485_v18, 0.0 }
  0x15   : > { %v562_v27 = vadd.f32 %v3120_v1, %v530_v19  ;;  %v488_v28 = vmax.f32 %v486_v20, 0.0  ;;  %v590_v29 = vmax.f32 %v558_v21, 0.0  ;;  %v563_v31 = vadd.f32 %v3120_v1, %v531_v23  ;;  %v520_v20 = vld [vmem:[%s3115_s10 + $0xd0] sm:$0xff]  ;;  %v521_v21 = vld [vmem:[%s3115_s10 + $0xd8] sm:$0xff] }
  0x16   : > { %v591_v30 = vmax.f32 %v559_v22, 0.0  ;;  %v624_v32 = vpack.c.bf16 %v592_v24, %v592_v24  ;;  %v625_v33 = vpack.c.bf16 %v593_v25, %v593_v25  ;;  %v490_v34 = vmul.f32 0.0, %v487_v26 }
  0x17   : > { %v594_v35 = vmax.f32 %v562_v27, 0.0  ;;  %v491_v36 = vmul.f32 0.0, %v488_v28  ;;  %v622_v37 = vpack.c.bf16 %v590_v29, %v590_v29  ;;  %v595_v39 = vmax.f32 %v563_v31, 0.0 }
  0x18   : > { %v623_v38 = vpack.c.bf16 %v591_v30, %v591_v30  ;;  %v707_v41 = vunpack.c.l.b16 %v624_v32  ;;  %v708_v42 = vunpack.c.l.b16 %v625_v33  ;;  %v492_v43 = vpack.c.bf16 %v490_v34, %v490_v34 }
  0x19   : > { %v626_v44 = vpack.c.bf16 %v594_v35, %v594_v35  ;;  %v493_v46 = vpack.c.bf16 %v491_v36, %v491_v36  ;;  %v627_v47 = vpack.c.bf16 %v595_v39, %v595_v39  ;;  %v705_v51 = vunpack.c.l.b16 %v622_v37 }
  0x1a   : > { %v3151_v49 = vpack.c.b16 %v708_v42, %v707_v41  ;;  %v703_v50 = vunpack.c.l.b16 %v492_v43  ;;  %v550_v52 = vmul.f32 %v3106_v0, %v518_v40  ;;  %v706_v55 = vunpack.c.l.b16 %v623_v38  ;;  %v502_v42 = vld [vmem:[%s3115_s10 + $0x40] sm:$0xff] }
  0x1b   : > { %v704_v54 = vunpack.c.l.b16 %v493_v46  ;;  %v709_v56 = vunpack.c.l.b16 %v626_v44  ;;  %v551_v57 = vmul.f32 %v3106_v0, %v519_v45  ;;  %v710_v63 = vunpack.c.l.b16 %v627_v47  ;;  %v503_v46 = vld [vmem:[%s3115_s10 + $0x48] sm:$0xff] }
  0x1c   : > { %1001 = vrot.lane.b32.xlu0 %v3151_v49, %s3041_s16  ;;  %v772_v58 = vshrl.u32 %v3151_v49, 16  ;;  %v775_v59 = vshll.u32 %v3151_v49, 16  ;;  %v582_v60 = vadd.f32 %v3120_v1, %v550_v52  ;;  %v533_v3 = vmul.f32 %v3106_v0, %v501_v53 }
  0x1d   : > { %v3162_v62 = vpack.c.b16 %v704_v54, %v703_v50  ;;  %v583_v2 = vadd.f32 %v3120_v1, %v551_v57  ;;  %v564_v6 = vadd.f32 %v3120_v1, %v532_v61  ;;  %v3182_v13 = vpack.c.b16 %v706_v55, %v705_v51  ;;  %v522_v55 = vld [vmem:[%s3115_s10 + $0xe0] sm:$0xff]  ;;  %v504_v61 = vld [vmem:[%s3115_s10 + $0x50] sm:$0xff] }
  0x1e   : > { %v926_v4 = vrot.slane %v775_v59, 1  ;;  %v614_v5 = vmax.f32 %v582_v60, 0.0  ;;  %v565_v11 = vadd.f32 %v3120_v1, %v533_v3  ;;  %v3184_v16 = vpack.c.b16 %v710_v63, %v709_v56  ;;  %v523_v60 = vld [vmem:[%s3115_s10 + $0xe8] sm:$0xff] }
  0x1f   : > { %997 = vrot.lane.b32.xlu1 %v3162_v62, %s3041_s16  ;;  %v615_v8 = vmax.f32 %v583_v2, 0.0  ;;  %v758_v9 = vshrl.u32 %v3162_v62, 16  ;;  %v761_v10 = vshll.u32 %v3162_v62, 16  ;;  %v596_v15 = vmax.f32 %v564_v6, 0.0 }
  0x20   : > { %v927_v12 = vor.u32 %v926_v4, %v772_v58  ;;  %v646_v14 = vpack.c.bf16 %v614_v5, %v614_v5  ;;  %v597_v19 = vmax.f32 %v565_v11, 0.0  ;;  %v768_v25 = vshll.u32 %v3182_v13, 16  ;;  %v505_v5 = vld [vmem:[%s3115_s10 + $0x58] sm:$0xff] }
  0x21   : > { %v647_v17 = vpack.c.bf16 %v615_v8, %v615_v8  ;;  %v922_v18 = vrot.slane %v761_v10, 1  ;;  %v628_v24 = vpack.c.bf16 %v596_v15, %v596_v15  ;;  %v765_v29 = vshrl.u32 %v3182_v13, 16 }
  0x22   : > { %v981_v22 = vsel %vm3173_vm2, %v927_v12, 0  ;;  %v729_v23 = vunpack.c.l.b16 %v646_v14  ;;  %v629_v28 = vpack.c.bf16 %v597_v19, %v597_v19  ;;  %v924_v31 = vrot.slane %v768_v25, 1 }
  0x23   : > { %v730_v26 = vunpack.c.l.b16 %v647_v17  ;;  %v923_v27 = vor.u32 %v922_v18, %v758_v9  ;;  %v711_v30 = vunpack.c.l.b16 %v628_v24  ;;  %v552_v32 = vmul.f32 %v3106_v0, %v520_v20 }
  0x24   : > { %1055 = vrot.lane.b32.xlu0 %v981_v22, %s3042_s17  ;;  %v553_v33 = vmul.f32 %v3106_v0, %v521_v21  ;;  %v712_v36 = vunpack.c.l.b16 %v629_v28  ;;  %v782_v39 = vshll.u32 %v3184_v16, 16  ;;  %v925_v41 = vor.u32 %v924_v31, %v765_v29 }
  0x25   : > { %v3201_v34 = vpack.c.b16 %v730_v26, %v729_v23  ;;  %v979_v35 = vsel %vm3173_vm2, %v923_v27, 0  ;;  %v584_v37 = vadd.f32 %v3120_v1, %v552_v32  ;;  %v779_v50 = vshrl.u32 %v3184_v16, 16 }
  0x26   : > { %1051 = vrot.lane.b32.xlu2 %v979_v35, %s3042_s17  ;;  %v585_v38 = vadd.f32 %v3120_v1, %v553_v33  ;;  %v3215_v43 = vpack.c.b16 %v712_v36, %v711_v30  ;;  %v928_v51 = vrot.slane %v782_v39, 1  ;;  %v534_v54 = vmul.f32 %v3106_v0, %v502_v42  ;;  %v524_v33 = vld [vmem:[%s3115_s10 + $0xf0] sm:$0xff]  ;;  %v525_v35 = vld [vmem:[%s3115_s10 + $0xf8] sm:$0xff] }
  0x27   : > { %999 = vrot.lane.b32.xlu1 %v3182_v13, %s3041_s16  ;;  %v852_v40 = vshll.u32 %v3201_v34, 16  ;;  %v616_v44 = vmax.f32 %v584_v37, 0.0  ;;  %v849_v47 = vshrl.u32 %v3201_v34, 16  ;;  %v980_v56 = vsel %vm3173_vm2, %v925_v41, 0 }
  0x28   : > { %v617_v45 = vmax.f32 %v585_v38, 0.0  ;;  %v535_v57 = vmul.f32 %v3106_v0, %v503_v46  ;;  %v789_v63 = vshll.u32 %v3215_v43, 16  ;;  %v566_v4 = vadd.f32 %v3120_v1, %v534_v54 }
  0x29   : > { %v948_v48 = vrot.slane %v852_v40, 1  ;;  %v648_v52 = vpack.c.bf16 %v616_v44, %v616_v44  ;;  %v929_v8 = vor.u32 %v928_v51, %v779_v50  ;;  %v554_v12 = vmul.f32 %v3106_v0, %v522_v55  ;;  %v506_v55 = vld [vmem:[%s3115_s10 + $0x60] sm:$0xff] }
  0x2a   : > { %v649_v53 = vpack.c.bf16 %v617_v45, %v617_v45  ;;  %v567_v11 = vadd.f32 %v3120_v1, %v535_v57  ;;  %v598_v15 = vmax.f32 %v566_v4, 0.0  ;;  %v555_v17 = vmul.f32 %v3106_v0, %v523_v60 }
  0x2b   : > { %v731_v2 = vunpack.c.l.b16 %v648_v52  ;;  %v949_v6 = vor.u32 %v948_v48, %v849_v47  ;;  %v536_v18 = vmul.f32 %v3106_v0, %v504_v61  ;;  %v786_v19 = vshrl.u32 %v3215_v43, 16  ;;  %v507_v61 = vld [vmem:[%s3115_s10 + $0x68] sm:$0xff] }
  0x2c   : > { %1003 = vrot.lane.b32.xlu0 %v3184_v16, %s3041_s16  ;;  %v732_v3 = vunpack.c.l.b16 %v649_v53  ;;  %v599_v20 = vmax.f32 %v567_v11, 0.0  ;;  %v586_v21 = vadd.f32 %v3120_v1, %v554_v12  ;;  %v537_v22 = vmul.f32 %v3106_v0, %v505_v5 }
  0x2d   : > { %v930_v23 = vrot.slane %v789_v63, 1  ;;  %v630_v26 = vpack.c.bf16 %v598_v15, %v598_v15  ;;  %v587_v27 = vadd.f32 %v3120_v1, %v555_v17  ;;  %v992_v28 = vsel %vm3173_vm2, %v949_v6, 0 }
  0x2e   : > { %1053 = vrot.lane.b32.xlu2 %v980_v56, %s3042_s17  ;;  %v3243_v14 = vpack.c.b16 %v732_v3, %v731_v2  ;;  %v982_v30 = vsel %vm3173_vm2, %v929_v8, 0  ;;  %v631_v31 = vpack.c.bf16 %v599_v20, %v599_v20  ;;  %v618_v32 = vmax.f32 %v586_v21, 0.0 }
  0x2f   : > { %1023 = vrot.lane.b32.xlu1 %v3201_v34, %s3041_s16  ;;  %v713_v37 = vunpack.c.l.b16 %v630_v26  ;;  %v619_v38 = vmax.f32 %v587_v27, 0.0  ;;  %v568_v41 = vadd.f32 %v3120_v1, %v536_v18  ;;  %v569_v46 = vadd.f32 %v3120_v1, %v537_v22 }
  0x30   : > { %v859_v24 = vshll.u32 %v3243_v14, 16  ;;  %v856_v36 = vshrl.u32 %v3243_v14, 16  ;;  %v714_v44 = vunpack.c.l.b16 %v631_v31  ;;  %v650_v45 = vpack.c.bf16 %v618_v32, %v618_v32 }
  0x31   : > { %v651_v48 = vpack.c.bf16 %v619_v38, %v619_v38  ;;  %v556_v51 = vmul.f32 %v3106_v0, %v524_v33  ;;  %v557_v52 = vmul.f32 %v3106_v0, %v525_v35  ;;  %v931_v53 = vor.u32 %v930_v23, %v786_v19  ;;  %v516_v33 = vld [vmem:[%s3115_s10 + $0xb0] sm:$0xff]  ;;  %v517_v35 = vld [vmem:[%s3115_s10 + $0xb8] sm:$0xff] }
  0x32   : > { %v950_v42 = vrot.slane %v859_v24, 1  ;;  %v3272_v54 = vpack.c.b16 %v714_v44, %v713_v37  ;;  %v600_v56 = vmax.f32 %v568_v41, 0.0  ;;  %v733_v3 = vunpack.c.l.b16 %v650_v45 }
  0x33   : > { %v588_v57 = vadd.f32 %v3120_v1, %v556_v51  ;;  %v589_v60 = vadd.f32 %v3120_v1, %v557_v52  ;;  %v734_v4 = vunpack.c.l.b16 %v651_v48  ;;  %v601_v5 = vmax.f32 %v569_v46, 0.0 }
  0x34   : > { %1077 = vrot.lane.b32.xlu0 %v992_v28, %s3042_s17  ;;  %v951_v2 = vor.u32 %v950_v42, %v856_v36  ;;  %v796_v6 = vshll.u32 %v3272_v54, 16  ;;  %v538_v12 = vmul.f32 %v3106_v0, %v506_v55  ;;  %v983_v15 = vsel %vm3173_vm2, %v931_v53, 0  ;;  %v508_v55 = vld [vmem:[%s3115_s10 + $0x70] sm:$0xff] }
  0x35   : > { %v620_v8 = vmax.f32 %v588_v57, 0.0  ;;  %v621_v11 = vmax.f32 %v589_v60, 0.0  ;;  %v539_v17 = vmul.f32 %v3106_v0, %v507_v61  ;;  %v632_v23 = vpack.c.bf16 %v600_v56, %v600_v56  ;;  %v509_v56 = vld [vmem:[%s3115_s10 + $0x78] sm:$0xff] }
  0x36   : > { %1057 = vrot.lane.b32.xlu2 %v982_v30, %s3042_s17  ;;  %v570_v21 = vadd.f32 %v3120_v1, %v538_v12  ;;  %v993_v22 = vsel %vm3173_vm2, %v951_v2, 0  ;;  %v633_v26 = vpack.c.bf16 %v601_v5, %v601_v5  ;;  %v793_v28 = vshrl.u32 %v3272_v54, 16 }
  0x37   : > { %1005 = vrot.lane.b32.xlu1 %v3215_v43, %s3041_s16  ;;  %v652_v18 = vpack.c.bf16 %v620_v8, %v620_v8  ;;  %v653_v20 = vpack.c.bf16 %v621_v11, %v621_v11  ;;  %v571_v27 = vadd.f32 %v3120_v1, %v539_v17  ;;  %v932_v30 = vrot.slane %v796_v6, 1 }
  0x38   : > { %v3296_v31 = vpack.c.b16 %v734_v4, %v733_v3  ;;  %v602_v38 = vmax.f32 %v570_v21, 0.0  ;;  %v548_v42 = vmul.f32 %v3106_v0, %v516_v33  ;;  %v549_v44 = vmul.f32 %v3106_v0, %v517_v35 }
  0x39   : > { %v735_v32 = vunpack.c.l.b16 %v652_v18  ;;  %v736_v37 = vunpack.c.l.b16 %v653_v20  ;;  %v603_v41 = vmax.f32 %v571_v27, 0.0  ;;  %v933_v48 = vor.u32 %v932_v30, %v793_v28 }
  0x3a   : > { %v866_v45 = vshll.u32 %v3296_v31, 16  ;;  %v580_v46 = vadd.f32 %v3120_v1, %v548_v42  ;;  %v715_v51 = vunpack.c.l.b16 %v632_v23  ;;  %v716_v52 = vunpack.c.l.b16 %v633_v26 }
  0x3b   : > { %v581_v53 = vadd.f32 %v3120_v1, %v549_v44  ;;  %v3312_v57 = vpack.c.b16 %v736_v37, %v735_v32  ;;  %v634_v60 = vpack.c.bf16 %v602_v38, %v602_v38  ;;  %v635_v61 = vpack.c.bf16 %v603_v41, %v603_v41 }
  0x3c   : > { %1059 = vrot.lane.b32.xlu0 %v983_v15, %s3042_s17  ;;  %v612_v2 = vmax.f32 %v580_v46, 0.0  ;;  %v863_v4 = vshrl.u32 %v3296_v31, 16  ;;  %v952_v5 = vrot.slane %v866_v45, 1  ;;  %v540_v8 = vmul.f32 %v3106_v0, %v508_v55 }
  0x3d   : > { %v613_v3 = vmax.f32 %v581_v53, 0.0  ;;  %v541_v11 = vmul.f32 %v3106_v0, %v509_v56  ;;  %v984_v12 = vsel %vm3173_vm2, %v933_v48, 0  ;;  %v3323_v15 = vpack.c.b16 %v716_v52, %v715_v51 }
  0x3e   : > { %1025 = vrot.lane.b32.xlu2 %v3243_v14, %s3041_s16  ;;  %v644_v17 = vpack.c.bf16 %v612_v2, %v612_v2  ;;  %v873_v20 = vshll.u32 %v3312_v57, 16  ;;  %v717_v21 = vunpack.c.l.b16 %v634_v60  ;;  %v572_v23 = vadd.f32 %v3120_v1, %v540_v8 }
  0x3f   : > { %1079 = vrot.lane.b32.xlu1 %v993_v22, %s3042_s17  ;;  %v645_v18 = vpack.c.bf16 %v613_v3, %v613_v3  ;;  %v718_v22 = vunpack.c.l.b16 %v635_v61  ;;  %v573_v26 = vadd.f32 %v3120_v1, %v541_v11  ;;  %v953_v27 = vor.u32 %v952_v5, %v863_v4 }
  0x40   : > { %v803_v30 = vshll.u32 %v3323_v15, 16  ;;  %v604_v32 = vmax.f32 %v572_v23, 0.0  ;;  %v727_v33 = vunpack.c.l.b16 %v644_v17  ;;  %v870_v38 = vshrl.u32 %v3312_v57, 16 }
  0x41   : > { %v728_v35 = vunpack.c.l.b16 %v645_v18  ;;  %v605_v37 = vmax.f32 %v573_v26, 0.0  ;;  %v954_v41 = vrot.slane %v873_v20, 1  ;;  %v3337_v42 = vpack.c.b16 %v718_v22, %v717_v21 }
  0x42   : > { %v636_v44 = vpack.c.bf16 %v604_v32, %v604_v32  ;;  %v994_v48 = vsel %vm3173_vm2, %v953_v27, 0  ;;  %v800_v51 = vshrl.u32 %v3323_v15, 16  ;;  %v934_v52 = vrot.slane %v803_v30, 1 }
  0x43   : > { %v637_v46 = vpack.c.bf16 %v605_v37, %v605_v37  ;;  %v3346_v53 = vpack.c.b16 %v728_v35, %v727_v33  ;;  %v955_v55 = vor.u32 %v954_v41, %v870_v38  ;;  %v810_v56 = vshll.u32 %v3337_v42, 16 }
  0x44   : > { %1027 = vrot.lane.b32.xlu0 %v3296_v31, %s3041_s16  ;;  %v719_v60 = vunpack.c.l.b16 %v636_v44  ;;  %v935_v2 = vor.u32 %v934_v52, %v800_v51  ;;  %v807_v8 = vshrl.u32 %v3337_v42, 16  ;;  %v510_v44 = vld [vmem:[%s3115_s10 + $0x80] sm:$0xff]  ;;  %v767_v62 = vrot.slane %v765_v29, 7 }
  0x45   : > { %v720_v61 = vunpack.c.l.b16 %v637_v46  ;;  %v845_v3 = vshll.u32 %v3346_v53, 16  ;;  %v995_v5 = vsel %vm3173_vm2, %v955_v55, 0  ;;  %v936_v11 = vrot.slane %v810_v56, 1  ;;  %v511_v46 = vld [vmem:[%s3115_s10 + $0x88] sm:$0xff] }
  0x46   : > { %1007 = vrot.lane.b32.xlu2 %v3272_v54, %s3041_s16  ;;  %v985_v17 = vsel %vm3173_vm2, %v935_v2, 0  ;;  %v842_v18 = vshrl.u32 %v3346_v53, 16  ;;  %v543_v52 = vmul.f32 %v3106_v0, %v511_v46  ;;  %v802_v31 = vrot.slane %v800_v51, 7 }
  0x47   : > { %1061 = vrot.lane.b32.xlu1 %v984_v12, %s3042_s17  ;;  %v3362_v12 = vpack.c.b16 %v720_v61, %v719_v60  ;;  %v946_v21 = vrot.slane %v845_v3, 1  ;;  %v937_v22 = vor.u32 %v936_v11, %v807_v8 }
  0x48   : > { %v575_v60 = vadd.f32 %v3120_v1, %v543_v52 }
  0x49   : > { %v3855_v23 = vshll.u32 %v3362_v12, 16  ;;  %v947_v26 = vor.u32 %v946_v21, %v842_v18  ;;  %v986_v27 = vsel %vm3173_vm2, %v937_v22, 0  ;;  %v814_v32 = vshrl.u32 %v3362_v12, 16  ;;  %v512_v22 = vld [vmem:[%s3115_s10 + $0x90] sm:$0xff] }
  0x4a   : > { %v607_v2 = vmax.f32 %v575_v60, 0.0 }
  0x4b   : > { %v938_v33 = vrot.slane %v3855_v23, 1  ;;  %v991_v35 = vsel %vm3173_vm2, %v947_v26, 0  ;;  %v513_v26 = vld [vmem:[%s3115_s10 + $0x98] sm:$0xff] }
  0x4c   : > { %1009 = vrot.lane.b32.xlu0 %v3323_v15, %s3041_s16  ;;  %v639_v11 = vpack.c.bf16 %v607_v2, %v607_v2 }
  0x4d   : > { %v939_v37 = vor.u32 %v938_v33, %v814_v32  ;;  %v545_v33 = vmul.f32 %v3106_v0, %v513_v26 }
  0x4e   : > { %1081 = vrot.lane.b32.xlu2 %v994_v48, %s3042_s17  ;;  %v542_v48 = vmul.f32 %v3106_v0, %v510_v44  ;;  %v722_v21 = vunpack.c.l.b16 %v639_v11 }
  0x4f   : > { %1029 = vrot.lane.b32.xlu1 %v3312_v57, %s3041_s16  ;;  %v987_v41 = vsel %vm3173_vm2, %v939_v37, 0  ;;  %v1376_v37 = vld [vmem:[%s3850_s5 + $0x8] sm:$0xf]  ;;  %v577_v44 = vadd.f32 %v3120_v1, %v545_v33  ;;  %v809_v57 = vrot.slane %v807_v8, 7 }
  0x50   : > { %v574_v55 = vadd.f32 %v3120_v1, %v542_v48  ;;  %v1730_v46 = vunpack.c.l.b16 %v1376_v37 }
  0x51   : > { %v609_v52 = vmax.f32 %v577_v44, 0.0 }
  0x52   : > { %v606_v61 = vmax.f32 %v574_v55, 0.0  ;;  %v1732_v55 = vpack.c.b16 %v1730_v46, %v1730_v46 }
  0x54   : > { %1083 = vrot.lane.b32.xlu0 %v995_v5, %s3042_s17  ;;  %v638_v5 = vpack.c.bf16 %v606_v61, %v606_v61  ;;  %v641_v61 = vpack.c.bf16 %v609_v52, %v609_v52  ;;  %v1783_v2 = vsel %vm1552_vm3, %v1732_v55, 0 }
  0x55   : > { %1791 = vmatpush.bf16.msra.mxu1 %v1783_v2 }
  0x56   : > { %1063 = vrot.lane.b32.xlu2 %v985_v17, %s3042_s17  ;;  %v721_v17 = vunpack.c.l.b16 %v638_v5  ;;  %v2743_v5 = vld [vmem:[%s3850_s5 + $0x20] sm:$0xf] }
  0x57   : > { %1011 = vrot.lane.b32.xlu1 %v3337_v42, %s3041_s16  ;;  %v1996_v11 = vunpack.c.l.b16 %v2743_v5  ;;  %v515_v5 = vld [vmem:[%s3115_s10 + $0xa8] sm:$0xff] }
  0x59   : > { %v1998_v26 = vpack.c.b16 %v1996_v11, %v1996_v11 }
  0x5c   : > { %1065 = vrot.lane.b32.xlu0 %v986_v27, %s3042_s17  ;;  %v544_v27 = vmul.f32 %v3106_v0, %v512_v22  ;;  %v2851_v22 = vld [vmem:[%s3850_s5] sm:$0xff] }
  0x5d   : > { %1792 = vmatpush.bf16.msra.mxu1 %v2851_v22 }
  0x5e   : > { %1021 = vrot.lane.b32.xlu2 %v3346_v53, %s3041_s16  ;;  %v816_v53 = vrot.slane %v814_v32, 7 }
  0x5f   : > { %1075 = vrot.lane.b32.xlu1 %v991_v35, %s3042_s17  ;;  %v3406_v35 = vpack.c.b16 %v722_v21, %v721_v17  ;;  %v724_v21 = vunpack.c.l.b16 %v641_v61  ;;  %v514_v61 = vld [vmem:[%s3115_s10 + $0xa0] sm:$0xff]  ;;  %s2833_s10 = sadd.s32 240, %s3109_s30 }
  0x60   : > { %s443_s15 = scalar_lea.vmem %s3847_s2, %s2833_s10 }
  0x61   : > { %v655_v51 = vld [vmem:[%s443_s15 + $0x8] sm:$0xff] }
  0x64   : > { %1067 = vrot.lane.b32.xlu0 %v987_v41, %s3042_s17  ;;  %v576_v41 = vadd.f32 %v3120_v1, %v544_v27  ;;  %v2572_v27 = vld [vmem:[%s3850_s5 + $0x14] sm:$0xf] }
  0x65   : > { %v1499_v37 = vunpack.c.l.b16 %v2572_v27 }
  0x66   : > { %1013 = vrot.lane.b32.xlu2 %v3362_v12, %s3041_s16  ;;  %v608_v48 = vmax.f32 %v576_v41, 0.0  ;;  %v3428_v41 = vsel %vm1552_vm3, %v1998_v26, 0  ;;  %v547_v26 = vmul.f32 %v3106_v0, %v515_v5 }
  0x67   : > { %1015 = vrot.lane.b32.xlu1 %v3406_v35, %s3041_s16  ;;  %2057 = vmatpush.bf16.msra.mxu2 %v3428_v41  ;;  %v1501_v46 = vpack.c.b16 %v1499_v37, %v1499_v37  ;;  %v2868_v37 = vld [vmem:[%s3850_s5 + $0xc] sm:$0xff] }
  0x68   : > { %v640_v60 = vpack.c.bf16 %v608_v48, %v608_v48 }
  0x69   : > { %v1554_v55 = vsel %vm1552_vm3, %v1501_v46, 0 }
  0x6a   : > { %v723_v17 = vunpack.c.l.b16 %v640_v60  ;;  %v3441_v60 = vld [vmem:[%s3850_s5 + $0x18] sm:$0xff]  ;;  %1562 = vmatpush.bf16.msra.mxu0 %v1554_v55  ;;  %2982 = vmatpush.bf16.msra.mxu3 %v1554_v55  ;;  %v824_v55 = vshll.u32 %v3406_v35, 16 }
  0x6b   : > { %2058 = vmatpush.bf16.msra.mxu2 %v3441_v60 }
  0x6c   : > { %v3425_v33 = vpack.c.b16 %v724_v21, %v723_v17  ;;  %v546_v21 = vmul.f32 %v3106_v0, %v514_v61 }
  0x6e   : > { %1017 = vrot.lane.b32.xlu0 %v3425_v33, %s3041_s16  ;;  %v3853_v44 = vshll.u32 %v3425_v33, 16  ;;  %v3854_v48 = vshrl.u32 %v3425_v33, 16  ;;  %v578_v46 = vadd.f32 %v3120_v1, %v546_v21  ;;  %1563 = vmatpush.bf16.msra.mxu0 %v2868_v37 }
  0x6f   : > { %2983 = vmatpush.bf16.msra.mxu3 %v2868_v37 }
  0x70   : > { %v942_v52 = vrot.slane %v3853_v44, 1  ;;  %v579_v44 = vadd.f32 %v3120_v1, %v547_v26  ;;  %v610_v61 = vmax.f32 %v578_v46, 0.0  ;;  %v774_v26 = vrot.slane %v772_v58, 7 }
  0x72   : > { %v943_v17 = vor.u32 %v942_v52, %v3854_v48  ;;  %v760_v52 = vrot.slane %v758_v9, 7  ;;  %v611_v5 = vmax.f32 %v579_v44, 0.0  ;;  %v940_v48 = vrot.slane %v824_v55, 1 }
  0x73   : > { %2984 = vmatpush.bf16.msrb.mxu3 %v1783_v2  ;;  %v642_v21 = vpack.c.bf16 %v610_v61, %v610_v61 }
  0x74   : > { %v989_v27 = vsel %vm3173_vm2, %v943_v17, 0  ;;  %v821_v17 = vshrl.u32 %v3406_v35, 16  ;;  %v643_v23 = vpack.c.bf16 %v611_v5, %v611_v5  ;;  %v763_v9 = vor.u32 %v761_v10, %v760_v52 }
  0x75   : > { %1071 = vrot.lane.b32.xlu1 %v989_v27, %s3042_s17  ;;  %v725_v44 = vunpack.c.l.b16 %v642_v21  ;;  %v777_v10 = vor.u32 %v775_v59, %v774_v26  ;;  %v770_v59 = vor.u32 %v768_v25, %v767_v62 }
  0x76   : > { %v941_v27 = vor.u32 %v940_v48, %v821_v17  ;;  %v726_v2 = vunpack.c.l.b16 %v643_v23  ;;  %v904_v23 = vsel %vm3475_vm6, 0, %v763_v9  ;;  %v781_v9 = vrot.slane %v779_v50, 7 }
  0x77   : > { %2985 = vmatpush.bf16.msrb.mxu3 %v2851_v22  ;;  %v906_v29 = vsel %vm3475_vm6, 0, %v777_v10  ;;  %v905_v25 = vsel %vm3475_vm6, 0, %v770_v59 }
  0x78   : > { %v988_v46 = vsel %vm3173_vm2, %v941_v27, 0  ;;  %v3472_v61 = vpack.c.b16 %v726_v2, %v725_v44 }
  0x79   : > { %1069 = vrot.lane.b32.xlu2 %v988_v46, %s3042_s17 }
  0x7a   : > { %v838_v22 = vshll.u32 %v3472_v61, 16  ;;  %v835_v52 = vshrl.u32 %v3472_v61, 16 }
  0x7c   : > { %v944_v21 = vrot.slane %v838_v22, 1 }
  0x7e   : > { %v945_v26 = vor.u32 %v944_v21, %v835_v52 }
  0x80   : > { %v1052_v11 = vpop.permute.xlu2 %1051  ;;  %v990_v46 = vsel %vm3173_vm2, %v945_v26, 0 }
  0x81   : > { %1073 = vrot.lane.b32.xlu0 %v990_v46, %s3042_s17  ;;  %1019 = vrot.lane.b32.xlu2 %v3472_v61, %s3041_s16 }
  0x88   : > { %v1054_v37 = vpop.permute.xlu2 %1053 }
  0x8e   : > { %v1002_v5 = vpop.permute.xlu0 %1001 }
  0x90   : > { %v1058_v50 = vpop.permute.xlu2 %1057 }
  0x91   : > { %v998_v48 = vpop.permute.xlu1 %997 }
  0x92   : > { %v1090_v27 = vsel %vm1087_vm8, %v904_v23, %v998_v48  ;;  %v1096_v23 = vsel %vm1087_vm8, %v906_v29, %v1002_v5  ;;  %v784_v5 = vor.u32 %v782_v39, %v781_v9 }
  0x93   : > { %v1144_v49 = vsel %vm1142_vm7, %v1090_v27, %v1052_v11  ;;  %v851_v27 = vrot.slane %v849_v47, 7 }
  0x94   : > { %v1197_v44 = vunpack.c.l.b16 %v1144_v49  ;;  %v1198_v2 = vunpack.c.h.b16 %v1144_v49  ;;  %v907_v16 = vsel %vm3475_vm6, 0, %v784_v5 }
  0x95   : > { %v854_v39 = vor.u32 %v852_v40, %v851_v27  ;;  %v858_v27 = vrot.slane %v856_v36, 7 }
  0x96   : > { %v1233_v10 = vpack.c.b16 %v1197_v44, %v1197_v44  ;;  %v1234_v48 = vpack.c.b16 %v1198_v2, %v1198_v2  ;;  %v1056_v11 = vpop.permute.xlu0 %1055 }
  0x97   : > { %v1148_v13 = vsel %vm1142_vm7, %v1096_v23, %v1056_v11  ;;  %v917_v40 = vsel %vm3475_vm6, 0, %v854_v39  ;;  %v861_v36 = vor.u32 %v859_v24, %v858_v27 }
  0x98   : > { %1306 = vst.msk [vmem:[#allocation2] sm:$0xf] %vm1305_vm9, %v1233_v10  ;;  %v1201_v62 = vunpack.c.l.b16 %v1148_v13  ;;  %v1202_v21 = vunpack.c.h.b16 %v1148_v13  ;;  %v788_v13 = vrot.slane %v786_v19, 7 }
  0x99   : > { %1307 = vst.msk [vmem:[#allocation2 + $0x4] sm:$0xf] %vm1305_vm9, %v1234_v48  ;;  %v1000_v29 = vpop.permute.xlu1 %999  ;;  %v1026_v48 = vpop.permute.xlu2 %1025  ;;  %v918_v24 = vsel %vm3475_vm6, 0, %v861_v36  ;;  %v657_v36 = vmul.f32 %v3106_v0, %v655_v51  ;;  %v812_v51 = vor.u32 %v810_v56, %v809_v57 }
  0x9a   : > { %v1237_v49 = vpack.c.b16 %v1201_v62, %v1201_v62  ;;  %v1238_v26 = vpack.c.b16 %v1202_v21, %v1202_v21  ;;  %v1093_v44 = vsel %vm1087_vm8, %v905_v25, %v1000_v29  ;;  %v791_v19 = vor.u32 %v789_v63, %v788_v13 }
  0x9b   : > { %v1146_v59 = vsel %vm1142_vm7, %v1093_v44, %v1054_v37  ;;  %v911_v42 = vsel %vm3475_vm6, 0, %v812_v51 }
  0x9c   : > { %1310 = vst.msk [vmem:[#allocation2 + $0x10] sm:$0xf] %vm1305_vm9, %v1237_v49  ;;  %v1199_v2 = vunpack.c.l.b16 %v1146_v59  ;;  %v1200_v46 = vunpack.c.h.b16 %v1146_v59 }
  0x9d   : > { %1311 = vst.msk [vmem:[#allocation2 + $0x14] sm:$0xf] %vm1305_vm9, %v1238_v26 }
  0x9e   : > { %v1235_v47 = vpack.c.b16 %v1199_v2, %v1199_v2  ;;  %v1236_v9 = vpack.c.b16 %v1200_v46, %v1200_v46  ;;  %v1004_v23 = vpop.permute.xlu0 %1003  ;;  %v908_v46 = vsel %vm3475_vm6, 0, %v791_v19 }
  0x9f   : > { %v1099_v10 = vsel %vm1087_vm8, %v907_v16, %v1004_v23 }
  0xa0   : > { %1308 = vst.msk [vmem:[#allocation2 + $0x8] sm:$0xf] %vm1305_vm9, %v1235_v47  ;;  %v1150_v37 = vsel %vm1142_vm7, %v1099_v10, %v1058_v50  ;;  %v2835_v11 = vld [vmem:[#allocation2] sm:$0xff]  ;;  %v795_v47 = vrot.slane %v793_v28, 7 }
  0xa1   : > { %1309 = vst.msk [vmem:[#allocation2 + $0xc] sm:$0xf] %vm1305_vm9, %v1236_v9  ;;  %v1203_v25 = vunpack.c.l.b16 %v1150_v37  ;;  %v1204_v34 = vunpack.c.h.b16 %v1150_v37  ;;  %v1024_v62 = vpop.permute.xlu1 %1023  ;;  %2725 = vmatmul.msk.bf16.vlgmr.msra.gmra.mxu1 %vm1503_vm10, %v2835_v11  ;;  %v1008_v39 = vpop.permute.xlu2 %1007  ;;  %v865_v9 = vrot.slane %v863_v4, 7  ;;  %v1132_v37 = vsel %vm1087_vm8, %v918_v24, %v1026_v48 }
  0xa2   : > { %v1129_v50 = vsel %vm1087_vm8, %v917_v40, %v1024_v62  ;;  %v798_v28 = vor.u32 %v796_v6, %v795_v47 }
  0xa3   : > { %v1239_v21 = vpack.c.b16 %v1203_v25, %v1203_v25  ;;  %v1240_v5 = vpack.c.b16 %v1204_v34, %v1204_v34  ;;  %v868_v25 = vor.u32 %v866_v45, %v865_v9 }
  0xa4   : > { %v2869_v29 = vld [vmem:[#allocation2 + $0x10] sm:$0xff]  ;;  %v909_v54 = vsel %vm3475_vm6, 0, %v798_v28 }
  0xa5   : > { %1312 = vst.msk [vmem:[#allocation2 + $0x18] sm:$0xf] %vm1305_vm9, %v1239_v21  ;;  %2812 = vmatmul.msk.bf16.vlgmr.msra.gmra.mxu2 %vm1503_vm10, %v2869_v29 }
  0xa6   : > { %1313 = vst.msk [vmem:[#allocation2 + $0x1c] sm:$0xf] %vm1305_vm9, %v1240_v5  ;;  %v1078_v49 = vpop.permute.xlu0 %1077 }
  0xa7   : > { %v1170_v26 = vsel %vm1142_vm7, %v1129_v50, %v1078_v49  ;;  %v919_v50 = vsel %vm3475_vm6, 0, %v868_v25  ;;  %v1105_v49 = vsel %vm1087_vm8, %v909_v54, %v1008_v39 }
  0xa8   : > { %v1223_v44 = vunpack.c.l.b16 %v1170_v26  ;;  %v1224_v59 = vunpack.c.h.b16 %v1170_v26  ;;  %v2852_v2 = vld [vmem:[#allocation2 + $0x8] sm:$0xff] }
  0xa9   : > { %v1006_v16 = vpop.permute.xlu1 %1005  ;;  %2641 = vmatmul.msk.bf16.vlgmr.msra.gmra.mxu0 %vm1503_vm10, %v2852_v2  ;;  %v2836_v4 = vld [vmem:[#allocation2 + $0x8] sm:$0xff]  ;;  %v1082_v6 = vpop.permute.xlu2 %1081 }
  0xaa   : > { %v1259_v43 = vpack.c.b16 %v1223_v44, %v1223_v44  ;;  %v1260_v63 = vpack.c.b16 %v1224_v59, %v1224_v59  ;;  %v1102_v14 = vsel %vm1087_vm8, %v908_v46, %v1006_v16  ;;  %v654_v44 = vld [vmem:[%s443_s15] sm:$0xff]  ;;  %v872_v46 = vrot.slane %v870_v38, 7  ;;  %v2853_v16 = vld [vmem:[#allocation2 + $0x10] sm:$0xff] }
  0xab   : > { %v656_v2 = vmul.f32 %v3106_v0, %v654_v44  ;;  %v3016_v0 = vld [vmem:[%s3849_s4] ss:$0 sm:$0xff] }
  0xac   : > { %1332 = vst.msk [vmem:[#allocation2 + $0x68] sm:$0xf] %vm1305_vm9, %v1259_v43  ;;  %v805_v43 = vor.u32 %v803_v30, %v802_v31 }
  0xad   : > { %1333 = vst.msk [vmem:[#allocation2 + $0x6c] sm:$0xf] %vm1305_vm9, %v1260_v63  ;;  %v2870_v48 = vld [vmem:[#allocation2 + $0x18] sm:$0xff] }
  0xae   : > { %v1060_v23 = vpop.permute.xlu0 %1059  ;;  %v910_v15 = vsel %vm3475_vm6, 0, %v805_v43 }
  0xaf   : > { %v1152_v10 = vsel %vm1142_vm7, %v1102_v14, %v1060_v23  ;;  %v658_v14 = vadd.f32 %v3120_v1, %v656_v2 }
  0xb0   : > { %v1205_v11 = vunpack.c.l.b16 %v1152_v10  ;;  %v1206_v13 = vunpack.c.h.b16 %v1152_v10 }
  0xb1   : > { %v1080_v34 = vpop.permute.xlu1 %1079  ;;  %2726 = vmatmul.msk.bf16.gmra.mxu1 %vm1503_vm10, %v2836_v4  ;;  %v660_v30 = vmax.f32 %v658_v14, 0.0  ;;  %v875_v4 = vor.u32 %v873_v20, %v872_v46 }
  0xb2   : > { %v1241_v40 = vpack.c.b16 %v1205_v11, %v1205_v11  ;;  %v1242_v62 = vpack.c.b16 %v1206_v13, %v1206_v13  ;;  %v1172_v21 = vsel %vm1142_vm7, %v1132_v37, %v1080_v34  ;;  %v1064_v13 = vpop.permute.xlu2 %1063 }
  0xb3   : > { %v1225_v5 = vunpack.c.l.b16 %v1172_v21  ;;  %v1226_v27 = vunpack.c.h.b16 %v1172_v21  ;;  %v663_v34 = vmul.f32 0.0, %v660_v30 }
  0xb4   : > { %1314 = vst.msk [vmem:[#allocation2 + $0x20] sm:$0xf] %vm1305_vm9, %v1241_v40  ;;  %v2864_v45 = vld [vmem:[#allocation2 + $0x68] sm:$0xff] }
  0xb5   : > { %1315 = vst.msk [vmem:[#allocation2 + $0x24] sm:$0xf] %vm1305_vm9, %v1242_v62  ;;  %v1261_v29 = vpack.c.b16 %v1225_v5, %v1225_v5  ;;  %v1262_v19 = vpack.c.b16 %v1226_v27, %v1226_v27  ;;  %2653 = vmatmul.msk.bf16.vlgmr.msra.gmra.mxu3 %vm1503_vm10, %v2864_v45  ;;  %2813 = vmatmul.msk.bf16.gmra.mxu2 %vm1503_vm10, %v2870_v48  ;;  %v2837_v62 = vld [vmem:[#allocation2 + $0x10] sm:$0xff] }
  0xb6   : > { %v1028_v26 = vpop.permute.xlu0 %1027  ;;  %2986 = vmatpush.bf16.msra.mxu3 %v3428_v41  ;;  %v659_v41 = vadd.f32 %v3016_v0, %v657_v36  ;;  %v665_v5 = vpack.c.bf16 %v663_v34, %v663_v34 }
  0xb7   : > { %1334 = vst.msk [vmem:[#allocation2 + $0x70] sm:$0xf] %vm1305_vm9, %v1261_v29  ;;  %v1135_v59 = vsel %vm1087_vm8, %v919_v50, %v1028_v26 }
  0xb8   : > { %1335 = vst.msk [vmem:[#allocation2 + $0x74] sm:$0xf] %vm1305_vm9, %v1262_v19  ;;  %v1174_v39 = vsel %vm1142_vm7, %v1135_v59, %v1082_v6  ;;  %v661_v1 = vmax.f32 %v659_v41, 0.0  ;;  %v920_v6 = vsel %vm3475_vm6, 0, %v875_v4  ;;  %v737_v48 = vunpack.c.l.b16 %v665_v5  ;;  %v2838_v41 = vld [vmem:[#allocation2 + $0x18] sm:$0xff] }
  0xb9   : > { %v1062_v63 = vpop.permute.xlu1 %1061  ;;  %v1227_v47 = vunpack.c.l.b16 %v1174_v39  ;;  %v1228_v9 = vunpack.c.h.b16 %v1174_v39  ;;  %2642 = vmatmul.msk.bf16.gmra.mxu0 %vm1503_vm10, %v2853_v16 }
  0xba   : > { %v1154_v38 = vsel %vm1142_vm7, %v1105_v49, %v1062_v63  ;;  %2987 = vmatpush.bf16.msra.mxu3 %v3441_v60  ;;  %v664_v40 = vmul.f32 0.0, %v661_v1  ;;  %v844_v49 = vrot.slane %v842_v18, 7  ;;  %v2854_v18 = vld [vmem:[#allocation2 + $0x18] sm:$0xff]  ;;  %v1022_v63 = vpop.permute.xlu2 %1021  ;;  %v3860_v1 = vshll.u32 %v3362_v12, 16 }
  0xbb   : > { %v1207_v24 = vunpack.c.l.b16 %v1154_v38  ;;  %v1208_v23 = vunpack.c.h.b16 %v1154_v38  ;;  %v1263_v10 = vpack.c.b16 %v1227_v47, %v1227_v47  ;;  %v1264_v37 = vpack.c.b16 %v1228_v9, %v1228_v9 }
  0xbc   : > { %v666_v27 = vpack.c.bf16 %v664_v40, %v664_v40  ;;  %v2871_v26 = vld [vmem:[#allocation2 + $0x20] sm:$0xff]  ;;  %v847_v16 = vor.u32 %v845_v3, %v844_v49 }
  0xbd   : > { %v1243_v28 = vpack.c.b16 %v1207_v24, %v1207_v24  ;;  %v1244_v11 = vpack.c.b16 %v1208_v23, %v1208_v23  ;;  %1336 = vst.msk [vmem:[#allocation2 + $0x78] sm:$0xf] %vm1305_vm9, %v1263_v10  ;;  %v2855_v5 = vld [vmem:[#allocation2 + $0x20] sm:$0xff] }
  0xbe   : > { %1337 = vst.msk [vmem:[#allocation2 + $0x7c] sm:$0xf] %vm1305_vm9, %v1264_v37  ;;  %v1010_v25 = vpop.permute.xlu0 %1009  ;;  %v738_v50 = vunpack.c.l.b16 %v666_v27  ;;  %v916_v9 = vsel %vm3475_vm6, 0, %v847_v16 }
  0xbf   : > { %1316 = vst.msk [vmem:[#allocation2 + $0x28] sm:$0xf] %vm1305_vm9, %v1243_v28  ;;  %v1108_v60 = vsel %vm1087_vm8, %v910_v15, %v1010_v25  ;;  %v2865_v45 = vld [vmem:[#allocation2 + $0x70] sm:$0xff]  ;;  %v1126_v0 = vsel %vm1087_vm8, %v916_v9, %v1022_v63  ;;  %v819_v28 = vor.u32 %v3860_v1, %v816_v53  ;;  %v2848_v1 = vld [vmem:[#allocation2 + $0x68] sm:$0xff] }
  0xc0   : > { %1317 = vst.msk [vmem:[#allocation2 + $0x2c] sm:$0xf] %vm1305_vm9, %v1244_v11  ;;  %v1156_v21 = vsel %vm1142_vm7, %v1108_v60, %v1064_v13  ;;  %v3614_v8 = vpack.c.b16 %v738_v50, %v737_v48  ;;  %v823_v50 = vrot.slane %v821_v17, 7 }
  0xc1   : > { %v1209_v20 = vunpack.c.l.b16 %v1156_v21  ;;  %v1210_v54 = vunpack.c.h.b16 %v1156_v21  ;;  %v1030_v31 = vpop.permute.xlu1 %1029  ;;  %2727 = vmatmul.msk.bf16.gmra.mxu1 %vm1503_vm10, %v2837_v62  ;;  %v912_v25 = vsel %vm3475_vm6, 0, %v819_v28 }
  0xc2   : > { %v1138_v44 = vsel %vm1087_vm8, %v920_v6, %v1030_v31  ;;  %1031 = vrot.lane.b32.xlu1 %v3614_v8, %s3041_s16  ;;  %v1014_v32 = vpop.permute.xlu2 %1013  ;;  %v880_v21 = vshll.u32 %v3614_v8, 16  ;;  %v826_v49 = vor.u32 %v824_v55, %v823_v50  ;;  %s2834_s16 = sshll.u32 %s3868_s24, 7 }
  0xc3   : > { %v1245_v29 = vpack.c.b16 %v1209_v20, %v1209_v20  ;;  %v1246_v19 = vpack.c.b16 %v1210_v54, %v1210_v54  ;;  %v1114_v60 = vsel %vm1087_vm8, %v912_v25, %v1014_v32  ;;  %v877_v20 = vshrl.u32 %v3614_v8, 16  ;;  %s3722_s20 = scalar_lea.vmem %s3851_s6, %s2834_s16 }
  0xc4   : > { %v956_v54 = vrot.slane %v880_v21, 1  ;;  %v913_v7 = vsel %vm3475_vm6, 0, %v826_v49 }
  0xc5   : > { %1318 = vst.msk [vmem:[#allocation2 + $0x30] sm:$0xf] %vm1305_vm9, %v1245_v29  ;;  %2654 = vmatmul.msk.bf16.gmra.mxu3 %vm1503_vm10, %v2865_v45  ;;  %2814 = vmatmul.msk.bf16.gmra.mxu2 %vm1503_vm10, %v2871_v26  ;;  %v2866_v10 = vld [vmem:[#allocation2 + $0x78] sm:$0xff]  ;;  %v2839_v29 = vld [vmem:[#allocation2 + $0x20] sm:$0xff] }
  0xc6   : > { %1319 = vst.msk [vmem:[#allocation2 + $0x34] sm:$0xf] %vm1305_vm9, %v1246_v19  ;;  %v1084_v59 = vpop.permute.xlu0 %1083  ;;  %v957_v45 = vor.u32 %v956_v54, %v877_v20 }
  0xc7   : > { %v1176_v2 = vsel %vm1142_vm7, %v1138_v44, %v1084_v59  ;;  %v2872_v4 = vld [vmem:[#allocation2 + $0x28] sm:$0xff] }
  0xc8   : > { %v1229_v36 = vunpack.c.l.b16 %v1176_v2  ;;  %v1230_v46 = vunpack.c.h.b16 %v1176_v2  ;;  %v996_v48 = vsel %vm3173_vm2, %v957_v45, 0  ;;  %v2856_v44 = vld [vmem:[#allocation2 + $0x28] sm:$0xff] }
  0xc9   : > { %v1012_v56 = vpop.permute.xlu1 %1011  ;;  %2643 = vmatmul.msk.bf16.gmra.mxu0 %vm1503_vm10, %v2854_v18  ;;  %1085 = vrot.lane.b32.xlu2 %v996_v48, %s3042_s17 }
  0xca   : > { %v1265_v39 = vpack.c.b16 %v1229_v36, %v1229_v36  ;;  %v1266_v43 = vpack.c.b16 %v1230_v46, %v1230_v46  ;;  %v1111_v47 = vsel %vm1087_vm8, %v911_v42, %v1012_v56  ;;  %v3861_v46 = vshrl.u32 %v3425_v33, 16  ;;  %v2840_v42 = vld [vmem:[#allocation2 + $0x28] sm:$0xff] }
  0xcc   : > { %1338 = vst.msk [vmem:[#allocation2 + $0x80] sm:$0xf] %vm1305_vm9, %v1265_v39  ;;  %v830_v16 = vrot.slane %v3861_v46, 7  ;;  %v3862_v39 = vshll.u32 %v3425_v33, 16 }
  0xcd   : > { %1339 = vst.msk [vmem:[#allocation2 + $0x84] sm:$0xf] %vm1305_vm9, %v1266_v43  ;;  %v2873_v26 = vld [vmem:[#allocation2 + $0x30] sm:$0xff] }
  0xce   : > { %v1066_v3 = vpop.permute.xlu0 %1065  ;;  %v833_v43 = vor.u32 %v3862_v39, %v830_v16 }
  0xcf   : > { %v1158_v14 = vsel %vm1142_vm7, %v1111_v47, %v1066_v3  ;;  %v2857_v3 = vld [vmem:[#allocation2 + $0x30] sm:$0xff] }
  0xd0   : > { %v1211_v38 = vunpack.c.l.b16 %v1158_v14  ;;  %v1212_v24 = vunpack.c.h.b16 %v1158_v14  ;;  %v914_v9 = vsel %vm3475_vm6, 0, %v833_v43 }
  0xd1   : > { %v1076_v23 = vpop.permute.xlu1 %1075  ;;  %2728 = vmatmul.msk.bf16.gmra.mxu1 %vm1503_vm10, %v2838_v41 }
  0xd2   : > { %v1247_v37 = vpack.c.b16 %v1211_v38, %v1211_v38  ;;  %v1248_v15 = vpack.c.b16 %v1212_v24, %v1212_v24  ;;  %v1168_v30 = vsel %vm1142_vm7, %v1126_v0, %v1076_v23  ;;  %v837_v23 = vrot.slane %v835_v52, 7 }
  0xd3   : > { %v1221_v11 = vunpack.c.l.b16 %v1168_v30  ;;  %v1222_v13 = vunpack.c.h.b16 %v1168_v30  ;;  %v1070_v17 = vpop.permute.xlu2 %1069 }
  0xd4   : > { %1320 = vst.msk [vmem:[#allocation2 + $0x38] sm:$0xf] %vm1305_vm9, %v1247_v37  ;;  %v2867_v19 = vld [vmem:[#allocation2 + $0x80] sm:$0xff] }
  0xd5   : > { %1321 = vst.msk [vmem:[#allocation2 + $0x3c] sm:$0xf] %vm1305_vm9, %v1248_v15  ;;  %v1257_v34 = vpack.c.b16 %v1221_v11, %v1221_v11  ;;  %v1258_v40 = vpack.c.b16 %v1222_v13, %v1222_v13  ;;  %2655 = vmatmul.msk.bf16.gmra.mxu3 %vm1503_vm10, %v2866_v10  ;;  %2815 = vmatmul.msk.bf16.gmra.mxu2 %vm1503_vm10, %v2872_v4  ;;  %v2841_v10 = vld [vmem:[#allocation2 + $0x30] sm:$0xff] }
  0xd6   : > { %v1068_v12 = vpop.permute.xlu0 %1067  ;;  %v840_v15 = vor.u32 %v838_v22, %v837_v23 }
  0xd7   : > { %1330 = vst.msk [vmem:[#allocation2 + $0x60] sm:$0xf] %vm1305_vm9, %v1257_v34  ;;  %v1160_v62 = vsel %vm1142_vm7, %v1114_v60, %v1068_v12  ;;  %v2849_v60 = vld [vmem:[#allocation2 + $0x70] sm:$0xff] }
  0xd8   : > { %1331 = vst.msk [vmem:[#allocation2 + $0x64] sm:$0xf] %vm1305_vm9, %v1258_v40  ;;  %v1213_v27 = vunpack.c.l.b16 %v1160_v62  ;;  %v1214_v57 = vunpack.c.h.b16 %v1160_v62  ;;  %v915_v28 = vsel %vm3475_vm6, 0, %v840_v15 }
  0xd9   : > { %2644 = vmatmul.msk.bf16.gmra.mxu0 %vm1503_vm10, %v2855_v5  ;;  %v1016_v51 = vpop.permute.xlu1 %1015 }
  0xda   : > { %v1249_v6 = vpack.c.b16 %v1213_v27, %v1213_v27  ;;  %v1250_v31 = vpack.c.b16 %v1214_v57, %v1214_v57  ;;  %v1117_v59 = vsel %vm1087_vm8, %v913_v7, %v1016_v51  ;;  %v2850_v57 = vld [vmem:[#allocation2 + $0x78] sm:$0xff] }
  0xdb   : > { %v1162_v2 = vsel %vm1142_vm7, %v1117_v59, %v1070_v17  ;;  %v1020_v30 = vpop.permute.xlu2 %1019 }
  0xdc   : > { %1322 = vst.msk [vmem:[#allocation2 + $0x40] sm:$0xf] %vm1305_vm9, %v1249_v6  ;;  %v1215_v18 = vunpack.c.l.b16 %v1162_v2  ;;  %v1216_v35 = vunpack.c.h.b16 %v1162_v2  ;;  %v2874_v47 = vld [vmem:[#allocation2 + $0x38] sm:$0xff]  ;;  %v1123_v52 = vsel %vm1087_vm8, %v915_v28, %v1020_v30 }
  0xdd   : > { %1323 = vst.msk [vmem:[#allocation2 + $0x44] sm:$0xf] %vm1305_vm9, %v1250_v31  ;;  %v2858_v32 = vld [vmem:[#allocation2 + $0x38] sm:$0xff] }
  0xde   : > { %v1251_v55 = vpack.c.b16 %v1215_v18, %v1215_v18  ;;  %v1252_v36 = vpack.c.b16 %v1216_v35, %v1216_v35  ;;  %v2842_v34 = vld [vmem:[#allocation2 + $0x38] sm:$0xff] }
  0xdf   : > { %v2847_v56 = vld [vmem:[#allocation2 + $0x60] sm:$0xff] }
  0xe0   : > { %1324 = vst.msk [vmem:[#allocation2 + $0x48] sm:$0xf] %vm1305_vm9, %v1251_v55  ;;  %v1018_v63 = vpop.permute.xlu0 %1017  ;;  %v2881_v55 = vld [vmem:[#allocation2 + $0x70] sm:$0xff] }
  0xe1   : > { %2729 = vmatmul.msk.bf16.gmra.mxu1 %vm1503_vm10, %v2839_v29  ;;  %1325 = vst.msk [vmem:[#allocation2 + $0x4c] sm:$0xf] %vm1305_vm9, %v1252_v36  ;;  %v1120_v53 = vsel %vm1087_vm8, %v914_v9, %v1018_v63 }
  0xe4   : > { %v2875_v37 = vld [vmem:[#allocation2 + $0x40] sm:$0xff] }
  0xe5   : > { %2656 = vmatmul.msk.bf16.gmra.mxu3 %vm1503_vm10, %v2867_v19  ;;  %2816 = vmatmul.msk.bf16.gmra.mxu2 %vm1503_vm10, %v2873_v26  ;;  %v2859_v12 = vld [vmem:[#allocation2 + $0x40] sm:$0xff] }
  0xe6   : > { %v2843_v5 = vld [vmem:[#allocation2 + $0x40] sm:$0xff] }
  0xe7   : > { %v1072_v14 = vpop.permute.xlu1 %1071 }
  0xe8   : > { %v1164_v0 = vsel %vm1142_vm7, %v1120_v53, %v1072_v14  ;;  %v2876_v40 = vld [vmem:[#allocation2 + $0x48] sm:$0xff] }
  0xe9   : > { %2645 = vmatmul.msk.bf16.gmra.mxu0 %vm1503_vm10, %v2856_v44  ;;  %v1217_v41 = vunpack.c.l.b16 %v1164_v0  ;;  %v1218_v33 = vunpack.c.h.b16 %v1164_v0  ;;  %v2860_v45 = vld [vmem:[#allocation2 + $0x48] sm:$0xff]  ;;  %v879_v44 = vrot.slane %v877_v20, 7 }
  0xea   : > { %v2844_v7 = vld [vmem:[#allocation2 + $0x48] sm:$0xff] }
  0xeb   : > { %v1253_v38 = vpack.c.b16 %v1217_v41, %v1217_v41  ;;  %v1254_v24 = vpack.c.b16 %v1218_v33, %v1218_v33  ;;  %v882_v36 = vor.u32 %v880_v21, %v879_v44 }
  0xed   : > { %1326 = vst.msk [vmem:[#allocation2 + $0x50] sm:$0xf] %vm1305_vm9, %v1253_v38 }
  0xee   : > { %1327 = vst.msk [vmem:[#allocation2 + $0x54] sm:$0xf] %vm1305_vm9, %v1254_v24 }
  0xf1   : > { %2730 = vmatmul.msk.bf16.gmra.mxu1 %vm1503_vm10, %v2840_v42 }
  0xf3   : > { %v1074_v11 = vpop.permute.xlu0 %1073 }
  0xf4   : > { %v1166_v13 = vsel %vm1142_vm7, %v1123_v52, %v1074_v11 }
  0xf5   : > { %2737 = vmatmul.msk.bf16.vlgmr.msrb.gmra.mxu3 %vm1503_vm10, %v2847_v56  ;;  %2817 = vmatmul.msk.bf16.gmra.mxu2 %vm1503_vm10, %v2874_v47  ;;  %v1219_v4 = vunpack.c.l.b16 %v1166_v13  ;;  %v1220_v61 = vunpack.c.h.b16 %v1166_v13  ;;  %v2877_v27 = vld [vmem:[#allocation2 + $0x50] sm:$0xff]  ;;  %v921_v47 = vsel %vm3475_vm6, 0, %v882_v36  ;;  %v2883_v36 = vld [vmem:[#allocation2 + $0x80] sm:$0xff] }
  0xf6   : > { %v2861_v63 = vld [vmem:[#allocation2 + $0x50] sm:$0xff] }
  0xf7   : > { %v1255_v22 = vpack.c.b16 %v1219_v4, %v1219_v4  ;;  %v1256_v25 = vpack.c.b16 %v1220_v61, %v1220_v61  ;;  %v2845_v52 = vld [vmem:[#allocation2 + $0x50] sm:$0xff] }
  0xf9   : > { %2646 = vmatmul.msk.bf16.gmra.mxu0 %vm1503_vm10, %v2857_v3  ;;  %1328 = vst.msk [vmem:[#allocation2 + $0x58] sm:$0xf] %vm1305_vm9, %v1255_v22 }
  0xfa   : > { %1329 = vst.msk [vmem:[#allocation2 + $0x5c] sm:$0xf] %vm1305_vm9, %v1256_v25  ;;  %v2879_v25 = vld [vmem:[#allocation2 + $0x60] sm:$0xff] }
 0x101   : > { %2731 = vmatmul.msk.bf16.gmra.mxu1 %vm1503_vm10, %v2841_v10  ;;  %v2878_v59 = vld [vmem:[#allocation2 + $0x58] sm:$0xff] }
 0x102   : > { %v2846_v44 = vld [vmem:[#allocation2 + $0x58] sm:$0xff] }
 0x105   : > { %2738 = vmatmul.msk.bf16.gmra.mxu3 %vm1503_vm10, %v2848_v1  ;;  %2818 = vmatmul.msk.bf16.gmra.mxu2 %vm1503_vm10, %v2875_v37 }
 0x109   : > { %2647 = vmatmul.msk.bf16.gmra.mxu0 %vm1503_vm10, %v2858_v32 }
 0x111   : > { %2732 = vmatmul.msk.bf16.gmra.mxu1 %vm1503_vm10, %v2842_v34  ;;  %v2882_v34 = vld [vmem:[#allocation2 + $0x78] sm:$0xff] }
 0x115   : > { %2739 = vmatmul.msk.bf16.gmra.mxu3 %vm1503_vm10, %v2849_v60  ;;  %2819 = vmatmul.msk.bf16.gmra.mxu2 %vm1503_vm10, %v2876_v40 }
 0x119   : > { %2648 = vmatmul.msk.bf16.gmra.mxu0 %vm1503_vm10, %v2859_v12 }
 0x11e   : > { %v1794_v62 = vpop.f32.mrf.mxu1 }
 0x121   : > { %2733 = vmatmul.msk.bf16.gmra.mxu1 %vm1503_vm10, %v2843_v5 }
 0x123   : > { %v1086_v9 = vpop.permute.xlu2 %1085 }
 0x125   : > { %2740 = vmatmul.msk.bf16.gmra.mxu3 %vm1503_vm10, %v2850_v57  ;;  %2820 = vmatmul.msk.bf16.gmra.mxu2 %vm1503_vm10, %v2877_v27  ;;  %v2862_v57 = vld [vmem:[#allocation2 + $0x58] sm:$0xff] }
 0x126   : > { %v1796_v54 = vpop.f32.mrf.mxu1  ;;  %v1565_v6 = vpop.f32.mrf.mxu0 }
 0x127   : > { %v1795_v31 = vadd.f32 %v1794_v62, %v1565_v6 }
 0x128   : > { %v2060_v48 = vpop.f32.mrf.mxu2 }
 0x129   : > { %2649 = vmatmul.msk.bf16.gmra.mxu0 %vm1503_vm10, %v2860_v45  ;;  %v2140_v50 = vadd.f32 %v2060_v48, %v1795_v31 }
 0x12b   : > { %v2172_v29 = vpack.c.bf16 %v2140_v50, %v2140_v50 }
 0x12d   : > { %v2236_v2 = vunpack.c.l.bf16 %v2172_v29 }
 0x12e   : > { %v1567_v19 = vpop.f32.mrf.mxu0  ;;  %v1799_v49 = vpop.f32.mrf.mxu1 }
 0x12f   : > { %v1797_v26 = vadd.f32 %v1796_v54, %v1567_v19  ;;  %v2305_v46 = vmul.f32 %v2236_v2, %v2236_v2 }
 0x130   : > { %v2062_v51 = vpop.f32.mrf.mxu2 }
 0x131   : > { %2734 = vmatmul.msk.bf16.gmra.mxu1 %vm1503_vm10, %v2844_v7  ;;  %v2141_v17 = vadd.f32 %v2062_v51, %v1797_v26 }
 0x133   : > { %v2173_v18 = vpack.c.bf16 %v2141_v17, %v2141_v17  ;;  %v2889_v35 = vpack.c.bf16 %v2141_v17, %v2140_v50 }
 0x134   : > { %v1032_v14 = vpop.permute.xlu1 %1031 }
 0x135   : > { %2890 = vst [vmem:[%s3722_s20] sm:$0xff] %v2889_v35   ;;  %v2237_v20 = vunpack.c.l.bf16 %v2173_v18  ;;  %2821 = vmatmul.msk.bf16.gmra.mxu2 %vm1503_vm10, %v2878_v59  ;;  %2824 = vmatmul.msk.bf16.vlgmr.msra.gmra.mxu3 %vm1503_vm10, %v2881_v55  ;;  %v1141_v0 = vsel %vm1087_vm8, %v921_v47, %v1032_v14  ;;  %v2880_v55 = vld [vmem:[#allocation2 + $0x68] sm:$0xff] }
 0x136   : > { %v1570_v16 = vpop.f32.mrf.mxu0  ;;  %v1801_v42 = vpop.f32.mrf.mxu1  ;;  %v1178_v33 = vsel %vm1142_vm7, %v1141_v0, %v1086_v9 }
 0x137   : > { %v2268_v56 = vadd.f32 %v2237_v20, %v2236_v2  ;;  %v2306_v39 = vmul.f32 %v2237_v20, %v2237_v20  ;;  %v1800_v43 = vadd.f32 %v1799_v49, %v1570_v16  ;;  %v1231_v38 = vunpack.c.l.b16 %v1178_v33 }
 0x138   : > { %v3731_v53 = vpop.f32.mrf.mxu3  ;;  %v2065_v8 = vpop.f32.mrf.mxu2  ;;  %v1232_v24 = vunpack.c.h.b16 %v1178_v33 }
 0x139   : > { %v2337_v21 = vadd.f32 %v2306_v39, %v2305_v46  ;;  %2650 = vmatmul.msk.bf16.gmra.mxu0 %vm1503_vm10, %v2861_v63  ;;  %v2142_v3 = vadd.f32 %v2065_v8, %v1800_v43  ;;  %v1267_v37 = vpack.c.b16 %v1231_v38, %v1231_v38  ;;  %v2863_v43 = vld [vmem:[#allocation2 + $0x60] sm:$0xff] }
 0x13a   : > { %v1268_v15 = vpack.c.b16 %v1232_v24, %v1232_v24 }
 0x13b   : > { %v2174_v41 = vpack.c.bf16 %v2142_v3, %v2142_v3  ;;  %1340 = vst.msk [vmem:[#allocation2 + $0x88] sm:$0xf] %vm1305_vm9, %v1267_v37 }
 0x13c   : > { %1341 = vst.msk [vmem:[#allocation2 + $0x8c] sm:$0xf] %vm1305_vm9, %v1268_v15 }
 0x13d   : > { %v2238_v23 = vunpack.c.l.bf16 %v2174_v41 }
 0x13e   : > { %v1572_v10 = vpop.f32.mrf.mxu0  ;;  %v1804_v58 = vpop.f32.mrf.mxu1 }
 0x13f   : > { %v2269_v30 = vadd.f32 %v2268_v56, %v2238_v23  ;;  %v2307_v1 = vmul.f32 %v2238_v23, %v2238_v23  ;;  %v1802_v28 = vadd.f32 %v1801_v42, %v1572_v10 }
 0x140   : > { %v3736_v32 = vpop.f32.mrf.mxu3  ;;  %v2067_v11 = vpop.f32.mrf.mxu2 }
 0x141   : > { %v2338_v13 = vadd.f32 %v2337_v21, %v2307_v1  ;;  %2735 = vmatmul.msk.bf16.gmra.mxu1 %vm1503_vm10, %v2845_v52  ;;  %v2143_v4 = vadd.f32 %v2067_v11, %v1802_v28 }
 0x143   : > { %v2175_v61 = vpack.c.bf16 %v2143_v4, %v2143_v4  ;;  %v2894_v22 = vpack.c.bf16 %v2143_v4, %v2142_v3  ;;  %v2884_v37 = vld [vmem:[#allocation2 + $0x88] sm:$0xff] }
 0x145   : > { %2967 = vst [vmem:[%s3722_s20 + $0x8] sm:$0xff] %v2894_v22   ;;  %v2239_v40 = vunpack.c.l.bf16 %v2175_v61  ;;  %2822 = vmatmul.msk.bf16.gmra.mxu2 %vm1503_vm10, %v2879_v25  ;;  %2825 = vmatmul.msk.bf16.gmra.mxu3 %vm1503_vm10, %v2882_v34 }
 0x146   : > { %v1575_v60 = vpop.f32.mrf.mxu0  ;;  %v1806_v12 = vpop.f32.mrf.mxu1 }
 0x147   : > { %v2270_v62 = vadd.f32 %v2269_v30, %v2239_v40  ;;  %v2308_v5 = vmul.f32 %v2239_v40, %v2239_v40  ;;  %v1805_v27 = vadd.f32 %v1804_v58, %v1575_v60 }
 0x148   : > { %v3744_v54 = vpop.f32.mrf.mxu3  ;;  %v2070_v6 = vpop.f32.mrf.mxu2 }
 0x149   : > { %v2339_v31 = vadd.f32 %v2338_v13, %v2308_v5  ;;  %2651 = vmatmul.msk.bf16.gmra.mxu0 %vm1503_vm10, %v2862_v57  ;;  %v2144_v45 = vadd.f32 %v2070_v6, %v1805_v27 }
 0x14b   : > { %v2176_v48 = vpack.c.bf16 %v2144_v45, %v2144_v45 }
 0x14d   : > { %v2240_v50 = vunpack.c.l.bf16 %v2176_v48 }
 0x14e   : > { %v1577_v29 = vpop.f32.mrf.mxu0  ;;  %v1809_v19 = vpop.f32.mrf.mxu1 }
 0x14f   : > { %v2271_v49 = vadd.f32 %v2270_v62, %v2240_v50  ;;  %v2309_v26 = vmul.f32 %v2240_v50, %v2240_v50  ;;  %v1807_v7 = vadd.f32 %v1806_v12, %v1577_v29 }
 0x150   : > { %v3747_v51 = vpop.f32.mrf.mxu3  ;;  %v2072_v17 = vpop.f32.mrf.mxu2 }
 0x151   : > { %v2340_v59 = vadd.f32 %v2339_v31, %v2309_v26  ;;  %2736 = vmatmul.msk.bf16.gmra.mxu1 %vm1503_vm10, %v2846_v44  ;;  %v2145_v2 = vadd.f32 %v2072_v17, %v1807_v7 }
 0x153   : > { %v2177_v18 = vpack.c.bf16 %v2145_v2, %v2145_v2  ;;  %v2899_v35 = vpack.c.bf16 %v2145_v2, %v2144_v45 }
 0x155   : > { %2968 = vst [vmem:[%s3722_s20 + $0x10] sm:$0xff] %v2899_v35   ;;  %v2241_v20 = vunpack.c.l.bf16 %v2177_v18  ;;  %2823 = vmatmul.msk.bf16.gmra.mxu2 %vm1503_vm10, %v2880_v55  ;;  %2826 = vmatmul.msk.bf16.gmra.mxu3 %vm1503_vm10, %v2883_v36 }
 0x156   : > { %v1580_v46 = vpop.f32.mrf.mxu0  ;;  %v1811_v16 = vpop.f32.mrf.mxu1 }
 0x157   : > { %v2272_v42 = vadd.f32 %v2271_v49, %v2241_v20  ;;  %v2310_v56 = vmul.f32 %v2241_v20, %v2241_v20  ;;  %v1810_v39 = vadd.f32 %v1809_v19, %v1580_v46 }
 0x158   : > { %v3753_v63 = vpop.f32.mrf.mxu3  ;;  %v2075_v47 = vpop.f32.mrf.mxu2 }
 0x159   : > { %v2341_v9 = vadd.f32 %v2340_v59, %v2310_v56  ;;  %2652 = vmatmul.msk.bf16.gmra.mxu0 %vm1503_vm10, %v2863_v43  ;;  %v2146_v8 = vadd.f32 %v2075_v47, %v1810_v39 }
 0x15b   : > { %v2178_v21 = vpack.c.bf16 %v2146_v8, %v2146_v8 }
 0x15d   : > { %v2242_v3 = vunpack.c.l.bf16 %v2178_v21 }
 0x15e   : > { %v1582_v14 = vpop.f32.mrf.mxu0  ;;  %v1814_v0 = vpop.f32.mrf.mxu1 }
 0x15f   : > { %v2273_v41 = vadd.f32 %v2272_v42, %v2242_v3  ;;  %v2311_v33 = vmul.f32 %v2242_v3, %v2242_v3  ;;  %v1812_v38 = vadd.f32 %v1811_v16, %v1582_v14 }
 0x160   : > { %v3756_v24 = vpop.f32.mrf.mxu3  ;;  %v2077_v23 = vpop.f32.mrf.mxu2 }
 0x161   : > { %v2342_v10 = vadd.f32 %v2341_v9, %v2311_v33  ;;  %v2147_v58 = vadd.f32 %v2077_v23, %v1812_v38 }
 0x163   : > { %v2179_v15 = vpack.c.bf16 %v2147_v58, %v2147_v58  ;;  %v2904_v30 = vpack.c.bf16 %v2147_v58, %v2146_v8 }
 0x165   : > { %2969 = vst [vmem:[%s3722_s20 + $0x18] sm:$0xff] %v2904_v30   ;;  %v2243_v1 = vunpack.c.l.bf16 %v2179_v15  ;;  %2827 = vmatmul.msk.bf16.gmra.mxu3 %vm1503_vm10, %v2884_v37 }
 0x166   : > { %v1585_v28 = vpop.f32.mrf.mxu0  ;;  %v1816_v52 = vpop.f32.mrf.mxu1 }
 0x167   : > { %v2274_v11 = vadd.f32 %v2273_v41, %v2243_v1  ;;  %v2312_v13 = vmul.f32 %v2243_v1, %v2243_v1  ;;  %v1815_v4 = vadd.f32 %v1814_v0, %v1585_v28 }
 0x168   : > { %v3760_v61 = vpop.f32.mrf.mxu3  ;;  %v2080_v22 = vpop.f32.mrf.mxu2 }
 0x169   : > { %v2343_v25 = vadd.f32 %v2342_v10, %v2312_v13  ;;  %v2148_v34 = vadd.f32 %v2080_v22, %v1815_v4 }
 0x16b   : > { %v2180_v40 = vpack.c.bf16 %v2148_v34, %v2148_v34 }
 0x16d   : > { %v2244_v60 = vunpack.c.l.bf16 %v2180_v40 }
 0x16e   : > { %v1587_v12 = vpop.f32.mrf.mxu0  ;;  %v1819_v62 = vpop.f32.mrf.mxu1 }
 0x16f   : > { %v2275_v5 = vadd.f32 %v2274_v11, %v2244_v60  ;;  %v2313_v27 = vmul.f32 %v2244_v60, %v2244_v60  ;;  %v1817_v57 = vadd.f32 %v1816_v52, %v1587_v12 }
 0x170   : > { %v3762_v6 = vpop.f32.mrf.mxu3  ;;  %v2082_v31 = vpop.f32.mrf.mxu2 }
 0x171   : > { %v2344_v45 = vadd.f32 %v2343_v25, %v2313_v27  ;;  %v2149_v48 = vadd.f32 %v2082_v31, %v1817_v57 }
 0x173   : > { %v2181_v50 = vpack.c.bf16 %v2149_v48, %v2149_v48  ;;  %v2909_v29 = vpack.c.bf16 %v2149_v48, %v2148_v34 }
 0x175   : > { %2970 = vst [vmem:[%s3722_s20 + $0x20] sm:$0xff] %v2909_v29   ;;  %v2245_v19 = vunpack.c.l.bf16 %v2181_v50 }
 0x176   : > { %v1590_v49 = vpop.f32.mrf.mxu0  ;;  %v1821_v26 = vpop.f32.mrf.mxu1 }
 0x177   : > { %v2276_v7 = vadd.f32 %v2275_v5, %v2245_v19  ;;  %v2314_v44 = vmul.f32 %v2245_v19, %v2245_v19  ;;  %v1820_v17 = vadd.f32 %v1819_v62, %v1590_v49 }
 0x178   : > { %v1854_v59 = vpop.f32.mrf.mxu3  ;;  %v2085_v2 = vpop.f32.mrf.mxu2 }
 0x179   : > { %v2345_v18 = vadd.f32 %v2344_v45, %v2314_v44  ;;  %v3766_v35 = vadd.f32 %v1854_v59, %v3731_v53  ;;  %v2150_v55 = vadd.f32 %v2085_v2, %v1820_v17 }
 0x17b   : > { %v2182_v36 = vpack.c.bf16 %v2150_v55, %v2150_v55 }
 0x17d   : > { %v2246_v20 = vunpack.c.l.bf16 %v2182_v36 }
 0x17e   : > { %v1592_v46 = vpop.f32.mrf.mxu0  ;;  %v1824_v16 = vpop.f32.mrf.mxu1 }
 0x17f   : > { %v2277_v42 = vadd.f32 %v2276_v7, %v2246_v20  ;;  %v2315_v56 = vmul.f32 %v2246_v20, %v2246_v20  ;;  %v1822_v39 = vadd.f32 %v1821_v26, %v1592_v46 }
 0x180   : > { %v1856_v43 = vpop.f32.mrf.mxu3  ;;  %v2087_v47 = vpop.f32.mrf.mxu2 }
 0x181   : > { %v2346_v9 = vadd.f32 %v2345_v18, %v2315_v56  ;;  %v2151_v8 = vadd.f32 %v2087_v47, %v1822_v39  ;;  %v1857_v39 = vadd.f32 %v1856_v43, %v3736_v32 }
 0x183   : > { %v2183_v21 = vpack.c.bf16 %v2151_v8, %v2151_v8  ;;  %v2914_v3 = vpack.c.bf16 %v2151_v8, %v2150_v55 }
 0x185   : > { %2971 = vst [vmem:[%s3722_s20 + $0x28] sm:$0xff] %v2914_v3   ;;  %v2247_v14 = vunpack.c.l.bf16 %v2183_v21 }
 0x186   : > { %v1595_v0 = vpop.f32.mrf.mxu0  ;;  %v1826_v41 = vpop.f32.mrf.mxu1 }
 0x187   : > { %v3769_v53 = vadd.f32 %v2277_v42, %v2247_v14  ;;  %v2316_v33 = vmul.f32 %v2247_v14, %v2247_v14  ;;  %v1825_v37 = vadd.f32 %v1824_v16, %v1595_v0 }
 0x188   : > { %v1859_v38 = vpop.f32.mrf.mxu3  ;;  %v2090_v23 = vpop.f32.mrf.mxu2 }
 0x189   : > { %v3771_v10 = vadd.f32 %v2346_v9, %v2316_v33  ;;  %v3774_v58 = vadd.f32 %v1859_v38, %v3744_v54  ;;  %v2152_v11 = vadd.f32 %v2090_v23, %v1825_v37 }
 0x18b   : > { %v2184_v23 = vpack.c.bf16 %v2152_v11, %v2152_v11 }
 0x18d   : > { %v2248_v43 = vunpack.c.l.bf16 %v2184_v23 }
 0x18e   : > { %v1597_v15 = vpop.f32.mrf.mxu0  ;;  %v1829_v30 = vpop.f32.mrf.mxu1 }
 0x18f   : > { %v1827_v1 = vadd.f32 %v1826_v41, %v1597_v15 }
 0x190   : > { %v3776_v28 = vpop.f32.mrf.mxu3  ;;  %v2092_v52 = vpop.f32.mrf.mxu2 }
 0x191   : > { %v2153_v13 = vadd.f32 %v2092_v52, %v1827_v1 }
 0x193   : > { %v2919_v4 = vpack.c.bf16 %v2153_v13, %v2152_v11  ;;  %v2185_v32 = vpack.c.bf16 %v2153_v13, %v2153_v13  ;;  %v1862_v11 = vadd.f32 %v3776_v28, %v3747_v51 }
 0x195   : > { %2972 = vst [vmem:[%s3722_s20 + $0x30] sm:$0xff] %v2919_v4   ;;  %v2249_v4 = vunpack.c.l.bf16 %v2185_v32 }
 0x196   : > { %v1600_v22 = vpop.f32.mrf.mxu0  ;;  %v1831_v25 = vpop.f32.mrf.mxu1 }
 0x197   : > { %v1830_v54 = vadd.f32 %v1829_v30, %v1600_v22 }
 0x198   : > { %v1864_v34 = vpop.f32.mrf.mxu3  ;;  %v2095_v40 = vpop.f32.mrf.mxu2 }
 0x199   : > { %v3780_v60 = vadd.f32 %v1864_v34, %v3753_v63  ;;  %v2154_v31 = vadd.f32 %v2095_v40, %v1830_v54 }
 0x19b   : > { %v2186_v15 = vpack.c.bf16 %v2154_v31, %v2154_v31 }
 0x19d   : > { %v2250_v22 = vunpack.c.l.bf16 %v2186_v15 }
 0x19e   : > { %v1602_v12 = vpop.f32.mrf.mxu0  ;;  %v1834_v62 = vpop.f32.mrf.mxu1 }
 0x19f   : > { %v1832_v5 = vadd.f32 %v1831_v25, %v1602_v12  ;;  %v2279_v12 = vadd.f32 %v3769_v53, %v2248_v43 }
 0x1a0   : > { %v3782_v27 = vpop.f32.mrf.mxu3  ;;  %v2097_v57 = vpop.f32.mrf.mxu2 }
 0x1a1   : > { %v2155_v45 = vadd.f32 %v2097_v57, %v1832_v5  ;;  %v2319_v57 = vmul.f32 %v2250_v22, %v2250_v22  ;;  %v2280_v53 = vadd.f32 %v2279_v12, %v2249_v4 }
 0x1a3   : > { %v2924_v48 = vpack.c.bf16 %v2155_v45, %v2154_v31  ;;  %v2187_v25 = vpack.c.bf16 %v2155_v45, %v2155_v45 }
 0x1a5   : > { %2973 = vst [vmem:[%s3722_s20 + $0x38] sm:$0xff] %v2924_v48   ;;  %v2251_v31 = vunpack.c.l.bf16 %v2187_v25 }
 0x1a6   : > { %v1605_v50 = vpop.f32.mrf.mxu0  ;;  %v1836_v29 = vpop.f32.mrf.mxu1 }
 0x1a7   : > { %v1835_v63 = vadd.f32 %v1834_v62, %v1605_v50  ;;  %v2318_v62 = vmul.f32 %v2249_v4, %v2249_v4 }
 0x1a8   : > { %v1869_v19 = vpop.f32.mrf.mxu3  ;;  %v2100_v49 = vpop.f32.mrf.mxu2 }
 0x1a9   : > { %v3786_v26 = vadd.f32 %v1869_v19, %v3760_v61  ;;  %v2156_v18 = vadd.f32 %v2100_v49, %v1835_v63 }
 0x1ab   : > { %v2188_v40 = vpack.c.bf16 %v2156_v18, %v2156_v18 }
 0x1ae   : > { %v1607_v7 = vpop.f32.mrf.mxu0  ;;  %v1839_v44 = vpop.f32.mrf.mxu1 }
 0x1af   : > { %v1837_v17 = vadd.f32 %v1836_v29, %v1607_v7  ;;  %v2252_v7 = vunpack.c.l.bf16 %v2188_v40  ;;  %v1867_v40 = vadd.f32 %v3782_v27, %v3756_v24 }
 0x1b0   : > { %v3788_v59 = vpop.f32.mrf.mxu3  ;;  %v2102_v2 = vpop.f32.mrf.mxu2 }
 0x1b1   : > { %v2157_v55 = vadd.f32 %v2102_v2, %v1837_v17  ;;  %v2281_v17 = vadd.f32 %v2280_v53, %v2250_v22  ;;  %v2320_v2 = vmul.f32 %v2251_v31, %v2251_v31 }
 0x1b3   : > { %v2929_v36 = vpack.c.bf16 %v2157_v55, %v2156_v18  ;;  %v2189_v48 = vpack.c.bf16 %v2157_v55, %v2157_v55 }
 0x1b5   : > { %2974 = vst [vmem:[%s3722_s20 + $0x40] sm:$0xff] %v2929_v36   ;;  %v2253_v18 = vunpack.c.l.bf16 %v2189_v48 }
 0x1b6   : > { %v1610_v20 = vpop.f32.mrf.mxu0  ;;  %v1841_v46 = vpop.f32.mrf.mxu1 }
 0x1b7   : > { %v1840_v56 = vadd.f32 %v1839_v44, %v1610_v20 }
 0x1b8   : > { %v2105_v16 = vpop.f32.mrf.mxu2  ;;  %v2120_v42 = vpop.f32.mrf.mxu3 }
 0x1b9   : > { %v2158_v3 = vadd.f32 %v2105_v16, %v1840_v56  ;;  %v3793_v14 = vadd.f32 %v2120_v42, %v3766_v35  ;;  %v2317_v35 = vmul.f32 %v2248_v43, %v2248_v43 }
 0x1bb   : > { %v2348_v13 = vadd.f32 %v3771_v10, %v2317_v35  ;;  %v2190_v51 = vpack.c.bf16 %v2158_v3, %v2158_v3 }
 0x1bd   : > { %v2349_v28 = vadd.f32 %v2348_v13, %v2318_v62  ;;  %v2254_v16 = vunpack.c.l.bf16 %v2190_v51 }
 0x1be   : > { %v1612_v61 = vpop.f32.mrf.mxu0  ;;  %v1844_v9 = vpop.f32.mrf.mxu1 }
 0x1bf   : > { %v1842_v47 = vadd.f32 %v1841_v46, %v1612_v61  ;;  %v2350_v20 = vadd.f32 %v2349_v28, %v2319_v57  ;;  %v2321_v46 = vmul.f32 %v2252_v7, %v2252_v7 }
 0x1c0   : > { %v2107_v8 = vpop.f32.mrf.mxu2  ;;  %v2122_v21 = vpop.f32.mrf.mxu3 }
 0x1c1   : > { %v2159_v0 = vadd.f32 %v2107_v8, %v1842_v47  ;;  %v3795_v41 = vadd.f32 %v2122_v21, %v1857_v39  ;;  %v2351_v39 = vadd.f32 %v2350_v20, %v2320_v2 }
 0x1c3   : > { %v2934_v33 = vpack.c.bf16 %v2159_v0, %v2158_v3  ;;  %v2949_v38 = vpack.c.bf16 %v3795_v41, %v3793_v14  ;;  %v2191_v55 = vpack.c.bf16 %v2159_v0, %v2159_v0  ;;  %v2352_v23 = vadd.f32 %v2351_v39, %v2321_v46 }
 0x1c5   : > { %2975 = vst [vmem:[%s3722_s20 + $0x48] sm:$0xff] %v2934_v33   ;;  %v2255_v8 = vunpack.c.l.bf16 %v2191_v55 }
 0x1c6   : > { %2978 = vst [vmem:[%s3722_s20 + $0x60] sm:$0xff] %v2949_v38   ;;  %v1615_v37 = vpop.f32.mrf.mxu0  ;;  %v1846_v52 = vpop.f32.mrf.mxu1 }
 0x1c7   : > { %v1845_v34 = vadd.f32 %v1844_v9, %v1615_v37  ;;  %v2322_v9 = vmul.f32 %v2253_v18, %v2253_v18  ;;  %v2323_v37 = vmul.f32 %v2254_v16, %v2254_v16 }
 0x1c8   : > { %v2110_v30 = vpop.f32.mrf.mxu2  ;;  %v2125_v1 = vpop.f32.mrf.mxu3 }
 0x1c9   : > { %v2160_v19 = vadd.f32 %v2110_v30, %v1845_v34  ;;  %v3806_v45 = vadd.f32 %v2125_v1, %v3774_v58  ;;  %v2282_v58 = vadd.f32 %v2281_v17, %v2251_v31  ;;  %v2353_v15 = vadd.f32 %v2352_v23, %v2322_v9 }
 0x1ca   : > { %v2324_v1 = vmul.f32 %v2255_v8, %v2255_v8  ;;  %v1872_v23 = vadd.f32 %v3788_v59, %v3762_v6 }
 0x1cb   : > { %v2192_v42 = vpack.c.bf16 %v2160_v19, %v2160_v19  ;;  %v2283_v47 = vadd.f32 %v2282_v58, %v2252_v7  ;;  %v2354_v4 = vadd.f32 %v2353_v15, %v2323_v37  ;;  %v2198_v28 = vpack.c.bf16 %v3806_v45, %v3806_v45 }
 0x1cd   : > { %v2284_v0 = vadd.f32 %v2283_v47, %v2253_v18  ;;  %v2256_v32 = vunpack.c.l.bf16 %v2192_v42  ;;  %v2355_v62 = vadd.f32 %v2354_v4, %v2324_v1  ;;  %v2262_v46 = vunpack.c.l.bf16 %v2198_v28 }
 0x1ce   : > { %v1617_v54 = vpop.f32.mrf.mxu0  ;;  %v1849_v36 = vpop.f32.mrf.mxu1 }
 0x1cf   : > { %v1847_v5 = vadd.f32 %v1846_v52, %v1617_v54  ;;  %v2285_v30 = vadd.f32 %v2284_v0, %v2254_v16  ;;  %v2325_v22 = vmul.f32 %v2256_v32, %v2256_v32 }
 0x1d0   : > { %v2112_v50 = vpop.f32.mrf.mxu2  ;;  %v2127_v29 = vpop.f32.mrf.mxu3 }
 0x1d1   : > { %v2161_v49 = vadd.f32 %v2112_v50, %v1847_v5  ;;  %v3808_v63 = vadd.f32 %v2127_v29, %v1862_v11  ;;  %v2286_v35 = vadd.f32 %v2285_v30, %v2255_v8  ;;  %v2196_v11 = vpack.c.bf16 %v3793_v14, %v3793_v14 }
 0x1d2   : > { %v2356_v24 = vadd.f32 %v2355_v62, %v2325_v22 }
 0x1d3   : > { %v2939_v44 = vpack.c.bf16 %v2161_v49, %v2160_v19  ;;  %v2954_v10 = vpack.c.bf16 %v3808_v63, %v3806_v45  ;;  %v2193_v33 = vpack.c.bf16 %v2161_v49, %v2161_v49  ;;  %v2287_v5 = vadd.f32 %v2286_v35, %v2256_v32 }
 0x1d4   : > { %v2197_v19 = vpack.c.bf16 %v3795_v41, %v3795_v41  ;;  %v2260_v51 = vunpack.c.l.bf16 %v2196_v11  ;;  %v2199_v2 = vpack.c.bf16 %v3808_v63, %v3808_v63 }
 0x1d5   : > { %2976 = vst [vmem:[%s3722_s20 + $0x50] sm:$0xff] %v2939_v44   ;;  %v2257_v52 = vunpack.c.l.bf16 %v2193_v33 }
 0x1d6   : > { %2979 = vst [vmem:[%s3722_s20 + $0x68] sm:$0xff] %v2954_v10   ;;  %v1620_v56 = vpop.f32.mrf.mxu0  ;;  %v1851_v25 = vpop.f32.mrf.mxu1  ;;  %v2261_v17 = vunpack.c.l.bf16 %v2197_v19  ;;  %v2263_v39 = vunpack.c.l.bf16 %v2199_v2 }
 0x1d7   : > { %v1850_v61 = vadd.f32 %v1849_v36, %v1620_v56  ;;  %v2326_v31 = vmul.f32 %v2257_v52, %v2257_v52  ;;  %v2288_v27 = vadd.f32 %v2287_v5, %v2257_v52  ;;  %v2329_v36 = vmul.f32 %v2260_v51, %v2260_v51 }
 0x1d8   : > { %v2115_v21 = vpop.f32.mrf.mxu2  ;;  %v2130_v3 = vpop.f32.mrf.mxu3  ;;  %v2332_v0 = vmul.f32 %v2263_v39, %v2263_v39 }
 0x1d9   : > { %v2162_v38 = vadd.f32 %v2115_v21, %v1850_v61  ;;  %v2168_v48 = vadd.f32 %v2130_v3, %v3780_v60  ;;  %v2357_v44 = vadd.f32 %v2356_v24, %v2326_v31  ;;  %v2330_v61 = vmul.f32 %v2261_v17, %v2261_v17 }
 0x1da   : > { %v2331_v21 = vmul.f32 %v2262_v46, %v2262_v46 }
 0x1db   : > { %v2194_v43 = vpack.c.bf16 %v2162_v38, %v2162_v38  ;;  %v2200_v20 = vpack.c.bf16 %v2168_v48, %v2168_v48 }
 0x1dd   : > { %v2258_v54 = vunpack.c.l.bf16 %v2194_v43  ;;  %v2264_v8 = vunpack.c.l.bf16 %v2200_v20 }
 0x1de   : > { %v1622_v34 = vpop.f32.mrf.mxu0 }
 0x1df   : > { %v1852_v12 = vadd.f32 %v1851_v25, %v1622_v34  ;;  %v2327_v49 = vmul.f32 %v2258_v54, %v2258_v54  ;;  %v2289_v10 = vadd.f32 %v2288_v27, %v2258_v54  ;;  %v2333_v43 = vmul.f32 %v2264_v8, %v2264_v8 }
 0x1e0   : > { %v2117_v13 = vpop.f32.mrf.mxu2  ;;  %v2132_v57 = vpop.f32.mrf.mxu3 }
 0x1e1   : > { %v2163_v50 = vadd.f32 %v2117_v13, %v1852_v12  ;;  %v2169_v29 = vadd.f32 %v2132_v57, %v1867_v40  ;;  %v2358_v41 = vadd.f32 %v2357_v44, %v2327_v49 }
 0x1e3   : > { %v2195_v53 = vpack.c.bf16 %v2163_v50, %v2163_v50  ;;  %v2944_v7 = vpack.c.bf16 %v2163_v50, %v2162_v38  ;;  %v2959_v14 = vpack.c.bf16 %v2169_v29, %v2168_v48  ;;  %v2201_v56 = vpack.c.bf16 %v2169_v29, %v2169_v29 }
 0x1e5   : > { %2977 = vst [vmem:[%s3722_s20 + $0x58] sm:$0xff] %v2944_v7   ;;  %v2259_v60 = vunpack.c.l.bf16 %v2195_v53  ;;  %v2265_v38 = vunpack.c.l.bf16 %v2201_v56 }
 0x1e6   : > { %2980 = vst [vmem:[%s3722_s20 + $0x70] sm:$0xff] %v2959_v14  }
 0x1e7   : > { %v2290_v18 = vadd.f32 %v2289_v10, %v2259_v60  ;;  %v2328_v55 = vmul.f32 %v2259_v60, %v2259_v60  ;;  %v2334_v4 = vmul.f32 %v2265_v38, %v2265_v38 }
 0x1e8   : > { %v2135_v58 = vpop.f32.mrf.mxu3 }
 0x1e9   : > { %v2291_v16 = vadd.f32 %v2290_v18, %v2260_v51  ;;  %v2359_v42 = vadd.f32 %v2358_v41, %v2328_v55  ;;  %v2170_v45 = vadd.f32 %v2135_v58, %v3786_v26 }
 0x1eb   : > { %v2292_v47 = vadd.f32 %v2291_v16, %v2261_v17  ;;  %v2360_v9 = vadd.f32 %v2359_v42, %v2329_v36  ;;  %v2202_v33 = vpack.c.bf16 %v2170_v45, %v2170_v45 }
 0x1ed   : > { %v2361_v3 = vadd.f32 %v2360_v9, %v2330_v61  ;;  %v2293_v63 = vadd.f32 %v2292_v47, %v2262_v46  ;;  %v2266_v1 = vunpack.c.l.bf16 %v2202_v33 }
 0x1ef   : > { %v2294_v37 = vadd.f32 %v2293_v63, %v2263_v39  ;;  %v2362_v32 = vadd.f32 %v2361_v3, %v2331_v21  ;;  %v2335_v12 = vmul.f32 %v2266_v1, %v2266_v1 }
 0x1f0   : > { %v2137_v26 = vpop.f32.mrf.mxu3 }
 0x1f1   : > { %v2295_v15 = vadd.f32 %v2294_v37, %v2264_v8  ;;  %v2363_v30 = vadd.f32 %v2362_v32, %v2332_v0  ;;  %v2171_v52 = vadd.f32 %v2137_v26, %v1872_v23 }
 0x1f3   : > { %v2296_v35 = vadd.f32 %v2295_v15, %v2265_v38  ;;  %v2364_v22 = vadd.f32 %v2363_v30, %v2333_v43  ;;  %v2203_v25 = vpack.c.bf16 %v2171_v52, %v2171_v52  ;;  %v2964_v34 = vpack.c.bf16 %v2171_v52, %v2170_v45 }
 0x1f5   : > { %v2365_v40 = vadd.f32 %v2364_v22, %v2334_v4  ;;  %v2297_v54 = vadd.f32 %v2296_v35, %v2266_v1  ;;  %2981 = vst [vmem:[%s3722_s20 + $0x78] sm:$0xff] %v2964_v34   ;;  %v2267_v6 = vunpack.c.l.bf16 %v2203_v25 }
 0x1f7   : > { %v2366_v59 = vadd.f32 %v2365_v40, %v2335_v12  ;;  %v2298_v11 = vadd.f32 %v2297_v54, %v2267_v6  ;;  %v2336_v62 = vmul.f32 %v2267_v6, %v2267_v6 }
 0x1f9   : > { %v2299_v5 = vrot.slane %v2298_v11, 4  ;;  %v2367_v13 = vadd.f32 %v2366_v59, %v2336_v62 }
 0x1fb   : > { %v2300_v57 = vadd.f32 %v2299_v5, %v2298_v11  ;;  %v2368_v31 = vrot.slane %v2367_v13, 4 }
 0x1fd   : > { %v2301_v48 = vrot.slane %v2300_v57, 2  ;;  %v2369_v50 = vadd.f32 %v2368_v31, %v2367_v13 }
 0x1ff   : > { %v2302_v29 = vadd.f32 %v2301_v48, %v2300_v57  ;;  %v2370_v19 = vrot.slane %v2369_v50, 2 }
 0x201   : > { %v2303_v24 = vrot.slane %v2302_v29, 1  ;;  %v2371_v27 = vadd.f32 %v2370_v19, %v2369_v50 }
 0x203   : > { %v2372_v49 = vrot.slane %v2371_v27, 1  ;;  %v2304_v53 = vadd.f32 %v2303_v24, %v2302_v29 }
 0x205   : > { %v2373_v7 = vadd.f32 %v2372_v49, %v2371_v27 }
 0x207   : > { %v2375_v14 = vsel %vm901_vm4, %v2304_v53, %v2373_v7 }
 0x208   : > { %2376 = vst [vmem:[%s465_s28] sm:$0x3] %v2375_v14 }
 0x209 PF: > { %s18_s26 = sadd.s32 1, %s3039_s26   ;;  %s3863_s24 = smov %s3035_s25 }
 0x20a   : > { %p15_p5 = scmp.ge.s32.totalorder %s18_s26, 4   ;;  %s3864_s25 = smov %s3866_s27 }
 0x20c   :  { %17 = sbr.rel (!%p15_p5) target bundleno = 2 (0x2), region = 96 }

// kernel: resnet_v2_block.5
= control target key start
LH: loop header
LB: loop body
LE: loop exit
PB: predicated region body
PF: predicated region fallthrough
CT: control target
= control target key end

     0   :  { %s5356_s24 = smov 0   ;;  %s5358_s25 = smov 0   ;;  %s6346_s0 = inlined_call_operand.vmem [shape: bf16[2,16,16,128], index: 0, kind: input, shape index: {}, may-alias: {0,1,2}]   ;;  %s6347_s1 = inlined_call_operand.vmem [shape: bf16[2,16,16,128], index: 1, kind: input, shape index: {}, may-alias: {0,1,2}]   ;;  %s6348_s2 = inlined_call_operand.vmem [shape: bf16[2,16,16,128], index: 2, kind: input, shape index: {}, may-alias: {0,1,2}]   ;;  %s6349_s3 = inlined_call_operand.vmem [shape: f32[1,128], index: 3, kind: input, shape index: {}]   ;;  %s6350_s4 = inlined_call_operand.vmem [shape: f32[1,128], index: 4, kind: input, shape index: {}]   ;;  %s6351_s5 = inlined_call_operand.vmem [shape: bf16[3,384,128], index: 5, kind: input, shape index: {}]   ;;  %s6352_s6 = inlined_call_operand.vmem [shape: f32[1,128], index: 6, kind: input, shape index: {}]   ;;  %s6353_s7 = inlined_call_operand.vmem [shape: f32[2,16,16,128], index: 7, kind: output, shape index: {}]  }
   0x1   :  { %s5360_s26 = smov 0  }
   0x2 LB: > { %s29_s27 = sadd.s32 1, %s5310_s25  ;;  %p3957_p0 = scmp.ge.s32.totalorder %s5314_s26, 1  ;;  %s5314_s26 = sphi %s5360_s26, %s17_s26   ;;  %s5310_s25 = sphi %s5358_s25, %s6373_s25   ;;  %s5306_s24 = sphi %s5356_s24, %s6372_s24  }
   0x3   : > { %p31_p1 = scmp.ge.s32.totalorder %s29_s27, 2  ;;  %p323_p2 = scmp.lt.s32.totalorder %s5314_s26, 3 }
   0x5   : > { %s6375_s27 = smov (%p31_p1, %s29_s27), 0  ;;  %p324_p3 = pnand %p3957_p0, %p323_p2 }
   0x6   : > { %p392_p4 = scmp.lt.s32.totalorder (!%p324_p3), %s5306_s24, 1 }
   0x7   : > { %327 = sbr.rel (%p324_p3) target bundleno = 792 (0x318), region = 48 }
   0xc   : > { %v5060_v0 = vld [vmem:[%s6351_s5 + $0xf8] sm:$0xff]  ;;  %v5059_v1 = vld [vmem:[%s6351_s5 + $0xf0] sm:$0xff]  ;;  %s6377_s24 = smov (!%p392_p4, %s5306_s24), 1  ;;  %v5058_v2 = vld [vmem:[%s6351_s5 + $0xe8] sm:$0xff]  ;;  %vm918_vm0 = vcmask 1040384   ;;  %vm993_vm3 = vcmask 1047552  }
   0xd   : > { %2000 = vmatpush.bf16.msra.mxu0 %v5060_v0  ;;  %5237 = vmatpush.bf16.msra.mxu1 %v5060_v0  ;;  %s5383_s9 = sshll.u32 %s6377_s24, 7  ;;  %v5397_v3 = vld [vmem:[%s6349_s3] ss:$0 sm:$0xff]  ;;  %v5056_v39 = vld [vmem:[%s6351_s5 + $0xd8] sm:$0xff]  ;;  %v5055_v56 = vld [vmem:[%s6351_s5 + $0xd0] sm:$0xff]  ;;  %s4932_s22 = sshll.u32 %s6377_s24, 8 }
   0xe   : > { %5238 = vmatpush.bf16.msra.mxu2 %v5060_v0  ;;  %5239 = vmatpush.bf16.msra.mxu3 %v5060_v0  ;;  %s5392_s14 = scalar_lea.vmem %s6346_s0, %s5383_s9  ;;  %v5405_v7 = vld [vmem:[%s6350_s4] ss:$0 sm:$0xff]  ;;  %vm919_vm1 = vsmask.f32 256  ;;  %s414_s23 = scalar_lea.vmem %s6347_s1, %s5383_s9  ;;  %vm994_vm4 = vsmask.f32 7424 }
   0xf   : > { %v5154_v4 = vld [vmem:[%s5392_s14] sm:$0xff]   ;;  %v5409_v13 = vld [vmem:[%s5392_s14 + $0x8] sm:$0xff]   ;;  %vm5466_vm2 = vmand %vm918_vm0, %vm919_vm1  ;;  %s6199_s8 = scalar_lea.vmem %s6353_s7, %s4932_s22  ;;  %s4931_s24 = sadd.s32 120, %s5383_s9 }
  0x10   : > { %v5225_v5 = vld [vmem:[%s5392_s14 + $0x20] sm:$0xff]   ;;  %v5155_v8 = vunpack.c.l.bf16 %v5154_v4  ;;  %v5156_v9 = vunpack.c.h.bf16 %v5154_v4  ;;  %v5159_v26 = vunpack.c.l.bf16 %v5409_v13  ;;  %v5160_v30 = vunpack.c.h.bf16 %v5409_v13  ;;  %vm5786_vm5 = vmand %vm993_vm3, %vm994_vm4  ;;  %s431_s12 = scalar_lea.vmem %s6348_s2, %s4931_s24 }
  0x11   : > { %2001 = vmatpush.bf16.msra.mxu0 %v5059_v1  ;;  %5240 = vmatpush.bf16.msra.mxu1 %v5059_v1  ;;  %v5229_v6 = vld [vmem:[%s5392_s14 + $0x40] sm:$0xff]   ;;  %v5171_v10 = vunpack.c.l.bf16 %v5225_v5  ;;  %v5172_v11 = vunpack.c.h.bf16 %v5225_v5  ;;  %v5054_v5 = vld [vmem:[%s6351_s5 + $0xc8] sm:$0xff] }
  0x12   : > { %5241 = vmatpush.bf16.msra.mxu2 %v5059_v1  ;;  %5242 = vmatpush.bf16.msra.mxu3 %v5059_v1  ;;  %v5233_v12 = vld [vmem:[%s5392_s14 + $0x60] sm:$0xff]   ;;  %v5187_v14 = vunpack.c.l.bf16 %v5229_v6  ;;  %v5188_v15 = vunpack.c.h.bf16 %v5229_v6  ;;  %v541_v18 = vmul.f32 %v5397_v3, %v5155_v8  ;;  %v542_v19 = vmul.f32 %v5397_v3, %v5156_v9 }
  0x13   : > { %v5203_v16 = vunpack.c.l.bf16 %v5233_v12  ;;  %v5204_v17 = vunpack.c.h.bf16 %v5233_v12  ;;  %v549_v20 = vmul.f32 %v5397_v3, %v5171_v10  ;;  %v550_v21 = vmul.f32 %v5397_v3, %v5172_v11  ;;  %v5057_v22 = vld [vmem:[%s6351_s5 + $0xe0] sm:$0xff]  ;;  %v5453_v10 = vld [vmem:[%s5392_s14 + $0x28] sm:$0xff]  }
  0x14   : > { %v557_v23 = vmul.f32 %v5397_v3, %v5187_v14  ;;  %v558_v24 = vmul.f32 %v5397_v3, %v5188_v15  ;;  %v573_v27 = vadd.f32 %v5405_v7, %v541_v18  ;;  %v574_v28 = vadd.f32 %v5405_v7, %v542_v19 }
  0x15   : > { %2002 = vmatpush.bf16.msra.mxu0 %v5058_v2  ;;  %5243 = vmatpush.bf16.msra.mxu1 %v5058_v2  ;;  %v565_v25 = vmul.f32 %v5397_v3, %v5203_v16  ;;  %v581_v29 = vadd.f32 %v5405_v7, %v549_v20  ;;  %v582_v31 = vadd.f32 %v5405_v7, %v550_v21 }
  0x16   : > { %5244 = vmatpush.bf16.msra.mxu2 %v5058_v2  ;;  %5245 = vmatpush.bf16.msra.mxu3 %v5058_v2  ;;  %v589_v32 = vadd.f32 %v5405_v7, %v557_v23  ;;  %v590_v33 = vadd.f32 %v5405_v7, %v558_v24  ;;  %v566_v34 = vmul.f32 %v5397_v3, %v5204_v17  ;;  %v605_v35 = vmax.f32 %v573_v27, 0.0  ;;  %v5476_v23 = vld [vmem:[%s5392_s14 + $0x48] sm:$0xff]  }
  0x17   : > { %v606_v36 = vmax.f32 %v574_v28, 0.0  ;;  %v613_v37 = vmax.f32 %v581_v29, 0.0  ;;  %v597_v38 = vadd.f32 %v5405_v7, %v565_v25  ;;  %v614_v40 = vmax.f32 %v582_v31, 0.0  ;;  %v5053_v28 = vld [vmem:[%s6351_s5 + $0xc0] sm:$0xff] }
  0x18   : > { %v621_v41 = vmax.f32 %v589_v32, 0.0  ;;  %v622_v42 = vmax.f32 %v590_v33, 0.0  ;;  %v598_v43 = vadd.f32 %v5405_v7, %v566_v34  ;;  %v637_v44 = vpack.c.bf16 %v605_v35, %v605_v35 }
  0x19   : > { %2003 = vmatpush.bf16.msra.mxu0 %v5057_v22  ;;  %5246 = vmatpush.bf16.msra.mxu1 %v5057_v22  ;;  %v638_v45 = vpack.c.bf16 %v606_v36, %v606_v36  ;;  %v645_v46 = vpack.c.bf16 %v613_v37, %v613_v37  ;;  %v629_v47 = vmax.f32 %v597_v38, 0.0  ;;  %v646_v48 = vpack.c.bf16 %v614_v40, %v614_v40 }
  0x1a   : > { %5247 = vmatpush.bf16.msra.mxu2 %v5057_v22  ;;  %5248 = vmatpush.bf16.msra.mxu3 %v5057_v22  ;;  %v653_v49 = vpack.c.bf16 %v621_v41, %v621_v41  ;;  %v654_v50 = vpack.c.bf16 %v622_v42, %v622_v42  ;;  %v630_v51 = vmax.f32 %v598_v43, 0.0  ;;  %v722_v52 = vunpack.c.l.b16 %v637_v44  ;;  %1178 = vst [vmem:[#allocation2 + $0x1c] sm:$0xf] %v637_v44  ;;  %v5076_v41 = vld [vmem:[%s6351_s5 + $0x178] sm:$0xff] }
  0x1b   : > { %v723_v53 = vunpack.c.l.b16 %v638_v45  ;;  %v730_v54 = vunpack.c.l.b16 %v645_v46  ;;  %v661_v55 = vpack.c.bf16 %v629_v47, %v629_v47  ;;  %1179 = vst [vmem:[#allocation2 + $0x28] sm:$0xf] %v638_v45  ;;  %v731_v57 = vunpack.c.l.b16 %v646_v48  ;;  %v4988_v42 = vld [vmem:[%s6351_s5 + $0x38] sm:$0xff] }
  0x1c   : > { %v738_v58 = vunpack.c.l.b16 %v653_v49  ;;  %v739_v59 = vunpack.c.l.b16 %v654_v50  ;;  %v662_v60 = vpack.c.bf16 %v630_v51, %v630_v51  ;;  %1186 = vst [vmem:[#allocation2 + $0x7c] sm:$0xf] %v645_v46  ;;  %v543_v63 = vmul.f32 %v5397_v3, %v5159_v26  ;;  %v5068_v47 = vld [vmem:[%s6351_s5 + $0x138] sm:$0xff] }
  0x1d   : > { %2004 = vmatpush.bf16.msra.mxu0 %v5056_v39  ;;  %5249 = vmatpush.bf16.msra.mxu1 %v5056_v39  ;;  %v5438_v61 = vpack.c.b16 %v723_v53, %v722_v52  ;;  %v746_v62 = vunpack.c.l.b16 %v661_v55  ;;  %v5441_v0 = vpack.c.b16 %v731_v57, %v730_v54  ;;  %1187 = vst [vmem:[#allocation2 + $0x88] sm:$0xf] %v646_v48  ;;  %v5175_v22 = vunpack.c.l.bf16 %v5453_v10  ;;  %v4996_v48 = vld [vmem:[%s6351_s5 + $0x78] sm:$0xff]  ;;  %v5234_v57 = vld [vmem:[%s5392_s14 + $0x68] sm:$0xff]  }
  0x1e   : > { %5250 = vmatpush.bf16.msra.mxu2 %v5056_v39  ;;  %5251 = vmatpush.bf16.msra.mxu3 %v5056_v39  ;;  %v5443_v1 = vpack.c.b16 %v739_v59, %v738_v58  ;;  %v747_v2 = vunpack.c.l.b16 %v662_v60  ;;  %v544_v4 = vmul.f32 %v5397_v3, %v5160_v30  ;;  %1194 = vst [vmem:[#allocation2 + $0xdc] sm:$0xf] %v653_v49  ;;  %v5176_v27 = vunpack.c.h.bf16 %v5453_v10 }
  0x1f   : > { %v782_v6 = vshrl.u32 %v5438_v61, 16  ;;  %v785_v8 = vshll.u32 %v5438_v61, 16  ;;  %v575_v9 = vadd.f32 %v5405_v7, %v543_v63  ;;  %v810_v11 = vshrl.u32 %v5441_v0, 16  ;;  %1195 = vst [vmem:[#allocation2 + $0xe8] sm:$0xf] %v654_v50  ;;  %v5061_v61 = vld [vmem:[%s6351_s5 + $0x100] sm:$0xff] }
  0x20   : > { %v813_v12 = vshll.u32 %v5441_v0, 16  ;;  %v838_v13 = vshrl.u32 %v5443_v1, 16  ;;  %v841_v14 = vshll.u32 %v5443_v1, 16  ;;  %v5461_v16 = vpack.c.b16 %v747_v2, %v746_v62  ;;  %1202 = vst [vmem:[#allocation2 + $0x13c] sm:$0xf] %v661_v55  ;;  %v4987_v62 = vld [vmem:[%s6351_s5 + $0x30] sm:$0xff] }
  0x21   : > { %2005 = vmatpush.bf16.msra.mxu0 %v5055_v56  ;;  %5252 = vmatpush.bf16.msra.mxu1 %v5055_v56  ;;  %v784_v15 = vrot.slane %v782_v6, 7  ;;  %v576_v17 = vadd.f32 %v5405_v7, %v544_v4  ;;  %v812_v19 = vrot.slane %v810_v11, 7  ;;  %1203 = vst [vmem:[#allocation2 + $0x148] sm:$0xf] %v662_v60  ;;  %v607_v21 = vmax.f32 %v575_v9, 0.0  ;;  %v5075_v60 = vld [vmem:[%s6351_s5 + $0x170] sm:$0xff] }
  0x22   : > { %5253 = vmatpush.bf16.msra.mxu2 %v5055_v56  ;;  %5254 = vmatpush.bf16.msra.mxu3 %v5055_v56  ;;  %v840_v20 = vrot.slane %v838_v13, 7  ;;  %v6358_v25 = vshrl.u32 %v5461_v16, 16  ;;  %v869_v31 = vshll.u32 %v5461_v16, 16  ;;  %v5191_v36 = vunpack.c.l.bf16 %v5476_v23 }
  0x23   : > { %v787_v24 = vor.u32 %v785_v8, %v784_v15  ;;  %v608_v26 = vmax.f32 %v576_v17, 0.0  ;;  %v815_v29 = vor.u32 %v813_v12, %v812_v19  ;;  %v639_v32 = vpack.c.bf16 %v607_v21, %v607_v21  ;;  %v5531_v21 = vld [vmem:[%s5392_s14 + $0x10] sm:$0xff]  }
  0x24   : > { %v843_v30 = vor.u32 %v841_v14, %v840_v20  ;;  %v868_v34 = vrot.slane %v6358_v25, 7  ;;  %v551_v63 = vmul.f32 %v5397_v3, %v5175_v22  ;;  %v5192_v2 = vunpack.c.h.bf16 %v5476_v23 }
  0x25   : > { %2006 = vmatpush.bf16.msra.mxu0 %v5054_v5  ;;  %5255 = vmatpush.bf16.msra.mxu1 %v5054_v5  ;;  %v922_v33 = vsel %vm5466_vm2, 0, %v787_v24  ;;  %v640_v35 = vpack.c.bf16 %v608_v26, %v608_v26  ;;  %v926_v39 = vsel %vm5466_vm2, 0, %v815_v29  ;;  %1180 = vst [vmem:[#allocation2 + $0x34] sm:$0xf] %v639_v32  ;;  %v724_v52 = vunpack.c.l.b16 %v639_v32 }
  0x26   : > { %5256 = vmatpush.bf16.msra.mxu2 %v5054_v5  ;;  %5257 = vmatpush.bf16.msra.mxu3 %v5054_v5  ;;  %v1034_v37 = vunpack.c.l.b16 %v922_v33  ;;  %v1035_v38 = vunpack.c.h.b16 %v922_v33  ;;  %v930_v40 = vsel %vm5466_vm2, 0, %v843_v30  ;;  %v1042_v43 = vunpack.c.l.b16 %v926_v39 }
  0x27   : > { %v1043_v44 = vunpack.c.h.b16 %v926_v39  ;;  %v1050_v45 = vunpack.c.l.b16 %v930_v40  ;;  %v1051_v46 = vunpack.c.h.b16 %v930_v40  ;;  %1181 = vst [vmem:[#allocation2 + $0x40] sm:$0xf] %v640_v35  ;;  %v871_v51 = vor.u32 %v869_v31, %v868_v34 }
  0x28   : > { %v1070_v49 = vpack.c.b16 %v1034_v37, %v1034_v37  ;;  %v1071_v50 = vpack.c.b16 %v1035_v38, %v1035_v38  ;;  %v1078_v53 = vpack.c.b16 %v1042_v43, %v1042_v43  ;;  %v725_v56 = vunpack.c.l.b16 %v640_v35 }
  0x29   : > { %2007 = vmatpush.bf16.msra.mxu0 %v5053_v28  ;;  %5258 = vmatpush.bf16.msra.mxu1 %v5053_v28  ;;  %v1079_v54 = vpack.c.b16 %v1043_v44, %v1043_v44  ;;  %v1086_v55 = vpack.c.b16 %v1050_v45, %v1050_v45  ;;  %v1087_v58 = vpack.c.b16 %v1051_v46, %v1051_v46  ;;  %v934_v59 = vsel %vm5466_vm2, 0, %v871_v51 }
  0x2a   : > { %5259 = vmatpush.bf16.msra.mxu2 %v5053_v28  ;;  %5260 = vmatpush.bf16.msra.mxu3 %v5053_v28  ;;  %1142 = vst [vmem:[#allocation2 + $0x18] sm:$0xf] %v1070_v49  ;;  %v1058_v4 = vunpack.c.l.b16 %v934_v59  ;;  %v1059_v5 = vunpack.c.h.b16 %v934_v59  ;;  %v5524_v9 = vpack.c.b16 %v725_v56, %v724_v52  ;;  %v552_v10 = vmul.f32 %v5397_v3, %v5176_v27  ;;  %v5074_v56 = vld [vmem:[%s6351_s5 + $0x168] sm:$0xff] }
  0x2b   : > { %1143 = vst [vmem:[#allocation2 + $0x24] sm:$0xf] %v1071_v50  ;;  %v583_v15 = vadd.f32 %v5405_v7, %v551_v63  ;;  %v559_v17 = vmul.f32 %v5397_v3, %v5191_v36  ;;  %v560_v19 = vmul.f32 %v5397_v3, %v5192_v2  ;;  %v5207_v20 = vunpack.c.l.bf16 %v5234_v57  ;;  %v4986_v63 = vld [vmem:[%s6351_s5 + $0x28] sm:$0xff]  ;;  %v4995_v2 = vld [vmem:[%s6351_s5 + $0x70] sm:$0xff] }
  0x2c   : > { %1150 = vst [vmem:[#allocation2 + $0x78] sm:$0xf] %v1078_v53  ;;  %v1094_v22 = vpack.c.b16 %v1058_v4, %v1058_v4  ;;  %v1095_v23 = vpack.c.b16 %v1059_v5, %v1059_v5  ;;  %v789_v24 = vshrl.u32 %v5524_v9, 16  ;;  %v792_v26 = vshll.u32 %v5524_v9, 16 }
  0x2d   : > { %2089 = vmatpush.bf16.msrb.mxu1 %v5068_v47  ;;  %2756 = vmatpush.bf16.msrb.mxu0 %v4996_v48  ;;  %1151 = vst [vmem:[#allocation2 + $0x84] sm:$0xf] %v1079_v54  ;;  %v584_v27 = vadd.f32 %v5405_v7, %v552_v10  ;;  %v615_v28 = vmax.f32 %v583_v15, 0.0  ;;  %v591_v29 = vadd.f32 %v5405_v7, %v559_v17  ;;  %v5208_v30 = vunpack.c.h.bf16 %v5234_v57 }
  0x2e   : > { %2178 = vmatpush.bf16.msrb.mxu2 %v5076_v41  ;;  %2667 = vmatpush.bf16.msrb.mxu3 %v4988_v42  ;;  %1158 = vst [vmem:[#allocation2 + $0xd8] sm:$0xf] %v1086_v55  ;;  %v791_v32 = vrot.slane %v789_v24, 7  ;;  %v592_v33 = vadd.f32 %v5405_v7, %v560_v19  ;;  %v567_v34 = vmul.f32 %v5397_v3, %v5207_v20  ;;  %v5163_v35 = vunpack.c.l.bf16 %v5531_v21  ;;  %v5067_v55 = vld [vmem:[%s6351_s5 + $0x130] sm:$0xff]  ;;  %v5066_v19 = vld [vmem:[%s6351_s5 + $0x128] sm:$0xff] }
  0x2f   : > { %1159 = vst [vmem:[#allocation2 + $0xe4] sm:$0xf] %v1087_v58  ;;  %v616_v36 = vmax.f32 %v584_v27, 0.0  ;;  %v647_v37 = vpack.c.bf16 %v615_v28, %v615_v28  ;;  %v623_v38 = vmax.f32 %v591_v29, 0.0  ;;  %v568_v39 = vmul.f32 %v5397_v3, %v5208_v30  ;;  %v5073_v28 = vld [vmem:[%s6351_s5 + $0x160] sm:$0xff] }
  0x30   : > { %1166 = vst [vmem:[#allocation2 + $0x138] sm:$0xf] %v1094_v22  ;;  %v794_v41 = vor.u32 %v792_v26, %v791_v32  ;;  %v624_v42 = vmax.f32 %v592_v33, 0.0  ;;  %v599_v43 = vadd.f32 %v5405_v7, %v567_v34  ;;  %v5164_v44 = vunpack.c.h.bf16 %v5531_v21  ;;  %v4985_v29 = vld [vmem:[%s6351_s5 + $0x20] sm:$0xff] }
  0x31   : > { %v4016_v40 = vld [vmem:[#allocation2 + $0x18] sm:$0xf]  ;;  %1167 = vst [vmem:[#allocation2 + $0x144] sm:$0xf] %v1095_v23  ;;  %v648_v46 = vpack.c.bf16 %v616_v36, %v616_v36  ;;  %v732_v47 = vunpack.c.l.b16 %v647_v37  ;;  %v655_v48 = vpack.c.bf16 %v623_v38, %v623_v38  ;;  %v600_v49 = vadd.f32 %v5405_v7, %v568_v39  ;;  %2090 = vmatpush.bf16.msrb.mxu1 %v5067_v55  ;;  %v5227_v38 = vld [vmem:[%s5392_s14 + $0x30] sm:$0xff]  }
  0x32   : > { %2179 = vmatpush.bf16.msrb.mxu2 %v5075_v60  ;;  %2668 = vmatpush.bf16.msrb.mxu3 %v4987_v62  ;;  %v5006_v45 = vld [vmem:[#allocation2 + $0x20] sm:$0xf0]  ;;  %1188 = vst [vmem:[#allocation2 + $0x94] sm:$0xf] %v647_v37  ;;  %v923_v52 = vsel %vm5466_vm2, 0, %v794_v41  ;;  %v656_v53 = vpack.c.bf16 %v624_v42, %v624_v42  ;;  %v631_v54 = vmax.f32 %v599_v43, 0.0  ;;  %v545_v42 = vmul.f32 %v5397_v3, %v5163_v35 }
  0x33   : > { %v4017_v50 = vor.u32 %v5006_v45, %v4016_v40  ;;  %v4064_v51 = vld [vmem:[#allocation2 + $0x78] sm:$0xf]  ;;  %v1036_v58 = vunpack.c.l.b16 %v923_v52  ;;  %v1037_v59 = vunpack.c.h.b16 %v923_v52  ;;  %v733_v60 = vunpack.c.l.b16 %v648_v46  ;;  %1189 = vst [vmem:[#allocation2 + $0xa0] sm:$0xf] %v648_v46  ;;  %v4994_v37 = vld [vmem:[%s6351_s5 + $0x68] sm:$0xff]  ;;  %2757 = vmatpush.bf16.msrb.mxu0 %v4995_v2 }
  0x34   : > { %v5018_v57 = vld [vmem:[#allocation2 + $0x80] sm:$0xf0]  ;;  %v740_v62 = vunpack.c.l.b16 %v655_v48  ;;  %v741_v10 = vunpack.c.l.b16 %v656_v53  ;;  %1196 = vst [vmem:[#allocation2 + $0xf4] sm:$0xf] %v655_v48  ;;  %v632_v15 = vmax.f32 %v600_v49, 0.0  ;;  %v663_v17 = vpack.c.bf16 %v631_v54, %v631_v54 }
  0x35   : > { %2008 = vmatmul.bf16.vlgmr.msra.gmra.mxu0 %v4017_v50  ;;  %v4065_v4 = vor.u32 %v5018_v57, %v4064_v51  ;;  %v4112_v5 = vld [vmem:[#allocation2 + $0xd8] sm:$0xf]  ;;  %v1072_v22 = vpack.c.b16 %v1036_v58, %v1036_v58  ;;  %v1073_v23 = vpack.c.b16 %v1037_v59, %v1037_v59  ;;  %v5565_v27 = vpack.c.b16 %v733_v60, %v732_v47 }
  0x36   : > { %v5030_v20 = vld [vmem:[#allocation2 + $0xe0] sm:$0xf0]  ;;  %1197 = vst [vmem:[#allocation2 + $0x100] sm:$0xf] %v656_v53  ;;  %2180 = vmatpush.bf16.msrb.mxu2 %v5074_v56  ;;  %2669 = vmatpush.bf16.msrb.mxu3 %v4986_v63  ;;  %v5573_v33 = vpack.c.b16 %v741_v10, %v740_v62  ;;  %v664_v34 = vpack.c.bf16 %v632_v15, %v632_v15  ;;  %v748_v36 = vunpack.c.l.b16 %v663_v17  ;;  %v5180_v52 = vunpack.c.h.bf16 %v5227_v38 }
  0x37   : > { %2028 = vmatmul.bf16.vlgmr.msra.gmra.mxu1 %v4065_v4  ;;  %v4113_v30 = vor.u32 %v5030_v20, %v4112_v5  ;;  %v4160_v32 = vld [vmem:[#allocation2 + $0x138] sm:$0xf]  ;;  %1204 = vst [vmem:[#allocation2 + $0x154] sm:$0xf] %v663_v17  ;;  %v817_v40 = vshrl.u32 %v5565_v27, 16  ;;  %v820_v41 = vshll.u32 %v5565_v27, 16  ;;  %v546_v43 = vmul.f32 %v5397_v3, %v5164_v44  ;;  %2758 = vmatpush.bf16.msrb.mxu0 %v4994_v37 }
  0x38   : > { %v5042_v39 = vld [vmem:[#allocation2 + $0x140] sm:$0xf0]  ;;  %1144 = vst [vmem:[#allocation2 + $0x30] sm:$0xf] %v1072_v22  ;;  %v845_v46 = vshrl.u32 %v5573_v33, 16  ;;  %v848_v47 = vshll.u32 %v5573_v33, 16  ;;  %v749_v48 = vunpack.c.l.b16 %v664_v34  ;;  %2091 = vmatpush.bf16.msrb.mxu1 %v5066_v19  ;;  %v577_v21 = vadd.f32 %v5405_v7, %v545_v42 }
  0x39   : > { %2048 = vmatmul.bf16.vlgmr.msra.gmra.mxu2 %v4113_v30  ;;  %v4161_v45 = vor.u32 %v5042_v39, %v4160_v32  ;;  %1145 = vst [vmem:[#allocation2 + $0x3c] sm:$0xf] %v1073_v23  ;;  %v819_v49 = vrot.slane %v817_v40, 7  ;;  %v578_v35 = vadd.f32 %v5405_v7, %v546_v43  ;;  %v5179_v44 = vunpack.c.l.bf16 %v5227_v38  ;;  %v5235_v43 = vld [vmem:[%s5392_s14 + $0x70] sm:$0xff]   ;;  %v5146_v27 = vld [vmem:[%s6351_s5 + $0x228] sm:$0xff] }
  0x3a   : > { %1205 = vst [vmem:[#allocation2 + $0x160] sm:$0xf] %v664_v34  ;;  %2181 = vmatpush.bf16.msrb.mxu2 %v5073_v28  ;;  %2670 = vmatpush.bf16.msrb.mxu3 %v4985_v29  ;;  %v847_v50 = vrot.slane %v845_v46, 7  ;;  %v5593_v51 = vpack.c.b16 %v749_v48, %v748_v36  ;;  %v609_v54 = vmax.f32 %v577_v21, 0.0  ;;  %v554_v60 = vmul.f32 %v5397_v3, %v5180_v52  ;;  %v5231_v29 = vld [vmem:[%s5392_s14 + $0x50] sm:$0xff]  }
  0x3b   : > { %2068 = vmatmul.bf16.vlgmr.msra.gmra.mxu3 %v4161_v45  ;;  %v822_v53 = vor.u32 %v820_v41, %v819_v49  ;;  %v610_v55 = vmax.f32 %v578_v35, 0.0  ;;  %v553_v56 = vmul.f32 %v5397_v3, %v5179_v44  ;;  %v5195_v49 = vunpack.c.l.bf16 %v5231_v29 }
  0x3c   : > { %v850_v57 = vor.u32 %v848_v47, %v847_v50  ;;  %v6356_v58 = vshrl.u32 %v5593_v51, 16  ;;  %v6357_v59 = vshll.u32 %v5593_v51, 16  ;;  %v641_v63 = vpack.c.bf16 %v609_v54, %v609_v54 }
  0x3d   : > { %v927_v62 = vsel %vm5466_vm2, 0, %v822_v53  ;;  %v642_v2 = vpack.c.bf16 %v610_v55, %v610_v55  ;;  %v585_v4 = vadd.f32 %v5405_v7, %v553_v56  ;;  %v586_v42 = vadd.f32 %v5405_v7, %v554_v60 }
  0x3e   : > { %v1044_v10 = vunpack.c.l.b16 %v927_v62  ;;  %v1045_v15 = vunpack.c.h.b16 %v927_v62  ;;  %v931_v17 = vsel %vm5466_vm2, 0, %v850_v57  ;;  %v875_v19 = vrot.slane %v6356_v58, 7  ;;  %1182 = vst [vmem:[#allocation2 + $0x4c] sm:$0xf] %v641_v63  ;;  %v5224_v57 = vld [vmem:[%s5392_s14 + $0x18] sm:$0xff]  }
  0x3f   : > { %v4028_v5 = vld [vmem:[#allocation2 + $0x30] sm:$0xf]  ;;  %v1052_v22 = vunpack.c.l.b16 %v931_v17  ;;  %v1053_v23 = vunpack.c.h.b16 %v931_v17  ;;  %v726_v28 = vunpack.c.l.b16 %v641_v63  ;;  %1183 = vst [vmem:[#allocation2 + $0x58] sm:$0xf] %v642_v2  ;;  %v727_v39 = vunpack.c.l.b16 %v642_v2 }
  0x40   : > { %v5009_v20 = vld [vmem:[#allocation2 + $0x38] sm:$0xf0]  ;;  %v1080_v32 = vpack.c.b16 %v1044_v10, %v1044_v10  ;;  %v1081_v34 = vpack.c.b16 %v1045_v15, %v1045_v15  ;;  %v878_v36 = vor.u32 %v6357_v59, %v875_v19  ;;  %v617_v48 = vmax.f32 %v585_v4, 0.0 }
  0x41   : > { %v4029_v30 = vor.u32 %v5009_v20, %v4028_v5  ;;  %v1088_v37 = vpack.c.b16 %v1052_v22, %v1052_v22  ;;  %v1089_v38 = vpack.c.b16 %v1053_v23, %v1053_v23  ;;  %v5196_v21 = vunpack.c.h.bf16 %v5231_v29 }
  0x42   : > { %1152 = vst [vmem:[#allocation2 + $0x90] sm:$0xf] %v1080_v32  ;;  %v935_v45 = vsel %vm5466_vm2, 0, %v878_v36  ;;  %v5617_v50 = vpack.c.b16 %v727_v39, %v726_v28  ;;  %v618_v52 = vmax.f32 %v586_v42, 0.0  ;;  %v649_v53 = vpack.c.bf16 %v617_v48, %v617_v48 }
  0x43   : > { %1153 = vst [vmem:[#allocation2 + $0x9c] sm:$0xf] %v1081_v34  ;;  %v1060_v35 = vunpack.c.l.b16 %v935_v45  ;;  %v1061_v44 = vunpack.c.h.b16 %v935_v45  ;;  %v561_v54 = vmul.f32 %v5397_v3, %v5195_v49  ;;  %v562_v55 = vmul.f32 %v5397_v3, %v5196_v21 }
  0x44   : > { %1160 = vst [vmem:[#allocation2 + $0xf0] sm:$0xf] %v1088_v37  ;;  %v5211_v56 = vunpack.c.l.bf16 %v5235_v43  ;;  %v796_v63 = vshrl.u32 %v5617_v50, 16  ;;  %v799_v2 = vshll.u32 %v5617_v50, 16  ;;  %v650_v4 = vpack.c.bf16 %v618_v52, %v618_v52 }
  0x45   : > { %2013 = vmatmul.bf16.gmra.mxu0 %v4029_v30  ;;  %1161 = vst [vmem:[#allocation2 + $0xfc] sm:$0xf] %v1089_v38  ;;  %v1096_v60 = vpack.c.b16 %v1060_v35, %v1060_v35  ;;  %v1097_v62 = vpack.c.b16 %v1061_v44, %v1061_v44  ;;  %v734_v5 = vunpack.c.l.b16 %v649_v53  ;;  %v593_v10 = vadd.f32 %v5405_v7, %v561_v54 }
  0x46   : > { %1190 = vst [vmem:[#allocation2 + $0xac] sm:$0xf] %v649_v53  ;;  %v594_v15 = vadd.f32 %v5405_v7, %v562_v55  ;;  %v798_v17 = vrot.slane %v796_v63, 7  ;;  %v5212_v19 = vunpack.c.h.bf16 %v5235_v43  ;;  %v569_v20 = vmul.f32 %v5397_v3, %v5211_v56  ;;  %v5228_v53 = vld [vmem:[%s5392_s14 + $0x38] sm:$0xff]  }
  0x47   : > { %1168 = vst [vmem:[#allocation2 + $0x150] sm:$0xf] %v1096_v60  ;;  %v5167_v22 = vunpack.c.l.bf16 %v5224_v57  ;;  %v735_v23 = vunpack.c.l.b16 %v650_v4  ;;  %v625_v28 = vmax.f32 %v593_v10, 0.0  ;;  %v5168_v30 = vunpack.c.h.bf16 %v5224_v57 }
  0x48   : > { %1169 = vst [vmem:[#allocation2 + $0x15c] sm:$0xf] %v1097_v62  ;;  %v626_v29 = vmax.f32 %v594_v15, 0.0  ;;  %v801_v34 = vor.u32 %v799_v2, %v798_v17  ;;  %v570_v36 = vmul.f32 %v5397_v3, %v5212_v19  ;;  %v601_v37 = vadd.f32 %v5405_v7, %v569_v20  ;;  %v5065_v15 = vld [vmem:[%s6351_s5 + $0x120] sm:$0xff]  ;;  %v5072_v17 = vld [vmem:[%s6351_s5 + $0x158] sm:$0xff] }
  0x49   : > { %v4076_v32 = vld [vmem:[#allocation2 + $0x90] sm:$0xf]  ;;  %1191 = vst [vmem:[#allocation2 + $0xb8] sm:$0xf] %v650_v4  ;;  %v547_v38 = vmul.f32 %v5397_v3, %v5167_v22  ;;  %v5634_v42 = vpack.c.b16 %v735_v23, %v734_v5  ;;  %v657_v43 = vpack.c.bf16 %v625_v28, %v625_v28  ;;  %v548_v48 = vmul.f32 %v5397_v3, %v5168_v30  ;;  %v4984_v19 = vld [vmem:[%s6351_s5 + $0x18] sm:$0xff]  ;;  %v4993_v30 = vld [vmem:[%s6351_s5 + $0x60] sm:$0xff] }
  0x4a   : > { %v5021_v39 = vld [vmem:[#allocation2 + $0x98] sm:$0xf0]  ;;  %v658_v45 = vpack.c.bf16 %v626_v29, %v626_v29  ;;  %v924_v35 = vsel %vm5466_vm2, 0, %v801_v34  ;;  %v602_v44 = vadd.f32 %v5405_v7, %v570_v36  ;;  %v633_v52 = vmax.f32 %v601_v37, 0.0  ;;  %2092 = vmatpush.bf16.msrb.mxu1 %v5065_v15  ;;  %2182 = vmatpush.bf16.msrb.mxu2 %v5072_v17 }
  0x4b   : > { %v4077_v49 = vor.u32 %v5021_v39, %v4076_v32  ;;  %v4124_v21 = vld [vmem:[#allocation2 + $0xf0] sm:$0xf]  ;;  %v1038_v55 = vunpack.c.l.b16 %v924_v35  ;;  %v1039_v56 = vunpack.c.h.b16 %v924_v35  ;;  %v824_v57 = vshrl.u32 %v5634_v42, 16  ;;  %1198 = vst [vmem:[#allocation2 + $0x10c] sm:$0xf] %v657_v43  ;;  %v5064_v37 = vld [vmem:[%s6351_s5 + $0x118] sm:$0xff]  ;;  %2671 = vmatpush.bf16.msrb.mxu3 %v4984_v19  ;;  %2759 = vmatpush.bf16.msrb.mxu0 %v4993_v30 }
  0x4c   : > { %v5033_v54 = vld [vmem:[#allocation2 + $0xf8] sm:$0xf0]  ;;  %v827_v60 = vshll.u32 %v5634_v42, 16  ;;  %v742_v4 = vunpack.c.l.b16 %v657_v43  ;;  %v743_v5 = vunpack.c.l.b16 %v658_v45  ;;  %1199 = vst [vmem:[#allocation2 + $0x118] sm:$0xf] %v658_v45  ;;  %v634_v10 = vmax.f32 %v602_v44, 0.0 }
  0x4d   : > { %2033 = vmatmul.bf16.gmra.mxu1 %v4077_v49  ;;  %v4125_v62 = vor.u32 %v5033_v54, %v4124_v21  ;;  %v1074_v22 = vpack.c.b16 %v1038_v55, %v1038_v55  ;;  %v1075_v23 = vpack.c.b16 %v1039_v56, %v1039_v56  ;;  %v826_v28 = vrot.slane %v824_v57, 7  ;;  %v5071_v35 = vld [vmem:[%s6351_s5 + $0x150] sm:$0xff]  ;;  %v4992_v56 = vld [vmem:[%s6351_s5 + $0x58] sm:$0xff] }
  0x4e   : > { %v4172_v20 = vld [vmem:[#allocation2 + $0x150] sm:$0xf]  ;;  %v665_v29 = vpack.c.bf16 %v633_v52, %v633_v52  ;;  %v5657_v34 = vpack.c.b16 %v743_v5, %v742_v4  ;;  %v666_v36 = vpack.c.bf16 %v634_v10, %v634_v10  ;;  %v579_v39 = vadd.f32 %v5405_v7, %v547_v38  ;;  %2093 = vmatpush.bf16.msrb.mxu1 %v5064_v37 }
  0x4f   : > { %2053 = vmatmul.bf16.gmra.mxu2 %v4125_v62  ;;  %v5045_v32 = vld [vmem:[#allocation2 + $0x158] sm:$0xf0]  ;;  %v5183_v43 = vunpack.c.l.bf16 %v5228_v53  ;;  %1146 = vst [vmem:[#allocation2 + $0x48] sm:$0xf] %v1074_v22  ;;  %v829_v49 = vor.u32 %v827_v60, %v826_v28  ;;  %v4983_v44 = vld [vmem:[%s6351_s5 + $0x10] sm:$0xff]  ;;  %v5184_v52 = vunpack.c.h.bf16 %v5228_v53  ;;  %v580_v62 = vadd.f32 %v5405_v7, %v548_v48  ;;  %2760 = vmatpush.bf16.msrb.mxu0 %v4992_v56 }
  0x50   : > { %v4173_v45 = vor.u32 %v5045_v32, %v4172_v20  ;;  %v750_v21 = vunpack.c.l.b16 %v665_v29  ;;  %1147 = vst [vmem:[#allocation2 + $0x54] sm:$0xf] %v1075_v23  ;;  %v852_v38 = vshrl.u32 %v5657_v34, 16  ;;  %v855_v54 = vshll.u32 %v5657_v34, 16  ;;  %2183 = vmatpush.bf16.msrb.mxu2 %v5071_v35  ;;  %2672 = vmatpush.bf16.msrb.mxu3 %v4983_v44  ;;  %v5232_v28 = vld [vmem:[%s5392_s14 + $0x58] sm:$0xff]  }
  0x51   : > { %v751_v55 = vunpack.c.l.b16 %v666_v36  ;;  %v928_v4 = vsel %vm5466_vm2, 0, %v829_v49  ;;  %1206 = vst [vmem:[#allocation2 + $0x16c] sm:$0xf] %v665_v29  ;;  %v611_v53 = vmax.f32 %v579_v39, 0.0  ;;  %v555_v5 = vmul.f32 %v5397_v3, %v5183_v43 }
  0x52   : > { %2073 = vmatmul.bf16.gmra.mxu3 %v4173_v45  ;;  %v556_v10 = vmul.f32 %v5397_v3, %v5184_v52  ;;  %v1046_v15 = vunpack.c.l.b16 %v928_v4  ;;  %v1047_v17 = vunpack.c.h.b16 %v928_v4  ;;  %v854_v19 = vrot.slane %v852_v38, 7  ;;  %1207 = vst [vmem:[#allocation2 + $0x178] sm:$0xf] %v666_v36 }
  0x53   : > { %v5683_v20 = vpack.c.b16 %v751_v55, %v750_v21  ;;  %v612_v48 = vmax.f32 %v580_v62, 0.0  ;;  %v643_v22 = vpack.c.bf16 %v611_v53, %v611_v53  ;;  %v587_v23 = vadd.f32 %v5405_v7, %v555_v5 }
  0x54   : > { %v1082_v29 = vpack.c.b16 %v1046_v15, %v1046_v15  ;;  %v1083_v30 = vpack.c.b16 %v1047_v17, %v1047_v17  ;;  %v857_v32 = vor.u32 %v855_v54, %v854_v19  ;;  %v588_v39 = vadd.f32 %v5405_v7, %v556_v10  ;;  %v5236_v17 = vld [vmem:[%s5392_s14 + $0x78] sm:$0xff]  }
  0x55   : > { %v6354_v36 = vshrl.u32 %v5683_v20, 16  ;;  %v6355_v37 = vshll.u32 %v5683_v20, 16  ;;  %v644_v43 = vpack.c.bf16 %v612_v48, %v612_v48  ;;  %v728_v45 = vunpack.c.l.b16 %v643_v22  ;;  %1184 = vst [vmem:[#allocation2 + $0x64] sm:$0xf] %v643_v22 }
  0x56   : > { %v4040_v49 = vld [vmem:[#allocation2 + $0x48] sm:$0xf]  ;;  %1154 = vst [vmem:[#allocation2 + $0xa8] sm:$0xf] %v1082_v29  ;;  %v932_v21 = vsel %vm5466_vm2, 0, %v857_v32  ;;  %v619_v35 = vmax.f32 %v587_v23, 0.0  ;;  %v5199_v44 = vunpack.c.l.bf16 %v5232_v28  ;;  %v5200_v52 = vunpack.c.h.bf16 %v5232_v28 }
  0x57   : > { %v5012_v55 = vld [vmem:[#allocation2 + $0x50] sm:$0xf0]  ;;  %1155 = vst [vmem:[#allocation2 + $0xb4] sm:$0xf] %v1083_v30  ;;  %v1054_v56 = vunpack.c.l.b16 %v932_v21  ;;  %v1055_v62 = vunpack.c.h.b16 %v932_v21  ;;  %v882_v4 = vrot.slane %v6354_v36, 7  ;;  %v729_v5 = vunpack.c.l.b16 %v644_v43  ;;  %v5150_v36 = vld [vmem:[%s414_s23] sm:$0xff]  }
  0x58   : > { %v4041_v53 = vor.u32 %v5012_v55, %v4040_v49  ;;  %1185 = vst [vmem:[#allocation2 + $0x70] sm:$0xf] %v644_v43  ;;  %v620_v10 = vmax.f32 %v588_v39, 0.0  ;;  %v651_v15 = vpack.c.bf16 %v619_v35, %v619_v35  ;;  %v563_v23 = vmul.f32 %v5397_v3, %v5199_v44 }
  0x59   : > { %v1090_v19 = vpack.c.b16 %v1054_v56, %v1054_v56  ;;  %v1091_v48 = vpack.c.b16 %v1055_v62, %v1055_v62  ;;  %v885_v22 = vor.u32 %v6355_v37, %v882_v4  ;;  %v5700_v28 = vpack.c.b16 %v729_v5, %v728_v45 }
  0x5a   : > { %2018 = vmatmul.bf16.gmra.mxu0 %v4041_v53  ;;  %v652_v29 = vpack.c.bf16 %v620_v10, %v620_v10  ;;  %v736_v30 = vunpack.c.l.b16 %v651_v15  ;;  %1192 = vst [vmem:[#allocation2 + $0xc4] sm:$0xf] %v651_v15  ;;  %v564_v32 = vmul.f32 %v5397_v3, %v5200_v52  ;;  %v595_v43 = vadd.f32 %v5405_v7, %v563_v23 }
  0x5b   : > { %1162 = vst [vmem:[#allocation2 + $0x108] sm:$0xf] %v1090_v19  ;;  %v936_v39 = vsel %vm5466_vm2, 0, %v885_v22  ;;  %v5215_v49 = vunpack.c.l.bf16 %v5236_v17  ;;  %v5216_v21 = vunpack.c.h.bf16 %v5236_v17  ;;  %v803_v55 = vshrl.u32 %v5700_v28, 16 }
  0x5c   : > { %1163 = vst [vmem:[#allocation2 + $0x114] sm:$0xf] %v1091_v48  ;;  %v1062_v35 = vunpack.c.l.b16 %v936_v39  ;;  %v1063_v44 = vunpack.c.h.b16 %v936_v39  ;;  %v806_v45 = vshll.u32 %v5700_v28, 16  ;;  %v737_v56 = vunpack.c.l.b16 %v652_v29  ;;  %v5147_v28 = vld [vmem:[%s6351_s5 + $0x230] sm:$0xff] }
  0x5d   : > { %v4088_v52 = vld [vmem:[#allocation2 + $0xa8] sm:$0xf]  ;;  %1193 = vst [vmem:[#allocation2 + $0xd0] sm:$0xf] %v652_v29  ;;  %v596_v62 = vadd.f32 %v5405_v7, %v564_v32  ;;  %v627_v4 = vmax.f32 %v595_v43, 0.0  ;;  %v571_v53 = vmul.f32 %v5397_v3, %v5215_v49  ;;  %v805_v17 = vrot.slane %v803_v55, 7 }
  0x5e   : > { %v5024_v5 = vld [vmem:[#allocation2 + $0xb0] sm:$0xf0]  ;;  %v1098_v10 = vpack.c.b16 %v1062_v35, %v1062_v35  ;;  %v1099_v15 = vpack.c.b16 %v1063_v44, %v1063_v44  ;;  %v572_v19 = vmul.f32 %v5397_v3, %v5216_v21  ;;  %v5717_v22 = vpack.c.b16 %v737_v56, %v736_v30 }
  0x5f   : > { %v4089_v48 = vor.u32 %v5024_v5, %v4088_v52  ;;  %v628_v23 = vmax.f32 %v596_v62, 0.0  ;;  %v659_v39 = vpack.c.bf16 %v627_v4, %v627_v4  ;;  %v941_v29 = vrot.slane %v785_v8, 1 }
  0x60   : > { %1170 = vst [vmem:[#allocation2 + $0x168] sm:$0xf] %v1098_v10  ;;  %v808_v32 = vor.u32 %v806_v45, %v805_v17  ;;  %v603_v43 = vadd.f32 %v5405_v7, %v571_v53  ;;  %v604_v49 = vadd.f32 %v5405_v7, %v572_v19  ;;  %v831_v3 = vshrl.u32 %v5717_v22, 16 }
  0x61   : > { %2038 = vmatmul.bf16.gmra.mxu1 %v4089_v48  ;;  %1171 = vst [vmem:[#allocation2 + $0x174] sm:$0xf] %v1099_v15  ;;  %v834_v30 = vshll.u32 %v5717_v22, 16  ;;  %v660_v21 = vpack.c.bf16 %v628_v23, %v628_v23  ;;  %v744_v35 = vunpack.c.l.b16 %v659_v39  ;;  %v5151_v56 = vunpack.c.l.bf16 %v5150_v36  ;;  %v5063_v15 = vld [vmem:[%s6351_s5 + $0x110] sm:$0xff]  ;;  %v5070_v23 = vld [vmem:[%s6351_s5 + $0x148] sm:$0xff]  ;;  %v5145_v22 = vld [vmem:[%s6351_s5 + $0x220] sm:$0xff] }
  0x62   : > { %v4136_v44 = vld [vmem:[#allocation2 + $0x108] sm:$0xf]  ;;  %v925_v8 = vsel %vm5466_vm2, 0, %v808_v32  ;;  %1200 = vst [vmem:[#allocation2 + $0x124] sm:$0xf] %v659_v39  ;;  %v635_v52 = vmax.f32 %v603_v43, 0.0  ;;  %v5152_v62 = vunpack.c.h.bf16 %v5150_v36  ;;  %2094 = vmatpush.bf16.msrb.mxu1 %v5063_v15  ;;  %2184 = vmatpush.bf16.msrb.mxu2 %v5070_v23 }
  0x63   : > { %v5036_v4 = vld [vmem:[#allocation2 + $0x110] sm:$0xf0]  ;;  %v1040_v53 = vunpack.c.l.b16 %v925_v8  ;;  %v1041_v5 = vunpack.c.h.b16 %v925_v8  ;;  %v833_v7 = vrot.slane %v831_v3, 7  ;;  %v745_v10 = vunpack.c.l.b16 %v660_v21  ;;  %1201 = vst [vmem:[#allocation2 + $0x130] sm:$0xf] %v660_v21  ;;  %v4982_v36 = vld [vmem:[%s6351_s5 + $0x8] sm:$0xff] }
  0x64   : > { %v4137_v17 = vor.u32 %v5036_v4, %v4136_v44  ;;  %v636_v19 = vmax.f32 %v604_v49, 0.0  ;;  %v667_v48 = vpack.c.bf16 %v635_v52, %v635_v52  ;;  %v4991_v39 = vld [vmem:[%s6351_s5 + $0x50] sm:$0xff]  ;;  %v5062_v49 = vld [vmem:[%s6351_s5 + $0x108] sm:$0xff]  ;;  %2673 = vmatpush.bf16.msrb.mxu3 %v4982_v36  ;;  %v5069_v4 = vld [vmem:[%s6351_s5 + $0x140] sm:$0xff] }
  0x65   : > { %v1076_v32 = vpack.c.b16 %v1040_v53, %v1040_v53  ;;  %v1077_v43 = vpack.c.b16 %v1041_v5, %v1041_v5  ;;  %v836_v21 = vor.u32 %v834_v30, %v833_v7  ;;  %v5745_v44 = vpack.c.b16 %v745_v10, %v744_v35  ;;  %v4981_v53 = vld [vmem:[%s6351_s5] sm:$0xff]  ;;  %2761 = vmatpush.bf16.msrb.mxu0 %v4991_v39 }
  0x66   : > { %2058 = vmatmul.bf16.gmra.mxu2 %v4137_v17  ;;  %v668_v8 = vpack.c.bf16 %v636_v19, %v636_v19  ;;  %v752_v52 = vunpack.c.l.b16 %v667_v48  ;;  %1208 = vst [vmem:[#allocation2 + $0x184] sm:$0xf] %v667_v48  ;;  %v5288_v35 = vld [vmem:[%s6349_s3] ss:$0 sm:$0xff]  ;;  %v942_v17 = vor.u32 %v941_v29, %v782_v6  ;;  %2095 = vmatpush.bf16.msrb.mxu1 %v5062_v49 }
  0x67   : > { %v463_v5 = vmul.f32 %v5288_v35, %v5151_v56  ;;  %v4184_v7 = vld [vmem:[#allocation2 + $0x168] sm:$0xf]  ;;  %1148 = vst [vmem:[#allocation2 + $0x60] sm:$0xf] %v1076_v32  ;;  %v929_v10 = vsel %vm5466_vm2, 0, %v836_v21  ;;  %v859_v15 = vshrl.u32 %v5745_v44, 16  ;;  %v464_v19 = vmul.f32 %v5288_v35, %v5152_v62  ;;  %2185 = vmatpush.bf16.msrb.mxu2 %v5069_v4 }
  0x68   : > { %v5048_v48 = vld [vmem:[#allocation2 + $0x170] sm:$0xf0]  ;;  %1149 = vst [vmem:[#allocation2 + $0x6c] sm:$0xf] %v1077_v43  ;;  %v1048_v36 = vunpack.c.l.b16 %v929_v10  ;;  %v1049_v37 = vunpack.c.h.b16 %v929_v10  ;;  %v862_v58 = vshll.u32 %v5745_v44, 16  ;;  %v753_v56 = vunpack.c.l.b16 %v668_v8  ;;  %v4990_v32 = vld [vmem:[%s6351_s5 + $0x48] sm:$0xff]  ;;  %2674 = vmatpush.bf16.msrb.mxu3 %v4981_v53 }
  0x69   : > { %v4185_v21 = vor.u32 %v5048_v48, %v4184_v7  ;;  %v861_v23 = vrot.slane %v859_v15, 7  ;;  %1209 = vst [vmem:[#allocation2 + $0x190] sm:$0xf] %v668_v8  ;;  %v5289_v6 = vld [vmem:[%s6350_s4] ss:$0 sm:$0xff]  ;;  %2762 = vmatpush.bf16.msrb.mxu0 %v4990_v32 }
  0x6a   : > { %v468_v29 = vadd.f32 %v5289_v6, %v463_v5  ;;  %v469_v62 = vadd.f32 %v5289_v6, %v464_v19  ;;  %v1084_v39 = vpack.c.b16 %v1048_v36, %v1048_v36  ;;  %v1085_v43 = vpack.c.b16 %v1049_v37, %v1049_v37  ;;  %v4989_v37 = vld [vmem:[%s6351_s5 + $0x40] sm:$0xff]  ;;  %2096 = vmatpush.bf16.msrb.mxu1 %v5061_v61 }
  0x6b   : > { %v5776_v35 = vpack.c.b16 %v753_v56, %v752_v52  ;;  %2078 = vmatmul.bf16.gmra.mxu3 %v4185_v21  ;;  %v864_v8 = vor.u32 %v862_v58, %v861_v23  ;;  %v997_v5 = vsel %vm5786_vm5, %v942_v17, 0 }
  0x6c   : > { %v470_v49 = vmax.f32 %v468_v29, 0.0  ;;  %1156 = vst [vmem:[#allocation2 + $0xc0] sm:$0xf] %v1084_v39  ;;  %v471_v53 = vmax.f32 %v469_v62, 0.0  ;;  %v1232_v23 = vunpack.c.l.b16 %v997_v5  ;;  %v1233_v6 = vunpack.c.h.b16 %v997_v5  ;;  %v5140_v5 = vld [vmem:[%s6351_s5 + $0x1f8] sm:$0xff] }
  0x6d   : > { %v6359_v7 = vshrl.u32 %v5776_v35, 16  ;;  %v6360_v10 = vshll.u32 %v5776_v35, 16  ;;  %1157 = vst [vmem:[#allocation2 + $0xcc] sm:$0xf] %v1085_v43  ;;  %v933_v4 = vsel %vm5466_vm2, 0, %v864_v8  ;;  %2763 = vmatpush.bf16.msrb.mxu0 %v4989_v37  ;;  %v5004_v37 = vld [vmem:[%s6351_s5 + $0xb8] sm:$0xff]  ;;  %3537 = vmatpush.bf16.msra.mxu3 %v5140_v5 }
  0x6e   : > { %v473_v19 = vmul.f32 0.0, %v470_v49  ;;  %v4052_v48 = vld [vmem:[#allocation2 + $0x60] sm:$0xf]  ;;  %v1056_v36 = vunpack.c.l.b16 %v933_v4  ;;  %v1057_v56 = vunpack.c.h.b16 %v933_v4  ;;  %v474_v29 = vmul.f32 0.0, %v471_v53  ;;  %v5132_v53 = vld [vmem:[%s6351_s5 + $0x1b8] sm:$0xff]  ;;  %2845 = vmatpush.bf16.msra.mxu1 %v5004_v37 }
  0x6f   : > { %v889_v32 = vrot.slane %v6359_v7, 7  ;;  %v5015_v21 = vld [vmem:[#allocation2 + $0x68] sm:$0xf0]  ;;  %v1268_v17 = vpack.c.b16 %v1232_v23, %v1232_v23  ;;  %v1269_v8 = vpack.c.b16 %v1233_v6, %v1233_v6  ;;  %3448 = vmatpush.bf16.msra.mxu2 %v5132_v53  ;;  %v4352_v42 = vld [vmem:[#allocation2 + $0x60] sm:$0xf] }
  0x70   : > { %v475_v62 = vpack.c.bf16 %v473_v19, %v473_v19  ;;  %v4053_v39 = vor.u32 %v5015_v21, %v4052_v48  ;;  %v1092_v43 = vpack.c.b16 %v1056_v36, %v1056_v36  ;;  %v1093_v59 = vpack.c.b16 %v1057_v56, %v1057_v56  ;;  %v4963_v7 = vld [vmem:[#allocation2 + $0xf4] sm:$0xf] }
  0x71   : > { %v892_v61 = vor.u32 %v6360_v10, %v889_v32  ;;  %v476_v49 = vpack.c.bf16 %v474_v29, %v474_v29  ;;  %v5148_v32 = vld [vmem:[%s6351_s5 + $0x238] sm:$0xff]  ;;  %v943_v21 = vrot.slane %v792_v26, 1  ;;  %1340 = vst [vmem:[#allocation2 + $0x20] sm:$0xf] %v1268_v17 }
  0x72   : > { %v720_v25 = vunpack.c.l.b16 %v475_v62  ;;  %1176 = vst [vmem:[#allocation2 + $0x4] sm:$0xf] %v475_v62  ;;  %2023 = vmatmul.bf16.gmra.mxu0 %v4053_v39 }
  0x73   : > { %1164 = vst [vmem:[#allocation2 + $0x120] sm:$0xf] %v1092_v43  ;;  %v937_v4 = vsel %vm5466_vm2, 0, %v892_v61  ;;  %v4100_v19 = vld [vmem:[#allocation2 + $0xc0] sm:$0xf]  ;;  %v721_v56 = vunpack.c.l.b16 %v476_v49  ;;  %3626 = vmatpush.bf16.msra.mxu0 %v5148_v32 }
  0x74   : > { %1165 = vst [vmem:[#allocation2 + $0x12c] sm:$0xf] %v1093_v59  ;;  %v1064_v48 = vunpack.c.l.b16 %v937_v4  ;;  %v1065_v36 = vunpack.c.h.b16 %v937_v4  ;;  %v5027_v23 = vld [vmem:[#allocation2 + $0xc8] sm:$0xf0]  ;;  %v944_v59 = vor.u32 %v943_v21, %v789_v24 }
  0x75   : > { %v4101_v6 = vor.u32 %v5027_v23, %v4100_v19  ;;  %1341 = vst [vmem:[#allocation2 + $0x2c] sm:$0xf] %v1269_v8  ;;  %v756_v39 = vpack.c.b16 %v721_v56, %v720_v25 }
  0x76   : > { %v1100_v29 = vpack.c.b16 %v1064_v48, %v1064_v48  ;;  %v1101_v62 = vpack.c.b16 %v1065_v36, %v1065_v36  ;;  %1177 = vst [vmem:[#allocation2 + $0x10] sm:$0xf] %v476_v49  ;;  %v998_v26 = vsel %vm5786_vm5, %v944_v59, 0  ;;  %v4018_v59 = vld [vmem:[#allocation2 + $0x24] sm:$0xf0] }
  0x77   : > { %2043 = vmatmul.bf16.gmra.mxu1 %v4101_v6  ;;  %v775_v43 = vshrl.u32 %v756_v39, 16  ;;  %v778_v61 = vshll.u32 %v756_v39, 16  ;;  %v1234_v5 = vunpack.c.l.b16 %v998_v26  ;;  %v1235_v8 = vunpack.c.h.b16 %v998_v26  ;;  %v5005_v39 = vld [vmem:[#allocation2 + $0x1c] sm:$0xf]  ;;  %3627 = vmatpush.bf16.msra.mxu0 %v5147_v28  ;;  %v4342_v28 = vld [vmem:[#allocation2 + $0x54] sm:$0xf0] }
  0x78   : > { %1172 = vst [vmem:[#allocation2 + $0x180] sm:$0xf] %v1100_v29  ;;  %v945_v26 = vrot.slane %v799_v2, 1  ;;  %v4936_v2 = vld [vmem:[#allocation2 + $0x1c] sm:$0xf] }
  0x79   : > { %1173 = vst [vmem:[#allocation2 + $0x18c] sm:$0xf] %v1101_v62  ;;  %v777_v4 = vrot.slane %v775_v43, 7  ;;  %v939_v53 = vrot.slane %v778_v61, 1  ;;  %v4933_v9 = vld [vmem:[#allocation2 + $0x4] sm:$0xf]  ;;  %v1270_v24 = vpack.c.b16 %v1234_v5, %v1234_v5  ;;  %v1271_v48 = vpack.c.b16 %v1235_v8, %v1235_v8 }
  0x7a   : > { %v4148_v17 = vld [vmem:[#allocation2 + $0x120] sm:$0xf] }
  0x7b   : > { %v5039_v25 = vld [vmem:[#allocation2 + $0x128] sm:$0xf0]  ;;  %v780_v37 = vor.u32 %v778_v61, %v777_v4  ;;  %v5818_v19 = vor.u32 %v939_v53, %v775_v43  ;;  %1342 = vst [vmem:[#allocation2 + $0x38] sm:$0xf] %v1270_v24  ;;  %v946_v4 = vor.u32 %v945_v26, %v796_v63  ;;  %v4024_v5 = vld [vmem:[#allocation2 + $0x20] sm:$0xf]  ;;  %3628 = vmatpush.bf16.msra.mxu0 %v5146_v27 }
  0x7c   : > { %v4149_v49 = vor.u32 %v5039_v25, %v4148_v17  ;;  %1343 = vst [vmem:[#allocation2 + $0x44] sm:$0xf] %v1271_v48  ;;  %v4021_v17 = vor.u32 %v5005_v39, %v4018_v59  ;;  %v5007_v8 = vld [vmem:[#allocation2 + $0x28] sm:$0xf0]  ;;  %v4318_v48 = vld [vmem:[#allocation2 + $0x24] sm:$0xf0] }
  0x7d   : > { %v921_v36 = vsel %vm5466_vm2, 0, %v780_v37  ;;  %v4306_v56 = vld [vmem:[#allocation2 + $0xc] sm:$0xf0]  ;;  %v999_v53 = vsel %vm5786_vm5, %v946_v4, 0  ;;  %v4025_v24 = vor.u32 %v5007_v8, %v4024_v5  ;;  %v4321_v63 = vor.u32 %v4936_v2, %v4318_v48  ;;  %v4316_v5 = vld [vmem:[#allocation2 + $0x18] sm:$0xf] }
  0x7e   : > { %2063 = vmatmul.bf16.gmra.mxu2 %v4149_v49  ;;  %v1032_v21 = vunpack.c.l.b16 %v921_v36  ;;  %v1033_v23 = vunpack.c.h.b16 %v921_v36  ;;  %v4309_v6 = vor.u32 %v4933_v9, %v4306_v56  ;;  %v1236_v25 = vunpack.c.l.b16 %v999_v53  ;;  %v4937_v8 = vld [vmem:[#allocation2 + $0x20] sm:$0xf0]  ;;  %v4042_v2 = vld [vmem:[#allocation2 + $0x54] sm:$0xf0] }
  0x7f   : > { %v4196_v32 = vld [vmem:[#allocation2 + $0x180] sm:$0xf]  ;;  %v1237_v49 = vunpack.c.h.b16 %v999_v53  ;;  %v949_v48 = vrot.slane %v813_v12, 1  ;;  %v4940_v12 = vld [vmem:[#allocation2 + $0x38] sm:$0xf0]  ;;  %3629 = vmatpush.bf16.msra.mxu0 %v5145_v22 }
  0x80   : > { %v5051_v29 = vld [vmem:[#allocation2 + $0x188] sm:$0xf0]  ;;  %v1068_v43 = vpack.c.b16 %v1032_v21, %v1032_v21  ;;  %v1069_v61 = vpack.c.b16 %v1033_v23, %v1033_v23  ;;  %v1272_v37 = vpack.c.b16 %v1236_v25, %v1236_v25  ;;  %v5008_v21 = vld [vmem:[#allocation2 + $0x34] sm:$0xf]  ;;  %v4030_v23 = vld [vmem:[#allocation2 + $0x3c] sm:$0xf0] }
  0x81   : > { %v4197_v62 = vor.u32 %v5051_v29, %v4196_v32  ;;  %v1273_v9 = vpack.c.b16 %v1237_v49, %v1237_v49  ;;  %v947_v32 = vrot.slane %v806_v45, 1  ;;  %v5131_v29 = vld [vmem:[%s6351_s5 + $0x1b0] sm:$0xff]  ;;  %v4033_v39 = vor.u32 %v5008_v21, %v4030_v23  ;;  %v4330_v49 = vld [vmem:[#allocation2 + $0x3c] sm:$0xf0] }
  0x82   : > { %1140 = vst [vmem:[#allocation2] sm:$0xf] %v1068_v43  ;;  %2764 = vmatmul.bf16.vlgmr.msrb.gmra.mxu0 %v4309_v6  ;;  %v5003_v45 = vld [vmem:[%s6351_s5 + $0xb0] sm:$0xff]  ;;  %3449 = vmatpush.bf16.msra.mxu2 %v5131_v29 }
  0x83   : > { %2083 = vmatmul.bf16.gmra.mxu3 %v4197_v62  ;;  %1141 = vst [vmem:[#allocation2 + $0xc] sm:$0xf] %v1069_v61  ;;  %v948_v6 = vor.u32 %v947_v32, %v803_v55  ;;  %v5139_v62 = vld [vmem:[%s6351_s5 + $0x1f0] sm:$0xff]  ;;  %2846 = vmatpush.bf16.msra.mxu1 %v5003_v45  ;;  %v4036_v61 = vld [vmem:[#allocation2 + $0x38] sm:$0xf] }
  0x84   : > { %1344 = vst [vmem:[#allocation2 + $0x50] sm:$0xf] %v1272_v37  ;;  %3538 = vmatpush.bf16.msra.mxu3 %v5139_v62  ;;  %v5010_v26 = vld [vmem:[#allocation2 + $0x40] sm:$0xf0]  ;;  %v4939_v25 = vld [vmem:[#allocation2 + $0x34] sm:$0xf]  ;;  %v4317_v37 = vor.u32 %v4937_v8, %v4316_v5 }
  0x85   : > { %1345 = vst [vmem:[#allocation2 + $0x5c] sm:$0xf] %v1273_v9  ;;  %v1000_v55 = vsel %vm5786_vm5, %v948_v6, 0  ;;  %v4037_v53 = vor.u32 %v5010_v26, %v4036_v61  ;;  %v4333_v9 = vor.u32 %v4939_v25, %v4330_v49  ;;  %v4942_v45 = vld [vmem:[#allocation2 + $0x4c] sm:$0xf] }
  0x86   : > { %v1238_v59 = vunpack.c.l.b16 %v1000_v55  ;;  %v1239_v43 = vunpack.c.h.b16 %v1000_v55  ;;  %v951_v55 = vrot.slane %v820_v41, 1  ;;  %v5130_v26 = vld [vmem:[%s6351_s5 + $0x1a8] sm:$0xff] }
  0x87   : > { %2097 = vmatmul.bf16.vlgmr.msrb.gmra.mxu1 %v4021_v17  ;;  %3450 = vmatpush.bf16.msra.mxu2 %v5130_v26 }
  0x88   : > { %v1274_v17 = vpack.c.b16 %v1238_v59, %v1238_v59  ;;  %v1275_v4 = vpack.c.b16 %v1239_v43, %v1239_v43  ;;  %v5014_v59 = vld [vmem:[#allocation2 + $0x64] sm:$0xf]  ;;  %v4054_v43 = vld [vmem:[#allocation2 + $0x6c] sm:$0xf0]  ;;  %v952_v61 = vor.u32 %v951_v55, %v817_v40 }
  0x89   : > { %v4304_v36 = vld [vmem:[#allocation2] sm:$0xf]  ;;  %v4057_v41 = vor.u32 %v5014_v59, %v4054_v43 }
  0x8a   : > { %v4934_v56 = vld [vmem:[#allocation2 + $0x8] sm:$0xf0]  ;;  %1346 = vst [vmem:[#allocation2 + $0x68] sm:$0xf] %v1274_v17  ;;  %v1002_v40 = vsel %vm5786_vm5, %v952_v61, 0 }
  0x8b   : > { %v4305_v50 = vor.u32 %v4934_v56, %v4304_v36  ;;  %1347 = vst [vmem:[#allocation2 + $0x74] sm:$0xf] %v1275_v4  ;;  %v950_v36 = vor.u32 %v949_v48, %v810_v11  ;;  %v4048_v21 = vld [vmem:[#allocation2 + $0x50] sm:$0xf]  ;;  %v4345_v11 = vor.u32 %v4942_v45, %v4342_v28  ;;  %v5138_v17 = vld [vmem:[%s6351_s5 + $0x1e8] sm:$0xff]  ;;  %v1242_v5 = vunpack.c.l.b16 %v1002_v40 }
  0x8c   : > { %v5013_v23 = vld [vmem:[#allocation2 + $0x58] sm:$0xf0]  ;;  %v5002_v4 = vld [vmem:[%s6351_s5 + $0xa8] sm:$0xff]  ;;  %3539 = vmatpush.bf16.msra.mxu3 %v5138_v17  ;;  %v1243_v8 = vunpack.c.h.b16 %v1002_v40 }
  0x8d   : > { %v4049_v62 = vor.u32 %v5013_v23, %v4048_v21  ;;  %2847 = vmatpush.bf16.msra.mxu1 %v5002_v4  ;;  %v4340_v48 = vld [vmem:[#allocation2 + $0x48] sm:$0xf]  ;;  %v5017_v23 = vld [vmem:[#allocation2 + $0x7c] sm:$0xf] }
  0x8e   : > { %2186 = vmatmul.bf16.vlgmr.msrb.gmra.mxu2 %v4025_v24  ;;  %v5011_v24 = vld [vmem:[#allocation2 + $0x4c] sm:$0xf]  ;;  %v4948_v4 = vld [vmem:[#allocation2 + $0x7c] sm:$0xf] }
  0x8f   : > { %v4045_v56 = vor.u32 %v5011_v24, %v4042_v2 }
  0x91   : > { %v4060_v25 = vld [vmem:[#allocation2 + $0x68] sm:$0xf] }
  0x92   : > { %2769 = vmatmul.bf16.gmra.mxu0 %v4321_v63  ;;  %v5016_v49 = vld [vmem:[#allocation2 + $0x70] sm:$0xf0] }
  0x93   : > { %2675 = vmatmul.bf16.vlgmr.msrb.gmra.mxu3 %v4305_v50  ;;  %v1001_v50 = vsel %vm5786_vm5, %v950_v36, 0  ;;  %v4061_v2 = vor.u32 %v5016_v49, %v4060_v25  ;;  %v4943_v36 = vld [vmem:[#allocation2 + $0x50] sm:$0xf0]  ;;  %v955_v25 = vrot.slane %v834_v30, 1  ;;  %v5001_v30 = vld [vmem:[%s6351_s5 + $0xa0] sm:$0xff] }
  0x94   : > { %v1240_v63 = vunpack.c.l.b16 %v1001_v50  ;;  %v1241_v32 = vunpack.c.h.b16 %v1001_v50  ;;  %v4354_v50 = vld [vmem:[#allocation2 + $0x6c] sm:$0xf0]  ;;  %v5020_v49 = vld [vmem:[#allocation2 + $0x94] sm:$0xf]  ;;  %2848 = vmatpush.bf16.msra.mxu1 %v5001_v30 }
  0x96   : > { %v1276_v6 = vpack.c.b16 %v1240_v63, %v1240_v63  ;;  %v1277_v29 = vpack.c.b16 %v1241_v32, %v1241_v32  ;;  %v4341_v32 = vor.u32 %v4943_v36, %v4340_v48  ;;  %v5129_v48 = vld [vmem:[%s6351_s5 + $0x1a0] sm:$0xff] }
  0x97   : > { %2102 = vmatmul.bf16.gmra.mxu1 %v4033_v39  ;;  %v4328_v39 = vld [vmem:[#allocation2 + $0x30] sm:$0xf]  ;;  %v5137_v36 = vld [vmem:[%s6351_s5 + $0x1e0] sm:$0xff]  ;;  %3451 = vmatpush.bf16.msra.mxu2 %v5129_v48 }
  0x98   : > { %1348 = vst [vmem:[#allocation2 + $0x80] sm:$0xf] %v1276_v6  ;;  %v4329_v0 = vor.u32 %v4940_v12, %v4328_v39  ;;  %v4066_v6 = vld [vmem:[#allocation2 + $0x84] sm:$0xf0]  ;;  %3540 = vmatpush.bf16.msra.mxu3 %v5137_v36 }
  0x99   : > { %1349 = vst [vmem:[#allocation2 + $0x8c] sm:$0xf] %v1277_v29  ;;  %v953_v29 = vrot.slane %v827_v60, 1  ;;  %v4069_v12 = vor.u32 %v5017_v23, %v4066_v6 }
  0x9b   : > { %v954_v39 = vor.u32 %v953_v29, %v824_v57  ;;  %v4946_v57 = vld [vmem:[#allocation2 + $0x68] sm:$0xf0] }
  0x9c   : > { %v4353_v40 = vor.u32 %v4946_v57, %v4352_v42 }
  0x9d   : > { %v1003_v28 = vsel %vm5786_vm5, %v954_v39, 0 }
  0x9e   : > { %2191 = vmatmul.bf16.gmra.mxu2 %v4037_v53 }
  0x9f   : > { %v4072_v55 = vld [vmem:[#allocation2 + $0x80] sm:$0xf] }
  0xa0   : > { %v5019_v59 = vld [vmem:[#allocation2 + $0x88] sm:$0xf0] }
  0xa1   : > { %v4073_v26 = vor.u32 %v5019_v59, %v4072_v55  ;;  %v4949_v55 = vld [vmem:[#allocation2 + $0x80] sm:$0xf0] }
  0xa2   : > { %2774 = vmatmul.bf16.gmra.mxu0 %v4333_v9  ;;  %v1279_v9 = vpack.c.b16 %v1243_v8, %v1243_v8 }
  0xa3   : > { %2680 = vmatmul.bf16.gmra.mxu3 %v4317_v37  ;;  %v1278_v37 = vpack.c.b16 %v1242_v5, %v1242_v5 }
  0xa4   : > { %1351 = vst [vmem:[#allocation2 + $0xa4] sm:$0xf] %v1279_v9 }
  0xa5   : > { %1350 = vst [vmem:[#allocation2 + $0x98] sm:$0xf] %v1278_v37  ;;  %v4078_v37 = vld [vmem:[#allocation2 + $0x9c] sm:$0xf0] }
  0xa7   : > { %2107 = vmatmul.bf16.gmra.mxu1 %v4045_v56  ;;  %v4945_v56 = vld [vmem:[#allocation2 + $0x64] sm:$0xf] }
  0xa8   : > { %v4357_v21 = vor.u32 %v4945_v56, %v4354_v50  ;;  %v4081_v50 = vor.u32 %v5020_v49, %v4078_v37 }
  0xab   : > { %v5022_v6 = vld [vmem:[#allocation2 + $0xa0] sm:$0xf0] }
  0xac   : > { %v4084_v23 = vld [vmem:[#allocation2 + $0x98] sm:$0xf] }
  0xae   : > { %2196 = vmatmul.bf16.gmra.mxu2 %v4049_v62 }
  0xb2   : > { %2779 = vmatmul.bf16.gmra.mxu0 %v4345_v11  ;;  %v5865_v53 = vpop.f32.mrf.mxu0  ;;  %v1245_v11 = vunpack.c.h.b16 %v1003_v28 }
  0xb3   : > { %2685 = vmatmul.bf16.gmra.mxu3 %v4329_v0  ;;  %v1244_v0 = vunpack.c.l.b16 %v1003_v28 }
  0xb4   : > { %v5872_v24 = vpop.f32.mrf.mxu1  ;;  %v1281_v61 = vpack.c.b16 %v1245_v11, %v1245_v11  ;;  %v4364_v11 = vld [vmem:[#allocation2 + $0x78] sm:$0xf] }
  0xb5   : > { %v1280_v60 = vpack.c.b16 %v1244_v0, %v1244_v0  ;;  %v4085_v0 = vor.u32 %v5022_v6, %v4084_v23  ;;  %v4365_v57 = vor.u32 %v4949_v55, %v4364_v11  ;;  %v4952_v23 = vld [vmem:[#allocation2 + $0x98] sm:$0xf0]  ;;  %v4954_v6 = vld [vmem:[#allocation2 + $0xac] sm:$0xf] }
  0xb6   : > { %1353 = vst [vmem:[#allocation2 + $0xbc] sm:$0xf] %v1281_v61  ;;  %v4378_v61 = vld [vmem:[#allocation2 + $0x9c] sm:$0xf0] }
  0xb7   : > { %2112 = vmatmul.bf16.gmra.mxu1 %v4057_v41  ;;  %1352 = vst [vmem:[#allocation2 + $0xb0] sm:$0xf] %v1280_v60  ;;  %v4366_v41 = vld [vmem:[#allocation2 + $0x84] sm:$0xf0]  ;;  %v4951_v60 = vld [vmem:[#allocation2 + $0x94] sm:$0xf] }
  0xb8   : > { %v4369_v8 = vor.u32 %v4948_v4, %v4366_v41  ;;  %v4381_v4 = vor.u32 %v4951_v60, %v4378_v61  ;;  %v5026_v61 = vld [vmem:[#allocation2 + $0xc4] sm:$0xf] }
  0xba   : > { %v5874_v63 = vpop.f32.mrf.mxu0 }
  0xbc   : > { %v5878_v62 = vpop.f32.mrf.mxu1  ;;  %v5882_v45 = vpop.f32.mrf.mxu2 }
  0xbe   : > { %2201 = vmatmul.bf16.gmra.mxu2 %v4061_v2  ;;  %v5888_v17 = vpop.f32.mrf.mxu3  ;;  %v956_v2 = vor.u32 %v955_v25, %v831_v3  ;;  %v4096_v30 = vld [vmem:[#allocation2 + $0xb0] sm:$0xf] }
  0xc0   : > { %v1004_v3 = vsel %vm5786_vm5, %v956_v2, 0 }
  0xc2   : > { %2784 = vmatmul.bf16.gmra.mxu0 %v4357_v21  ;;  %v5886_v43 = vpop.f32.mrf.mxu0  ;;  %v1247_v21 = vunpack.c.h.b16 %v1004_v3 }
  0xc3   : > { %2690 = vmatmul.bf16.gmra.mxu3 %v4341_v32  ;;  %v1246_v32 = vunpack.c.l.b16 %v1004_v3 }
  0xc4   : > { %v5892_v5 = vpop.f32.mrf.mxu2 }
  0xc5   : > { %v1282_v39 = vpack.c.b16 %v1246_v32, %v1246_v32 }
  0xc6   : > { %v5909_v56 = vpop.f32.mrf.mxu3 }
  0xc7   : > { %2117 = vmatmul.bf16.gmra.mxu1 %v4069_v12  ;;  %v1283_v12 = vpack.c.b16 %v1247_v21, %v1247_v21  ;;  %1354 = vst [vmem:[#allocation2 + $0xc8] sm:$0xf] %v1282_v39  ;;  %v4390_v39 = vld [vmem:[#allocation2 + $0xb4] sm:$0xf0] }
  0xc8   : > { %v4393_v55 = vor.u32 %v4954_v6, %v4390_v39  ;;  %v4955_v39 = vld [vmem:[#allocation2 + $0xb0] sm:$0xf0] }
  0xc9   : > { %1355 = vst [vmem:[#allocation2 + $0xd4] sm:$0xf] %v1283_v12 }
  0xca   : > { %v5890_v27 = vpop.f32.mrf.mxu1  ;;  %v5896_v9 = vpop.f32.mrf.mxu0 }
  0xce   : > { %2206 = vmatmul.bf16.gmra.mxu2 %v4073_v26  ;;  %v957_v26 = vrot.slane %v841_v14, 1 }
  0xd0   : > { %v958_v25 = vor.u32 %v957_v26, %v838_v13  ;;  %v4376_v13 = vld [vmem:[#allocation2 + $0x90] sm:$0xf] }
  0xd1   : > { %v4377_v11 = vor.u32 %v4952_v23, %v4376_v13  ;;  %v4102_v26 = vld [vmem:[#allocation2 + $0xcc] sm:$0xf0]  ;;  %v4388_v23 = vld [vmem:[#allocation2 + $0xa8] sm:$0xf] }
  0xd2   : > { %2789 = vmatmul.bf16.gmra.mxu0 %v4369_v8  ;;  %v5916_v29 = vpop.f32.mrf.mxu1  ;;  %v5918_v28 = vpop.f32.mrf.mxu2  ;;  %v4090_v8 = vld [vmem:[#allocation2 + $0xb4] sm:$0xf0]  ;;  %v1005_v14 = vsel %vm5786_vm5, %v958_v25, 0 }
  0xd3   : > { %2695 = vmatmul.bf16.gmra.mxu3 %v4353_v40  ;;  %v5023_v40 = vld [vmem:[#allocation2 + $0xac] sm:$0xf]  ;;  %v1248_v2 = vunpack.c.l.b16 %v1005_v14  ;;  %v1249_v48 = vunpack.c.h.b16 %v1005_v14  ;;  %v4108_v14 = vld [vmem:[#allocation2 + $0xc8] sm:$0xf] }
  0xd4   : > { %v4093_v37 = vor.u32 %v5023_v40, %v4090_v8  ;;  %v5128_v40 = vld [vmem:[%s6351_s5 + $0x198] sm:$0xff]  ;;  %v4105_v8 = vor.u32 %v5026_v61, %v4102_v26  ;;  %v961_v61 = vrot.slane %v855_v54, 1  ;;  %v4389_v26 = vor.u32 %v4955_v39, %v4388_v23 }
  0xd5   : > { %v5924_v42 = vpop.f32.mrf.mxu3  ;;  %v1284_v22 = vpack.c.b16 %v1248_v2, %v1248_v2  ;;  %v1285_v3 = vpack.c.b16 %v1249_v48, %v1249_v48  ;;  %3452 = vmatpush.bf16.msra.mxu2 %v5128_v40  ;;  %v5028_v48 = vld [vmem:[#allocation2 + $0xd0] sm:$0xf0] }
  0xd6   : > { %v4109_v13 = vor.u32 %v5028_v48, %v4108_v14 }
  0xd7   : > { %2122 = vmatmul.bf16.gmra.mxu1 %v4081_v50  ;;  %v5920_v59 = vpop.f32.mrf.mxu0  ;;  %v5025_v50 = vld [vmem:[#allocation2 + $0xb8] sm:$0xf0]  ;;  %1356 = vst [vmem:[#allocation2 + $0xe0] sm:$0xf] %v1284_v22 }
  0xd8   : > { %v4097_v1 = vor.u32 %v5025_v50, %v4096_v30  ;;  %1357 = vst [vmem:[#allocation2 + $0xec] sm:$0xf] %v1285_v3  ;;  %v5000_v30 = vld [vmem:[%s6351_s5 + $0x98] sm:$0xff] }
  0xd9   : > { %v5144_v50 = vld [vmem:[%s6351_s5 + $0x218] sm:$0xff]  ;;  %2849 = vmatpush.bf16.msra.mxu1 %v5000_v30 }
  0xda   : > { %v5930_v49 = vpop.f32.mrf.mxu2  ;;  %3630 = vmatpush.bf16.msra.mxu0 %v5144_v50 }
  0xdd   : > { %v5936_v32 = vpop.f32.mrf.mxu3 }
  0xde   : > { %2211 = vmatmul.bf16.gmra.mxu2 %v4085_v0  ;;  %v5926_v41 = vpop.f32.mrf.mxu1  ;;  %v959_v0 = vrot.slane %v848_v47, 1  ;;  %v5136_v47 = vld [vmem:[%s6351_s5 + $0x1d8] sm:$0xff] }
  0xdf   : > { %v5934_v36 = vpop.f32.mrf.mxu0  ;;  %3541 = vmatpush.bf16.msra.mxu3 %v5136_v47 }
  0xe2   : > { %2794 = vmatmul.bf16.gmra.mxu0 %v4381_v4  ;;  %v960_v4 = vor.u32 %v959_v0, %v845_v46  ;;  %v4957_v0 = vld [vmem:[#allocation2 + $0xc4] sm:$0xf] }
  0xe3   : > { %2700 = vmatmul.bf16.gmra.mxu3 %v4365_v57 }
  0xe4   : > { %v1006_v25 = vsel %vm5786_vm5, %v960_v4, 0 }
  0xe5   : > { %v1250_v33 = vunpack.c.l.b16 %v1006_v25  ;;  %v1251_v46 = vunpack.c.h.b16 %v1006_v25  ;;  %v4114_v25 = vld [vmem:[#allocation2 + $0xe4] sm:$0xf0] }
  0xe6   : > { %v5938_v21 = vpop.f32.mrf.mxu1 }
  0xe7   : > { %2127 = vmatmul.bf16.gmra.mxu1 %v4093_v37  ;;  %v1286_v22 = vpack.c.b16 %v1250_v33, %v1250_v33  ;;  %v1287_v3 = vpack.c.b16 %v1251_v46, %v1251_v46  ;;  %v962_v33 = vor.u32 %v961_v61, %v852_v38  ;;  %v4960_v61 = vld [vmem:[#allocation2 + $0xdc] sm:$0xf] }
  0xe9   : > { %v5940_v12 = vpop.f32.mrf.mxu2  ;;  %1358 = vst [vmem:[#allocation2 + $0xf8] sm:$0xf] %v1286_v22  ;;  %v1007_v14 = vsel %vm5786_vm5, %v962_v33, 0  ;;  %v4120_v22 = vld [vmem:[#allocation2 + $0xe0] sm:$0xf] }
  0xea   : > { %1359 = vst [vmem:[#allocation2 + $0x104] sm:$0xf] %v1287_v3  ;;  %v1252_v54 = vunpack.c.l.b16 %v1007_v14  ;;  %v1253_v30 = vunpack.c.h.b16 %v1007_v14  ;;  %v5031_v3 = vld [vmem:[#allocation2 + $0xe8] sm:$0xf0] }
  0xeb   : > { %v4121_v38 = vor.u32 %v5031_v3, %v4120_v22  ;;  %v5032_v22 = vld [vmem:[#allocation2 + $0xf4] sm:$0xf]  ;;  %v4126_v3 = vld [vmem:[#allocation2 + $0xfc] sm:$0xf0] }
  0xec   : > { %v1289_v23 = vpack.c.b16 %v1253_v30, %v1253_v30 }
  0xee   : > { %2216 = vmatmul.bf16.gmra.mxu2 %v4097_v1  ;;  %v5946_v57 = vpop.f32.mrf.mxu3  ;;  %1361 = vst [vmem:[#allocation2 + $0x11c] sm:$0xf] %v1289_v23 }
  0xef   : > { %v5944_v60 = vpop.f32.mrf.mxu0 }
  0xf1   : > { %v5960_v2 = vpop.f32.mrf.mxu2 }
  0xf2   : > { %2799 = vmatmul.bf16.gmra.mxu0 %v4393_v55 }
  0xf3   : > { %2705 = vmatmul.bf16.gmra.mxu3 %v4377_v11  ;;  %v4402_v11 = vld [vmem:[#allocation2 + $0xcc] sm:$0xf0] }
  0xf4   : > { %v5958_v37 = vpop.f32.mrf.mxu1  ;;  %v4405_v4 = vor.u32 %v4957_v0, %v4402_v11  ;;  %v4400_v0 = vld [vmem:[#allocation2 + $0xc0] sm:$0xf]  ;;  %v4958_v11 = vld [vmem:[#allocation2 + $0xc8] sm:$0xf0] }
  0xf5   : > { %v4401_v33 = vor.u32 %v4958_v11, %v4400_v0 }
  0xf6   : > { %v5970_v6 = vpop.f32.mrf.mxu3 }
  0xf7   : > { %2132 = vmatmul.bf16.gmra.mxu1 %v4105_v8  ;;  %v5968_v1 = vpop.f32.mrf.mxu0  ;;  %v5029_v8 = vld [vmem:[#allocation2 + $0xdc] sm:$0xf] }
  0xf8   : > { %v4117_v46 = vor.u32 %v5029_v8, %v4114_v25  ;;  %v963_v8 = vrot.slane %v862_v58, 1  ;;  %v5127_v58 = vld [vmem:[%s6351_s5 + $0x190] sm:$0xff] }
  0xf9   : > { %3453 = vmatpush.bf16.msra.mxu2 %v5127_v58 }
  0xfa   : > { %v964_v23 = vor.u32 %v963_v8, %v859_v15  ;;  %v5034_v8 = vld [vmem:[#allocation2 + $0x100] sm:$0xf0] }
  0xfc   : > { %v5972_v55 = vpop.f32.mrf.mxu1 }
  0xfe   : > { %2221 = vmatmul.bf16.gmra.mxu2 %v4109_v13  ;;  %v1288_v13 = vpack.c.b16 %v1252_v54, %v1252_v54 }
  0xff   : > { %v5976_v40 = vpop.f32.mrf.mxu0 }
 0x100   : > { %1360 = vst [vmem:[#allocation2 + $0x110] sm:$0xf] %v1288_v13 }
 0x101   : > { %v5978_v47 = vpop.f32.mrf.mxu2 }
 0x102   : > { %2804 = vmatmul.bf16.gmra.mxu0 %v4405_v4 }
 0x103   : > { %2710 = vmatmul.bf16.gmra.mxu3 %v4389_v26  ;;  %v4414_v26 = vld [vmem:[#allocation2 + $0xe4] sm:$0xf0] }
 0x104   : > { %v2098_v48 = vpop.f32.mrf.mxu1 }
 0x105   : > { %v2099_v14 = vadd.f32 %v2098_v48, %v5865_v53  ;;  %v4129_v53 = vor.u32 %v5032_v22, %v4126_v3  ;;  %v1008_v48 = vsel %vm5786_vm5, %v964_v23, 0 }
 0x106   : > { %v5984_v50 = vpop.f32.mrf.mxu3  ;;  %v1254_v11 = vunpack.c.l.b16 %v1008_v48  ;;  %v1255_v44 = vunpack.c.h.b16 %v1008_v48  ;;  %v4412_v48 = vld [vmem:[#allocation2 + $0xd8] sm:$0xf] }
 0x107   : > { %2137 = vmatmul.bf16.gmra.mxu1 %v4117_v46  ;;  %v5986_v39 = vpop.f32.mrf.mxu0  ;;  %v4417_v46 = vor.u32 %v4960_v61, %v4414_v26  ;;  %v4132_v61 = vld [vmem:[#allocation2 + $0xf8] sm:$0xf] }
 0x109   : > { %v5988_v34 = vpop.f32.mrf.mxu2 }
 0x10c   : > { %v2100_v4 = vpop.f32.mrf.mxu1 }
 0x10d   : > { %v2101_v22 = vadd.f32 %v2100_v4, %v5874_v63  ;;  %v965_v63 = vrot.slane %v869_v31, 1 }
 0x10e   : > { %v5992_v25 = vpop.f32.mrf.mxu3  ;;  %2226 = vmatmul.bf16.gmra.mxu2 %v4121_v38  ;;  %v5135_v38 = vld [vmem:[%s6351_s5 + $0x1d0] sm:$0xff] }
 0x10f   : > { %v5995_v54 = vpop.f32.mrf.mxu0  ;;  %3542 = vmatpush.bf16.msra.mxu3 %v5135_v38  ;;  %v4133_v38 = vor.u32 %v5034_v8, %v4132_v61  ;;  %v5035_v61 = vld [vmem:[#allocation2 + $0x10c] sm:$0xf]  ;;  %v4138_v8 = vld [vmem:[#allocation2 + $0x114] sm:$0xf0] }
 0x110   : > { %v4141_v31 = vor.u32 %v5035_v61, %v4138_v8  ;;  %v4966_v61 = vld [vmem:[#allocation2 + $0x10c] sm:$0xf]  ;;  %v4438_v8 = vld [vmem:[#allocation2 + $0x114] sm:$0xf0] }
 0x111   : > { %v2187_v30 = vpop.f32.mrf.mxu2 }
 0x112   : > { %v2188_v13 = vadd.f32 %v2187_v30, %v2099_v14  ;;  %2809 = vmatmul.bf16.gmra.mxu0 %v4417_v46  ;;  %v5143_v46 = vld [vmem:[%s6351_s5 + $0x210] sm:$0xff]  ;;  %v1290_v14 = vpack.c.b16 %v1254_v11, %v1254_v11  ;;  %v1291_v30 = vpack.c.b16 %v1255_v44, %v1255_v44  ;;  %v4426_v11 = vld [vmem:[#allocation2 + $0xfc] sm:$0xf0] }
 0x113   : > { %2715 = vmatmul.bf16.gmra.mxu3 %v4401_v33  ;;  %v4999_v33 = vld [vmem:[%s6351_s5 + $0x90] sm:$0xff]  ;;  %3631 = vmatpush.bf16.msra.mxu0 %v5143_v46  ;;  %v4429_v46 = vor.u32 %v4963_v7, %v4426_v11  ;;  %v5037_v11 = vld [vmem:[#allocation2 + $0x118] sm:$0xf0] }
 0x114   : > { %v2103_v0 = vpop.f32.mrf.mxu1  ;;  %2850 = vmatpush.bf16.msra.mxu1 %v4999_v33  ;;  %1362 = vst [vmem:[#allocation2 + $0x128] sm:$0xf] %v1290_v14 }
 0x115   : > { %1363 = vst [vmem:[#allocation2 + $0x134] sm:$0xf] %v1291_v30  ;;  %v2104_v14 = vadd.f32 %v2103_v0, %v5886_v43 }
 0x116   : > { %v2676_v15 = vpop.f32.mrf.mxu3 }
 0x117   : > { %v2677_v26 = vadd.f32 %v2676_v15, %v2188_v13  ;;  %2142 = vmatmul.bf16.gmra.mxu1 %v4129_v53  ;;  %v6014_v3 = vpop.f32.mrf.mxu0  ;;  %v4961_v15 = vld [vmem:[#allocation2 + $0xe0] sm:$0xf0] }
 0x118   : > { %v4413_v33 = vor.u32 %v4961_v15, %v4412_v48  ;;  %v4144_v15 = vld [vmem:[#allocation2 + $0x110] sm:$0xf] }
 0x119   : > { %v2189_v23 = vpop.f32.mrf.mxu2  ;;  %v6017_v13 = vadd.f32 %v5976_v40, %v2677_v26 }
 0x11a   : > { %v2190_v58 = vadd.f32 %v2189_v23, %v2101_v22  ;;  %v6365_v23 = vshrl.u32 %v5461_v16, 16 }
 0x11c   : > { %v2105_v44 = vpop.f32.mrf.mxu1  ;;  %v966_v10 = vor.u32 %v965_v63, %v6365_v23  ;;  %v6366_v23 = vshll.u32 %v5593_v51, 16 }
 0x11e   : > { %v2678_v4 = vpop.f32.mrf.mxu3  ;;  %2231 = vmatmul.bf16.gmra.mxu2 %v4133_v38  ;;  %v1009_v7 = vsel %vm5786_vm5, %v966_v10, 0 }
 0x11f   : > { %v2679_v53 = vadd.f32 %v2678_v4, %v2190_v58  ;;  %v6022_v40 = vpop.f32.mrf.mxu0  ;;  %v1256_v43 = vunpack.c.l.b16 %v1009_v7  ;;  %v1257_v0 = vunpack.c.h.b16 %v1009_v7  ;;  %v967_v7 = vrot.slane %v6366_v23, 1  ;;  %v4998_v23 = vld [vmem:[%s6351_s5 + $0x88] sm:$0xff] }
 0x120   : > { %2851 = vmatpush.bf16.msra.mxu1 %v4998_v23  ;;  %v6369_v23 = vshrl.u32 %v5683_v20, 16 }
 0x121   : > { %v2192_v26 = vpop.f32.mrf.mxu2  ;;  %v6025_v30 = vadd.f32 %v5986_v39, %v2679_v53  ;;  %v1292_v4 = vpack.c.b16 %v1256_v43, %v1256_v43  ;;  %v1293_v39 = vpack.c.b16 %v1257_v0, %v1257_v0  ;;  %v2106_v53 = vadd.f32 %v2105_v44, %v5896_v9 }
 0x122   : > { %v2193_v22 = vadd.f32 %v2192_v26, %v2104_v14  ;;  %2814 = vmatmul.bf16.gmra.mxu0 %v4429_v46  ;;  %v4145_v46 = vor.u32 %v5037_v11, %v4144_v15  ;;  %v4424_v14 = vld [vmem:[#allocation2 + $0xf0] sm:$0xf]  ;;  %v4964_v26 = vld [vmem:[#allocation2 + $0xf8] sm:$0xf0]  ;;  %v4441_v0 = vor.u32 %v4966_v61, %v4438_v8  ;;  %v5038_v15 = vld [vmem:[#allocation2 + $0x124] sm:$0xf] }
 0x123   : > { %2720 = vmatmul.bf16.gmra.mxu3 %v4413_v33  ;;  %1364 = vst [vmem:[#allocation2 + $0x140] sm:$0xf] %v1292_v4  ;;  %v4425_v43 = vor.u32 %v4964_v26, %v4424_v14  ;;  %v4150_v11 = vld [vmem:[#allocation2 + $0x12c] sm:$0xf0]  ;;  %v4156_v61 = vld [vmem:[#allocation2 + $0x128] sm:$0xf] }
 0x124   : > { %v2108_v58 = vpop.f32.mrf.mxu1  ;;  %1365 = vst [vmem:[#allocation2 + $0x14c] sm:$0xf] %v1293_v39 }
 0x126   : > { %v2681_v38 = vpop.f32.mrf.mxu3 }
 0x127   : > { %v2682_v48 = vadd.f32 %v2681_v38, %v2193_v22  ;;  %2147 = vmatmul.bf16.gmra.mxu1 %v4141_v31  ;;  %v6032_v16 = vpop.f32.mrf.mxu0 }
 0x129   : > { %v2194_v63 = vpop.f32.mrf.mxu2  ;;  %v6035_v33 = vadd.f32 %v5995_v54, %v2682_v48  ;;  %v2109_v54 = vadd.f32 %v2108_v58, %v5920_v59  ;;  %v5134_v59 = vld [vmem:[%s6351_s5 + $0x1c8] sm:$0xff]  ;;  %v4153_v58 = vor.u32 %v5038_v15, %v4150_v11  ;;  %v4967_v11 = vld [vmem:[#allocation2 + $0x110] sm:$0xf0] }
 0x12a   : > { %v2195_v10 = vadd.f32 %v2194_v63, %v2106_v53  ;;  %v6367_v53 = vshrl.u32 %v5593_v51, 16  ;;  %3543 = vmatpush.bf16.msra.mxu3 %v5134_v59  ;;  %v4436_v15 = vld [vmem:[#allocation2 + $0x108] sm:$0xf] }
 0x12c   : > { %v2110_v22 = vpop.f32.mrf.mxu1  ;;  %v968_v63 = vor.u32 %v967_v7, %v6367_v53  ;;  %v5142_v7 = vld [vmem:[%s6351_s5 + $0x208] sm:$0xff]  ;;  %v4450_v53 = vld [vmem:[#allocation2 + $0x12c] sm:$0xf0] }
 0x12d   : > { %v2111_v44 = vadd.f32 %v2110_v22, %v5934_v36  ;;  %v5126_v36 = vld [vmem:[%s6351_s5 + $0x188] sm:$0xff]  ;;  %v5040_v22 = vld [vmem:[#allocation2 + $0x130] sm:$0xf0]  ;;  %3632 = vmatpush.bf16.msra.mxu0 %v5142_v7 }
 0x12e   : > { %v2683_v9 = vpop.f32.mrf.mxu3  ;;  %2236 = vmatmul.bf16.gmra.mxu2 %v4145_v46 }
 0x12f   : > { %v2684_v31 = vadd.f32 %v2683_v9, %v2195_v10  ;;  %v6041_v38 = vpop.f32.mrf.mxu0  ;;  %v1010_v10 = vsel %vm5786_vm5, %v968_v63, 0  ;;  %3454 = vmatpush.bf16.msra.mxu2 %v5126_v36  ;;  %v6368_v36 = vshll.u32 %v5683_v20, 16 }
 0x130   : > { %v1258_v46 = vunpack.c.l.b16 %v1010_v10  ;;  %v1259_v51 = vunpack.c.h.b16 %v1010_v10 }
 0x131   : > { %v2197_v48 = vpop.f32.mrf.mxu2  ;;  %v6044_v4 = vadd.f32 %v6014_v3, %v2684_v31  ;;  %v969_v59 = vrot.slane %v6368_v36, 1 }
 0x132   : > { %v2198_v39 = vadd.f32 %v2197_v48, %v2109_v54  ;;  %2819 = vmatmul.bf16.gmra.mxu0 %v4441_v0  ;;  %v1294_v9 = vpack.c.b16 %v1258_v46, %v1258_v46  ;;  %v1295_v31 = vpack.c.b16 %v1259_v51, %v1259_v51  ;;  %v4157_v48 = vor.u32 %v5040_v22, %v4156_v61  ;;  %v4162_v61 = vld [vmem:[#allocation2 + $0x144] sm:$0xf0] }
 0x133   : > { %2725 = vmatmul.bf16.gmra.mxu3 %v4425_v43  ;;  %v4437_v46 = vor.u32 %v4967_v11, %v4436_v15  ;;  %v970_v7 = vor.u32 %v969_v59, %v6369_v23  ;;  %v4168_v11 = vld [vmem:[#allocation2 + $0x140] sm:$0xf] }
 0x134   : > { %v2113_v3 = vpop.f32.mrf.mxu1  ;;  %1366 = vst [vmem:[#allocation2 + $0x158] sm:$0xf] %v1294_v9 }
 0x135   : > { %v2114_v26 = vadd.f32 %v2113_v3, %v5944_v60  ;;  %1367 = vst [vmem:[#allocation2 + $0x164] sm:$0xf] %v1295_v31 }
 0x136   : > { %v2686_v14 = vpop.f32.mrf.mxu3 }
 0x137   : > { %v2687_v8 = vadd.f32 %v2686_v14, %v2198_v39  ;;  %2152 = vmatmul.bf16.gmra.mxu1 %v4153_v58  ;;  %v6063_v43 = vpop.f32.mrf.mxu0  ;;  %v4969_v39 = vld [vmem:[#allocation2 + $0x124] sm:$0xf]  ;;  %v5041_v14 = vld [vmem:[#allocation2 + $0x13c] sm:$0xf] }
 0x138   : > { %v4453_v51 = vor.u32 %v4969_v39, %v4450_v53  ;;  %v4165_v9 = vor.u32 %v5041_v14, %v4162_v61  ;;  %v5043_v39 = vld [vmem:[#allocation2 + $0x148] sm:$0xf0]  ;;  %v6370_v14 = vshll.u32 %v5776_v35, 16 }
 0x139   : > { %v2199_v0 = vpop.f32.mrf.mxu2  ;;  %v6066_v60 = vadd.f32 %v6022_v40, %v2687_v8  ;;  %v4169_v59 = vor.u32 %v5043_v39, %v4168_v11  ;;  %v6371_v11 = vshrl.u32 %v5776_v35, 16 }
 0x13a   : > { %v2200_v54 = vadd.f32 %v2199_v0, %v2111_v44  ;;  %v971_v61 = vrot.slane %v6370_v14, 1 }
 0x13c   : > { %v2115_v63 = vpop.f32.mrf.mxu1  ;;  %v972_v39 = vor.u32 %v971_v61, %v6371_v11  ;;  %v4474_v11 = vld [vmem:[#allocation2 + $0x15c] sm:$0xf0] }
 0x13d   : > { %v2116_v10 = vadd.f32 %v2115_v63, %v5968_v1  ;;  %v1011_v1 = vsel %vm5786_vm5, %v970_v7, 0 }
 0x13e   : > { %v2688_v58 = vpop.f32.mrf.mxu3  ;;  %2241 = vmatmul.bf16.gmra.mxu2 %v4157_v48  ;;  %v1260_v0 = vunpack.c.l.b16 %v1011_v1 }
 0x13f   : > { %v2689_v3 = vadd.f32 %v2688_v58, %v2200_v54  ;;  %v6071_v40 = vpop.f32.mrf.mxu0  ;;  %v1261_v54 = vunpack.c.h.b16 %v1011_v1  ;;  %v4448_v58 = vld [vmem:[#allocation2 + $0x120] sm:$0xf] }
 0x140   : > { %v1296_v53 = vpack.c.b16 %v1260_v0, %v1260_v0  ;;  %v5044_v0 = vld [vmem:[#allocation2 + $0x154] sm:$0xf] }
 0x141   : > { %v2202_v44 = vpop.f32.mrf.mxu2  ;;  %v6074_v8 = vadd.f32 %v6032_v16, %v2689_v3  ;;  %v1297_v16 = vpack.c.b16 %v1261_v54, %v1261_v54  ;;  %v4970_v3 = vld [vmem:[#allocation2 + $0x128] sm:$0xf0]  ;;  %v4174_v54 = vld [vmem:[#allocation2 + $0x15c] sm:$0xf0] }
 0x142   : > { %v2203_v22 = vadd.f32 %v2202_v44, %v2114_v26  ;;  %2824 = vmatmul.bf16.gmra.mxu0 %v4453_v51  ;;  %1368 = vst [vmem:[#allocation2 + $0x170] sm:$0xf] %v1296_v53  ;;  %v4462_v51 = vld [vmem:[#allocation2 + $0x144] sm:$0xf0]  ;;  %v4449_v7 = vor.u32 %v4970_v3, %v4448_v58  ;;  %v5125_v53 = vld [vmem:[%s6351_s5 + $0x180] sm:$0xff] }
 0x143   : > { %2730 = vmatmul.bf16.gmra.mxu3 %v4437_v46  ;;  %1369 = vst [vmem:[#allocation2 + $0x17c] sm:$0xf] %v1297_v16  ;;  %v4972_v46 = vld [vmem:[#allocation2 + $0x13c] sm:$0xf]  ;;  %v1012_v16 = vsel %vm5786_vm5, %v972_v39, 0  ;;  %3455 = vmatpush.bf16.msra.mxu2 %v5125_v53 }
 0x144   : > { %v2118_v31 = vpop.f32.mrf.mxu1  ;;  %v1263_v35 = vunpack.c.h.b16 %v1012_v16  ;;  %v5046_v3 = vld [vmem:[#allocation2 + $0x160] sm:$0xf0] }
 0x145   : > { %v2119_v1 = vadd.f32 %v2118_v31, %v5872_v24  ;;  %v5133_v24 = vld [vmem:[%s6351_s5 + $0x1c0] sm:$0xff]  ;;  %v4177_v31 = vor.u32 %v5044_v0, %v4174_v54  ;;  %v4460_v0 = vld [vmem:[#allocation2 + $0x138] sm:$0xf] }
 0x146   : > { %v2691_v48 = vpop.f32.mrf.mxu3  ;;  %3544 = vmatpush.bf16.msra.mxu3 %v5133_v24  ;;  %v1299_v61 = vpack.c.b16 %v1263_v35, %v1263_v35  ;;  %v4973_v54 = vld [vmem:[#allocation2 + $0x140] sm:$0xf0]  ;;  %v5047_v35 = vld [vmem:[#allocation2 + $0x16c] sm:$0xf] }
 0x147   : > { %v2692_v15 = vadd.f32 %v2691_v48, %v2203_v22  ;;  %2157 = vmatmul.bf16.gmra.mxu1 %v4165_v9  ;;  %v6080_v26 = vpop.f32.mrf.mxu0  ;;  %v4465_v9 = vor.u32 %v4972_v46, %v4462_v51  ;;  %v4997_v46 = vld [vmem:[%s6351_s5 + $0x80] sm:$0xff] }
 0x148   : > { %v5141_v51 = vld [vmem:[%s6351_s5 + $0x200] sm:$0xff]  ;;  %2852 = vmatpush.bf16.msra.mxu1 %v4997_v46  ;;  %1371 = vst [vmem:[#allocation2 + $0x194] sm:$0xf] %v1299_v61 }
 0x149   : > { %v2204_v20 = vpop.f32.mrf.mxu2  ;;  %v6083_v63 = vadd.f32 %v6041_v38, %v2692_v15  ;;  %3633 = vmatpush.bf16.msra.mxu0 %v5141_v51 }
 0x14a   : > { %v2205_v36 = vadd.f32 %v2204_v20, %v2116_v10  ;;  %v1262_v20 = vunpack.c.l.b16 %v1012_v16 }
 0x14c   : > { %v2120_v44 = vpop.f32.mrf.mxu1  ;;  %v1298_v14 = vpack.c.b16 %v1262_v20, %v1262_v20 }
 0x14e   : > { %v2693_v22 = vpop.f32.mrf.mxu3  ;;  %2246 = vmatmul.bf16.gmra.mxu2 %v4169_v59  ;;  %v4180_v59 = vld [vmem:[#allocation2 + $0x158] sm:$0xf]  ;;  %1370 = vst [vmem:[#allocation2 + $0x188] sm:$0xf] %v1298_v14 }
 0x14f   : > { %v2694_v23 = vadd.f32 %v2693_v22, %v2205_v36  ;;  %v6088_v38 = vpop.f32.mrf.mxu0  ;;  %v2121_v22 = vadd.f32 %v2120_v44, %v5878_v62  ;;  %v4461_v44 = vor.u32 %v4973_v54, %v4460_v0 }
 0x151   : > { %v2207_v10 = vpop.f32.mrf.mxu2  ;;  %v6091_v48 = vadd.f32 %v6063_v43, %v2694_v23 }
 0x152   : > { %v2208_v15 = vadd.f32 %v2207_v10, %v2119_v1  ;;  %2829 = vmatmul.bf16.gmra.mxu0 %v4465_v9  ;;  %v4181_v10 = vor.u32 %v5046_v3, %v4180_v59  ;;  %v996_v3 = vsel %vm5786_vm5, %v5818_v19, 0 }
 0x153   : > { %2735 = vmatmul.bf16.gmra.mxu3 %v4449_v7  ;;  %v1230_v51 = vunpack.c.l.b16 %v996_v3  ;;  %v1231_v14 = vunpack.c.h.b16 %v996_v3 }
 0x154   : > { %v2123_v43 = vpop.f32.mrf.mxu1 }
 0x156   : > { %v2696_v36 = vpop.f32.mrf.mxu3 }
 0x157   : > { %v2697_v58 = vadd.f32 %v2696_v36, %v2208_v15  ;;  %2162 = vmatmul.bf16.gmra.mxu1 %v4177_v31  ;;  %v6110_v23 = vpop.f32.mrf.mxu0  ;;  %v4975_v15 = vld [vmem:[#allocation2 + $0x154] sm:$0xf]  ;;  %v2124_v31 = vadd.f32 %v2123_v43, %v5890_v27  ;;  %v4192_v43 = vld [vmem:[#allocation2 + $0x170] sm:$0xf] }
 0x158   : > { %v4477_v24 = vor.u32 %v4975_v15, %v4474_v11  ;;  %v4472_v11 = vld [vmem:[#allocation2 + $0x150] sm:$0xf] }
 0x159   : > { %v2209_v7 = vpop.f32.mrf.mxu2  ;;  %v6113_v9 = vadd.f32 %v6071_v40, %v2697_v58  ;;  %v4186_v40 = vld [vmem:[#allocation2 + $0x174] sm:$0xf0] }
 0x15a   : > { %v2210_v1 = vadd.f32 %v2209_v7, %v2121_v22  ;;  %v4189_v58 = vor.u32 %v5047_v35, %v4186_v40  ;;  %v5049_v22 = vld [vmem:[#allocation2 + $0x178] sm:$0xf0]  ;;  %v1266_v7 = vpack.c.b16 %v1230_v51, %v1230_v51 }
 0x15b   : > { %v4193_v19 = vor.u32 %v5049_v22, %v4192_v43  ;;  %v4204_v22 = vld [vmem:[#allocation2 + $0x188] sm:$0xf] }
 0x15c   : > { %v2125_v39 = vpop.f32.mrf.mxu1  ;;  %1338 = vst [vmem:[#allocation2 + $0x8] sm:$0xf] %v1266_v7  ;;  %v5052_v7 = vld [vmem:[#allocation2 + $0x190] sm:$0xf0] }
 0x15e   : > { %v2698_v53 = vpop.f32.mrf.mxu3  ;;  %2251 = vmatmul.bf16.gmra.mxu2 %v4181_v10 }
 0x15f   : > { %v2699_v62 = vadd.f32 %v2698_v53, %v2210_v1  ;;  %v2795_v16 = vpop.f32.mrf.mxu0  ;;  %v1267_v1 = vpack.c.b16 %v1231_v14, %v1231_v14  ;;  %v4976_v53 = vld [vmem:[#allocation2 + $0x158] sm:$0xf0] }
 0x160   : > { %v4473_v35 = vor.u32 %v4976_v53, %v4472_v11  ;;  %v4648_v11 = vld [vmem:[#allocation2 + $0x38] sm:$0xf]  ;;  %v5079_v53 = vld [vmem:[#allocation2 + $0x40] sm:$0xf0] }
 0x161   : > { %v2212_v20 = vpop.f32.mrf.mxu2  ;;  %v6117_v36 = vadd.f32 %v6080_v26, %v2699_v62  ;;  %v2126_v26 = vadd.f32 %v2125_v39, %v5916_v29  ;;  %1339 = vst [vmem:[#allocation2 + $0x14] sm:$0xf] %v1267_v1  ;;  %v4978_v62 = vld [vmem:[#allocation2 + $0x16c] sm:$0xf] }
 0x162   : > { %v2213_v59 = vadd.f32 %v2212_v20, %v2124_v31  ;;  %2834 = vmatmul.bf16.gmra.mxu0 %v4477_v24 }
 0x163   : > { %2740 = vmatmul.bf16.gmra.mxu3 %v4461_v44  ;;  %v4486_v44 = vld [vmem:[#allocation2 + $0x174] sm:$0xf0] }
 0x164   : > { %v2128_v46 = vpop.f32.mrf.mxu1  ;;  %v4489_v29 = vor.u32 %v4978_v62, %v4486_v44 }
 0x165   : > { %v2129_v39 = vadd.f32 %v2128_v46, %v5926_v41 }
 0x166   : > { %v2701_v61 = vpop.f32.mrf.mxu3 }
 0x167   : > { %v2702_v27 = vadd.f32 %v2701_v61, %v2213_v59  ;;  %2167 = vmatmul.bf16.gmra.mxu1 %v4189_v58  ;;  %v2797_v10 = vpop.f32.mrf.mxu0  ;;  %v5050_v58 = vld [vmem:[#allocation2 + $0x184] sm:$0xf] }
 0x169   : > { %v2214_v0 = vpop.f32.mrf.mxu2  ;;  %v6124_v54 = vadd.f32 %v6088_v38, %v2702_v27  ;;  %v4198_v38 = vld [vmem:[#allocation2 + $0x18c] sm:$0xf0] }
 0x16a   : > { %v2215_v15 = vadd.f32 %v2214_v0, %v2126_v26  ;;  %v4201_v14 = vor.u32 %v5050_v58, %v4198_v38 }
 0x16c   : > { %v2130_v24 = vpop.f32.mrf.mxu1 }
 0x16d   : > { %v2131_v1 = vadd.f32 %v2130_v24, %v5938_v21 }
 0x16e   : > { %v2703_v31 = vpop.f32.mrf.mxu3  ;;  %2256 = vmatmul.bf16.gmra.mxu2 %v4193_v19  ;;  %v4979_v19 = vld [vmem:[#allocation2 + $0x170] sm:$0xf0] }
 0x16f   : > { %v2704_v20 = vadd.f32 %v2703_v31, %v2215_v15  ;;  %v2800_v40 = vpop.f32.mrf.mxu0  ;;  %v4205_v15 = vor.u32 %v5052_v7, %v4204_v22  ;;  %v5078_v22 = vld [vmem:[#allocation2 + $0x38] sm:$0xf0] }
 0x171   : > { %v2217_v59 = vpop.f32.mrf.mxu2  ;;  %v6128_v3 = vadd.f32 %v6110_v23, %v2704_v20  ;;  %v4484_v23 = vld [vmem:[#allocation2 + $0x168] sm:$0xf] }
 0x172   : > { %v2218_v51 = vadd.f32 %v2217_v59, %v2129_v39  ;;  %2839 = vmatmul.bf16.gmra.mxu0 %v4489_v29  ;;  %v4485_v20 = vor.u32 %v4979_v19, %v4484_v23  ;;  %v4312_v39 = vld [vmem:[#allocation2 + $0x8] sm:$0xf]  ;;  %v4935_v59 = vld [vmem:[#allocation2 + $0x10] sm:$0xf0]  ;;  %v4660_v23 = vld [vmem:[#allocation2 + $0x50] sm:$0xf] }
 0x173   : > { %2745 = vmatmul.bf16.gmra.mxu3 %v4473_v35  ;;  %v4649_v35 = vor.u32 %v5079_v53, %v4648_v11  ;;  %v4313_v38 = vor.u32 %v4935_v59, %v4312_v39  ;;  %v5082_v19 = vld [vmem:[#allocation2 + $0x58] sm:$0xf0] }
 0x174   : > { %v2133_v61 = vpop.f32.mrf.mxu1 }
 0x175   : > { %v2134_v29 = vadd.f32 %v2133_v61, %v5958_v37 }
 0x176   : > { %v2706_v27 = vpop.f32.mrf.mxu3 }
 0x177   : > { %v2707_v43 = vadd.f32 %v2706_v27, %v2218_v51  ;;  %2172 = vmatmul.bf16.gmra.mxu1 %v4201_v14  ;;  %v2802_v41 = vpop.f32.mrf.mxu0 }
 0x179   : > { %v2219_v46 = vpop.f32.mrf.mxu2  ;;  %v6131_v26 = vadd.f32 %v2795_v16, %v2707_v43  ;;  %v4640_v43 = vld [vmem:[#allocation2 + $0x30] sm:$0xf] }
 0x17a   : > { %v2220_v0 = vadd.f32 %v2219_v46, %v2131_v1 }
 0x17c   : > { %v2135_v62 = vpop.f32.mrf.mxu1 }
 0x17d   : > { %v2136_v7 = vadd.f32 %v2135_v62, %v5972_v55 }
 0x17e   : > { %v2708_v44 = vpop.f32.mrf.mxu3  ;;  %2261 = vmatmul.bf16.gmra.mxu2 %v4205_v15  ;;  %v4642_v15 = vld [vmem:[#allocation2 + $0x3c] sm:$0xf0] }
 0x17f   : > { %v2709_v31 = vadd.f32 %v2708_v44, %v2220_v0  ;;  %v2805_v21 = vpop.f32.mrf.mxu0  ;;  %v4641_v0 = vor.u32 %v5078_v22, %v4640_v43  ;;  %v5081_v43 = vld [vmem:[#allocation2 + $0x50] sm:$0xf0] }
 0x181   : > { %v2222_v24 = vpop.f32.mrf.mxu2  ;;  %v6134_v16 = vadd.f32 %v2797_v10, %v2709_v31  ;;  %v5077_v10 = vld [vmem:[#allocation2 + $0x34] sm:$0xf] }
 0x182   : > { %v2223_v58 = vadd.f32 %v2222_v24, %v2134_v29  ;;  %3634 = vmatmul.bf16.vlgmr.msra.gmra.mxu0 %v4649_v35  ;;  %v4645_v31 = vor.u32 %v5077_v10, %v4642_v15  ;;  %v4324_v29 = vld [vmem:[#allocation2 + $0x20] sm:$0xf]  ;;  %v4938_v24 = vld [vmem:[#allocation2 + $0x28] sm:$0xf0]  ;;  %v4672_v10 = vld [vmem:[#allocation2 + $0x68] sm:$0xf] }
 0x183   : > { %2750 = vmatmul.bf16.gmra.mxu3 %v4485_v20  ;;  %v4661_v20 = vor.u32 %v5082_v19, %v4660_v23  ;;  %v4325_v59 = vor.u32 %v4938_v24, %v4324_v29  ;;  %v5085_v15 = vld [vmem:[#allocation2 + $0x70] sm:$0xf0] }
 0x184   : > { %v2138_v51 = vpop.f32.mrf.mxu1 }
 0x185   : > { %v2139_v35 = vadd.f32 %v2138_v51, %v5882_v45 }
 0x186   : > { %v2711_v14 = vpop.f32.mrf.mxu3 }
 0x187   : > { %v2712_v27 = vadd.f32 %v2711_v14, %v2223_v58  ;;  %2853 = vmatmul.bf16.vlgmr.msra.gmra.mxu1 %v4313_v38  ;;  %v2807_v1 = vpop.f32.mrf.mxu0 }
 0x189   : > { %v2224_v37 = vpop.f32.mrf.mxu2  ;;  %v6137_v61 = vadd.f32 %v2800_v40, %v2712_v27  ;;  %v4652_v27 = vld [vmem:[#allocation2 + $0x48] sm:$0xf] }
 0x18a   : > { %v2225_v46 = vadd.f32 %v2224_v37, %v2136_v7 }
 0x18c   : > { %v2140_v11 = vpop.f32.mrf.mxu1 }
 0x18d   : > { %v2141_v22 = vadd.f32 %v2140_v11, %v5892_v5 }
 0x18e   : > { %v2713_v53 = vpop.f32.mrf.mxu3  ;;  %3456 = vmatmul.bf16.vlgmr.msra.gmra.mxu2 %v4641_v0  ;;  %v4654_v0 = vld [vmem:[#allocation2 + $0x54] sm:$0xf0] }
 0x18f   : > { %v2714_v44 = vadd.f32 %v2713_v53, %v2225_v46  ;;  %v2810_v55 = vpop.f32.mrf.mxu0  ;;  %v4653_v46 = vor.u32 %v5081_v43, %v4652_v27  ;;  %v5084_v27 = vld [vmem:[#allocation2 + $0x68] sm:$0xf0] }
 0x191   : > { %v2227_v62 = vpop.f32.mrf.mxu2  ;;  %v6140_v40 = vadd.f32 %v2802_v41, %v2714_v44  ;;  %v5080_v41 = vld [vmem:[#allocation2 + $0x4c] sm:$0xf] }
 0x192   : > { %v2228_v39 = vadd.f32 %v2227_v62, %v2139_v35  ;;  %3639 = vmatmul.bf16.gmra.mxu0 %v4661_v20  ;;  %v4657_v44 = vor.u32 %v5080_v41, %v4654_v0  ;;  %v4336_v35 = vld [vmem:[#allocation2 + $0x38] sm:$0xf]  ;;  %v4941_v62 = vld [vmem:[#allocation2 + $0x40] sm:$0xf0]  ;;  %v4684_v41 = vld [vmem:[#allocation2 + $0x80] sm:$0xf] }
 0x193   : > { %3545 = vmatmul.bf16.vlgmr.msra.gmra.mxu3 %v4645_v31  ;;  %v4673_v31 = vor.u32 %v5085_v15, %v4672_v10  ;;  %v4337_v24 = vor.u32 %v4941_v62, %v4336_v35  ;;  %v5088_v0 = vld [vmem:[#allocation2 + $0x88] sm:$0xf0] }
 0x194   : > { %v2143_v58 = vpop.f32.mrf.mxu1 }
 0x195   : > { %v2144_v20 = vadd.f32 %v2143_v58, %v5918_v28 }
 0x196   : > { %v2716_v38 = vpop.f32.mrf.mxu3 }
 0x197   : > { %v2717_v14 = vadd.f32 %v2716_v38, %v2228_v39  ;;  %2858 = vmatmul.bf16.gmra.mxu1 %v4325_v59  ;;  %v2812_v7 = vpop.f32.mrf.mxu0 }
 0x199   : > { %v2229_v45 = vpop.f32.mrf.mxu2  ;;  %v6143_v51 = vadd.f32 %v2805_v21, %v2717_v14  ;;  %v4664_v14 = vld [vmem:[#allocation2 + $0x60] sm:$0xf] }
 0x19a   : > { %v2230_v37 = vadd.f32 %v2229_v45, %v2141_v22 }
 0x19c   : > { %v2145_v23 = vpop.f32.mrf.mxu1 }
 0x19d   : > { %v2146_v43 = vadd.f32 %v2145_v23, %v5930_v49 }
 0x19e   : > { %v2718_v19 = vpop.f32.mrf.mxu3  ;;  %3461 = vmatmul.bf16.gmra.mxu2 %v4653_v46  ;;  %v4666_v46 = vld [vmem:[#allocation2 + $0x6c] sm:$0xf0] }
 0x19f   : > { %v2719_v53 = vadd.f32 %v2718_v19, %v2230_v37  ;;  %v2815_v5 = vpop.f32.mrf.mxu0  ;;  %v4665_v37 = vor.u32 %v5084_v27, %v4664_v14  ;;  %v5087_v14 = vld [vmem:[#allocation2 + $0x80] sm:$0xf0] }
 0x1a1   : > { %v2232_v11 = vpop.f32.mrf.mxu2  ;;  %v6146_v21 = vadd.f32 %v2807_v1, %v2719_v53  ;;  %v5083_v1 = vld [vmem:[#allocation2 + $0x64] sm:$0xf] }
 0x1a2   : > { %v2233_v29 = vadd.f32 %v2232_v11, %v2144_v20  ;;  %3644 = vmatmul.bf16.gmra.mxu0 %v4673_v31  ;;  %v4669_v53 = vor.u32 %v5083_v1, %v4666_v46  ;;  %v4348_v20 = vld [vmem:[#allocation2 + $0x50] sm:$0xf]  ;;  %v4944_v11 = vld [vmem:[#allocation2 + $0x58] sm:$0xf0]  ;;  %v4696_v1 = vld [vmem:[#allocation2 + $0x98] sm:$0xf] }
 0x1a3   : > { %3550 = vmatmul.bf16.gmra.mxu3 %v4657_v44  ;;  %v4685_v44 = vor.u32 %v5088_v0, %v4684_v41  ;;  %v4349_v62 = vor.u32 %v4944_v11, %v4348_v20  ;;  %v5091_v46 = vld [vmem:[#allocation2 + $0xa0] sm:$0xf0] }
 0x1a4   : > { %v2148_v39 = vpop.f32.mrf.mxu1 }
 0x1a5   : > { %v2149_v31 = vadd.f32 %v2148_v39, %v5940_v12 }
 0x1a6   : > { %v2721_v59 = vpop.f32.mrf.mxu3 }
 0x1a7   : > { %v2722_v38 = vadd.f32 %v2721_v59, %v2233_v29  ;;  %2863 = vmatmul.bf16.gmra.mxu1 %v4337_v24  ;;  %v2817_v22 = vpop.f32.mrf.mxu0 }
 0x1a9   : > { %v2234_v28 = vpop.f32.mrf.mxu2  ;;  %v6149_v58 = vadd.f32 %v2810_v55, %v2722_v38  ;;  %v4676_v38 = vld [vmem:[#allocation2 + $0x78] sm:$0xf] }
 0x1aa   : > { %v2235_v45 = vadd.f32 %v2234_v28, %v2146_v43 }
 0x1ac   : > { %v2150_v10 = vpop.f32.mrf.mxu1 }
 0x1ad   : > { %v2151_v27 = vadd.f32 %v2150_v10, %v5960_v2 }
 0x1ae   : > { %v2723_v15 = vpop.f32.mrf.mxu3  ;;  %3466 = vmatmul.bf16.gmra.mxu2 %v4665_v37  ;;  %v4678_v37 = vld [vmem:[#allocation2 + $0x84] sm:$0xf0] }
 0x1af   : > { %v2724_v19 = vadd.f32 %v2723_v15, %v2235_v45  ;;  %v2820_v49 = vpop.f32.mrf.mxu0  ;;  %v4677_v45 = vor.u32 %v5087_v14, %v4676_v38  ;;  %v5090_v38 = vld [vmem:[#allocation2 + $0x98] sm:$0xf0] }
 0x1b1   : > { %v2237_v23 = vpop.f32.mrf.mxu2  ;;  %v6152_v55 = vadd.f32 %v2812_v7, %v2724_v19  ;;  %v5086_v7 = vld [vmem:[#allocation2 + $0x7c] sm:$0xf] }
 0x1b2   : > { %v2238_v35 = vadd.f32 %v2237_v23, %v2149_v31  ;;  %3649 = vmatmul.bf16.gmra.mxu0 %v4685_v44  ;;  %v4681_v19 = vor.u32 %v5086_v7, %v4678_v37  ;;  %v4360_v31 = vld [vmem:[#allocation2 + $0x68] sm:$0xf]  ;;  %v4947_v23 = vld [vmem:[#allocation2 + $0x70] sm:$0xf0]  ;;  %v4708_v7 = vld [vmem:[#allocation2 + $0xb0] sm:$0xf] }
 0x1b3   : > { %3555 = vmatmul.bf16.gmra.mxu3 %v4669_v53  ;;  %v4697_v53 = vor.u32 %v5091_v46, %v4696_v1  ;;  %v4361_v11 = vor.u32 %v4947_v23, %v4360_v31  ;;  %v5094_v37 = vld [vmem:[#allocation2 + $0xb8] sm:$0xf0] }
 0x1b4   : > { %v2153_v29 = vpop.f32.mrf.mxu1 }
 0x1b5   : > { %v2154_v44 = vadd.f32 %v2153_v29, %v5978_v47 }
 0x1b6   : > { %v2726_v24 = vpop.f32.mrf.mxu3 }
 0x1b7   : > { %v2727_v59 = vadd.f32 %v2726_v24, %v2238_v35  ;;  %2868 = vmatmul.bf16.gmra.mxu1 %v4349_v62  ;;  %v2822_v43 = vpop.f32.mrf.mxu0 }
 0x1b9   : > { %v2239_v12 = vpop.f32.mrf.mxu2  ;;  %v6155_v39 = vadd.f32 %v2815_v5, %v2727_v59  ;;  %v4688_v59 = vld [vmem:[#allocation2 + $0x90] sm:$0xf] }
 0x1ba   : > { %v2240_v28 = vadd.f32 %v2239_v12, %v2151_v27 }
 0x1bc   : > { %v2155_v41 = vpop.f32.mrf.mxu1 }
 0x1bd   : > { %v2156_v14 = vadd.f32 %v2155_v41, %v5988_v34 }
 0x1be   : > { %v2728_v0 = vpop.f32.mrf.mxu3  ;;  %3471 = vmatmul.bf16.gmra.mxu2 %v4677_v45  ;;  %v4690_v45 = vld [vmem:[#allocation2 + $0x9c] sm:$0xf0] }
 0x1bf   : > { %v2729_v15 = vadd.f32 %v2728_v0, %v2240_v28  ;;  %v2825_v2 = vpop.f32.mrf.mxu0  ;;  %v4689_v28 = vor.u32 %v5090_v38, %v4688_v59  ;;  %v5093_v59 = vld [vmem:[#allocation2 + $0xb0] sm:$0xf0] }
 0x1c1   : > { %v2242_v10 = vpop.f32.mrf.mxu2  ;;  %v6158_v5 = vadd.f32 %v2817_v22, %v2729_v15  ;;  %v5089_v22 = vld [vmem:[#allocation2 + $0x94] sm:$0xf] }
 0x1c2   : > { %v2243_v20 = vadd.f32 %v2242_v10, %v2154_v44  ;;  %3654 = vmatmul.bf16.gmra.mxu0 %v4697_v53  ;;  %v4693_v15 = vor.u32 %v5089_v22, %v4690_v45  ;;  %v4372_v44 = vld [vmem:[#allocation2 + $0x80] sm:$0xf]  ;;  %v4950_v10 = vld [vmem:[#allocation2 + $0x88] sm:$0xf0]  ;;  %v4720_v22 = vld [vmem:[#allocation2 + $0xc8] sm:$0xf] }
 0x1c3   : > { %3560 = vmatmul.bf16.gmra.mxu3 %v4681_v19  ;;  %v4709_v19 = vor.u32 %v5094_v37, %v4708_v7  ;;  %v4373_v23 = vor.u32 %v4950_v10, %v4372_v44  ;;  %v5097_v45 = vld [vmem:[#allocation2 + $0xd0] sm:$0xf0] }
 0x1c4   : > { %v2158_v35 = vpop.f32.mrf.mxu1 }
 0x1c5   : > { %v2159_v53 = vadd.f32 %v2158_v35, %v5888_v17 }
 0x1c6   : > { %v2731_v62 = vpop.f32.mrf.mxu3 }
 0x1c7   : > { %v2732_v24 = vadd.f32 %v2731_v62, %v2243_v20  ;;  %2873 = vmatmul.bf16.gmra.mxu1 %v4361_v11  ;;  %v2827_v27 = vpop.f32.mrf.mxu0 }
 0x1c9   : > { %v2244_v47 = vpop.f32.mrf.mxu2  ;;  %v6161_v29 = vadd.f32 %v2820_v49, %v2732_v24  ;;  %v4700_v24 = vld [vmem:[#allocation2 + $0xa8] sm:$0xf] }
 0x1ca   : > { %v2245_v12 = vadd.f32 %v2244_v47, %v2156_v14 }
 0x1cc   : > { %v2160_v1 = vpop.f32.mrf.mxu1 }
 0x1cd   : > { %v2161_v38 = vadd.f32 %v2160_v1, %v5909_v56 }
 0x1ce   : > { %v2733_v46 = vpop.f32.mrf.mxu3  ;;  %3476 = vmatmul.bf16.gmra.mxu2 %v4689_v28  ;;  %v4702_v28 = vld [vmem:[#allocation2 + $0xb4] sm:$0xf0] }
 0x1cf   : > { %v2734_v0 = vadd.f32 %v2733_v46, %v2245_v12  ;;  %v2830_v34 = vpop.f32.mrf.mxu0  ;;  %v4701_v12 = vor.u32 %v5093_v59, %v4700_v24  ;;  %v5096_v24 = vld [vmem:[#allocation2 + $0xc8] sm:$0xf0] }
 0x1d1   : > { %v2247_v41 = vpop.f32.mrf.mxu2  ;;  %v6164_v49 = vadd.f32 %v2822_v43, %v2734_v0  ;;  %v5092_v43 = vld [vmem:[#allocation2 + $0xac] sm:$0xf] }
 0x1d2   : > { %v2248_v31 = vadd.f32 %v2247_v41, %v2159_v53  ;;  %3659 = vmatmul.bf16.gmra.mxu0 %v4709_v19  ;;  %v4705_v0 = vor.u32 %v5092_v43, %v4702_v28  ;;  %v4384_v53 = vld [vmem:[#allocation2 + $0x98] sm:$0xf]  ;;  %v4953_v41 = vld [vmem:[#allocation2 + $0xa0] sm:$0xf0]  ;;  %v4732_v43 = vld [vmem:[#allocation2 + $0xe0] sm:$0xf] }
 0x1d3   : > { %3565 = vmatmul.bf16.gmra.mxu3 %v4693_v15  ;;  %v4721_v15 = vor.u32 %v5097_v45, %v4720_v22  ;;  %v4385_v10 = vor.u32 %v4953_v41, %v4384_v53  ;;  %v5100_v28 = vld [vmem:[#allocation2 + $0xe8] sm:$0xf0] }
 0x1d4   : > { %v2163_v20 = vpop.f32.mrf.mxu1 }
 0x1d5   : > { %v2164_v19 = vadd.f32 %v2163_v20, %v5924_v42 }
 0x1d6   : > { %v2736_v11 = vpop.f32.mrf.mxu3 }
 0x1d7   : > { %v2737_v62 = vadd.f32 %v2736_v11, %v2248_v31  ;;  %2878 = vmatmul.bf16.gmra.mxu1 %v4373_v23  ;;  %v2832_v14 = vpop.f32.mrf.mxu0 }
 0x1d9   : > { %v2249_v17 = vpop.f32.mrf.mxu2  ;;  %v6167_v35 = vadd.f32 %v2825_v2, %v2737_v62  ;;  %v4712_v62 = vld [vmem:[#allocation2 + $0xc0] sm:$0xf] }
 0x1da   : > { %v2250_v47 = vadd.f32 %v2249_v17, %v2161_v38 }
 0x1dc   : > { %v2165_v7 = vpop.f32.mrf.mxu1 }
 0x1dd   : > { %v2166_v59 = vadd.f32 %v2165_v7, %v5936_v32 }
 0x1de   : > { %v2738_v37 = vpop.f32.mrf.mxu3  ;;  %3481 = vmatmul.bf16.gmra.mxu2 %v4701_v12  ;;  %v4714_v12 = vld [vmem:[#allocation2 + $0xcc] sm:$0xf0] }
 0x1df   : > { %v2739_v46 = vadd.f32 %v2738_v37, %v2250_v47  ;;  %v2835_v56 = vpop.f32.mrf.mxu0  ;;  %v4713_v47 = vor.u32 %v5096_v24, %v4712_v62  ;;  %v5099_v62 = vld [vmem:[#allocation2 + $0xe0] sm:$0xf0] }
 0x1e1   : > { %v2252_v1 = vpop.f32.mrf.mxu2  ;;  %v6170_v2 = vadd.f32 %v2827_v27, %v2739_v46  ;;  %v5095_v27 = vld [vmem:[#allocation2 + $0xc4] sm:$0xf] }
 0x1e2   : > { %v2253_v44 = vadd.f32 %v2252_v1, %v2164_v19  ;;  %3664 = vmatmul.bf16.gmra.mxu0 %v4721_v15  ;;  %v4717_v46 = vor.u32 %v5095_v27, %v4714_v12  ;;  %v4396_v19 = vld [vmem:[#allocation2 + $0xb0] sm:$0xf]  ;;  %v4956_v1 = vld [vmem:[#allocation2 + $0xb8] sm:$0xf0]  ;;  %v4744_v27 = vld [vmem:[#allocation2 + $0xf8] sm:$0xf] }
 0x1e3   : > { %3570 = vmatmul.bf16.gmra.mxu3 %v4705_v0  ;;  %v4733_v0 = vor.u32 %v5100_v28, %v4732_v43  ;;  %v4397_v41 = vor.u32 %v4956_v1, %v4396_v19  ;;  %v5103_v12 = vld [vmem:[#allocation2 + $0x100] sm:$0xf0] }
 0x1e4   : > { %v2168_v31 = vpop.f32.mrf.mxu1 }
 0x1e5   : > { %v2169_v15 = vadd.f32 %v2168_v31, %v5946_v57 }
 0x1e6   : > { %v2741_v23 = vpop.f32.mrf.mxu3 }
 0x1e7   : > { %v2742_v11 = vadd.f32 %v2741_v23, %v2253_v44  ;;  %2883 = vmatmul.bf16.gmra.mxu1 %v4385_v10  ;;  %v2837_v38 = vpop.f32.mrf.mxu0 }
 0x1e9   : > { %v2254_v42 = vpop.f32.mrf.mxu2  ;;  %v6173_v20 = vadd.f32 %v2830_v34, %v2742_v11  ;;  %v4724_v11 = vld [vmem:[#allocation2 + $0xd8] sm:$0xf] }
 0x1ea   : > { %v2255_v17 = vadd.f32 %v2254_v42, %v2166_v59 }
 0x1ec   : > { %v2170_v22 = vpop.f32.mrf.mxu1 }
 0x1ed   : > { %v2171_v24 = vadd.f32 %v2170_v22, %v5970_v6 }
 0x1ee   : > { %v2743_v45 = vpop.f32.mrf.mxu3  ;;  %3486 = vmatmul.bf16.gmra.mxu2 %v4713_v47  ;;  %v4726_v47 = vld [vmem:[#allocation2 + $0xe4] sm:$0xf0] }
 0x1ef   : > { %v2744_v37 = vadd.f32 %v2743_v45, %v2255_v17  ;;  %v2840_v32 = vpop.f32.mrf.mxu0  ;;  %v4725_v17 = vor.u32 %v5099_v62, %v4724_v11  ;;  %v5102_v11 = vld [vmem:[#allocation2 + $0xf8] sm:$0xf0] }
 0x1f1   : > { %v2257_v7 = vpop.f32.mrf.mxu2  ;;  %v6176_v34 = vadd.f32 %v2832_v14, %v2744_v37  ;;  %v5098_v14 = vld [vmem:[#allocation2 + $0xdc] sm:$0xf] }
 0x1f2   : > { %v2258_v53 = vadd.f32 %v2257_v7, %v2169_v15  ;;  %3669 = vmatmul.bf16.gmra.mxu0 %v4733_v0  ;;  %v4729_v37 = vor.u32 %v5098_v14, %v4726_v47  ;;  %v4408_v15 = vld [vmem:[#allocation2 + $0xc8] sm:$0xf]  ;;  %v4959_v7 = vld [vmem:[#allocation2 + $0xd0] sm:$0xf0]  ;;  %v4756_v14 = vld [vmem:[#allocation2 + $0x110] sm:$0xf] }
 0x1f3   : > { %3575 = vmatmul.bf16.gmra.mxu3 %v4717_v46  ;;  %v4745_v46 = vor.u32 %v5103_v12, %v4744_v27  ;;  %v4409_v1 = vor.u32 %v4959_v7, %v4408_v15  ;;  %v5106_v47 = vld [vmem:[#allocation2 + $0x118] sm:$0xf0] }
 0x1f4   : > { %v2173_v44 = vpop.f32.mrf.mxu1 }
 0x1f5   : > { %v2174_v0 = vadd.f32 %v2173_v44, %v5984_v50 }
 0x1f6   : > { %v2746_v10 = vpop.f32.mrf.mxu3 }
 0x1f7   : > { %v2747_v23 = vadd.f32 %v2746_v10, %v2258_v53  ;;  %2888 = vmatmul.bf16.gmra.mxu1 %v4397_v41  ;;  %v2842_v59 = vpop.f32.mrf.mxu0 }
 0x1f9   : > { %v2259_v57 = vpop.f32.mrf.mxu2  ;;  %v6179_v31 = vadd.f32 %v2835_v56, %v2747_v23  ;;  %v4736_v23 = vld [vmem:[#allocation2 + $0xf0] sm:$0xf] }
 0x1fa   : > { %v2260_v42 = vadd.f32 %v2259_v57, %v2171_v24 }
 0x1fc   : > { %v2175_v43 = vpop.f32.mrf.mxu1 }
 0x1fd   : > { %v2176_v62 = vadd.f32 %v2175_v43, %v5992_v25  ;;  %v4420_v43 = vld [vmem:[#allocation2 + $0xe0] sm:$0xf] }
 0x1fe   : > { %v2748_v28 = vpop.f32.mrf.mxu3  ;;  %3491 = vmatmul.bf16.gmra.mxu2 %v4725_v17  ;;  %v4738_v17 = vld [vmem:[#allocation2 + $0xfc] sm:$0xf0] }
 0x1ff   : > { %v2749_v45 = vadd.f32 %v2748_v28, %v2260_v42  ;;  %v3635_v6 = vpop.f32.mrf.mxu0  ;;  %v4737_v42 = vor.u32 %v5102_v11, %v4736_v23 }
 0x201   : > { %v2262_v22 = vpop.f32.mrf.mxu2  ;;  %v6182_v56 = vadd.f32 %v2837_v38, %v2749_v45  ;;  %v5101_v38 = vld [vmem:[#allocation2 + $0xf4] sm:$0xf] }
 0x202   : > { %v2263_v19 = vadd.f32 %v2262_v22, %v2174_v0  ;;  %3674 = vmatmul.bf16.gmra.mxu0 %v4745_v46  ;;  %v4741_v45 = vor.u32 %v5101_v38, %v4738_v17  ;;  %v4962_v0 = vld [vmem:[#allocation2 + $0xe8] sm:$0xf0]  ;;  %v4750_v38 = vld [vmem:[#allocation2 + $0x114] sm:$0xf0]  ;;  %v4768_v17 = vld [vmem:[#allocation2 + $0x128] sm:$0xf] }
 0x203   : > { %3580 = vmatmul.bf16.gmra.mxu3 %v4729_v37  ;;  %v4757_v37 = vor.u32 %v5106_v47, %v4756_v14  ;;  %v5109_v14 = vld [vmem:[#allocation2 + $0x130] sm:$0xf0] }
 0x204   : > { %v2854_v53 = vpop.f32.mrf.mxu1 }
 0x205   : > { %v2855_v23 = vadd.f32 %v2854_v53, %v6017_v13 }
 0x206   : > { %v2751_v41 = vpop.f32.mrf.mxu3 }
 0x207   : > { %v2752_v10 = vadd.f32 %v2751_v41, %v2263_v19  ;;  %2893 = vmatmul.bf16.gmra.mxu1 %v4409_v1  ;;  %v3637_v24 = vpop.f32.mrf.mxu0  ;;  %v4748_v1 = vld [vmem:[#allocation2 + $0x108] sm:$0xf]  ;;  %v5105_v41 = vld [vmem:[#allocation2 + $0x110] sm:$0xf0] }
 0x209   : > { %v2264_v50 = vpop.f32.mrf.mxu2  ;;  %v6185_v44 = vadd.f32 %v2840_v32, %v2752_v10  ;;  %v4421_v32 = vor.u32 %v4962_v0, %v4420_v43  ;;  %v4432_v0 = vld [vmem:[#allocation2 + $0xf8] sm:$0xf] }
 0x20a   : > { %v2265_v57 = vadd.f32 %v2264_v50, %v2176_v62  ;;  %v6194_v62 = vld [vmem:[%s6352_s6] ss:$0 sm:$0xff]  ;;  %v4749_v50 = vor.u32 %v5105_v41, %v4748_v1 }
 0x20c   : > { %v2856_v27 = vpop.f32.mrf.mxu1 }
 0x20e   : > { %v2753_v12 = vpop.f32.mrf.mxu3  ;;  %3496 = vmatmul.bf16.gmra.mxu2 %v4737_v42  ;;  %v5104_v42 = vld [vmem:[#allocation2 + $0x10c] sm:$0xf] }
 0x20f   : > { %v2754_v28 = vadd.f32 %v2753_v12, %v2265_v57  ;;  %v3640_v46 = vpop.f32.mrf.mxu0  ;;  %v4753_v12 = vor.u32 %v5104_v42, %v4750_v38 }
 0x211   : > { %v3457_v25 = vpop.f32.mrf.mxu2  ;;  %v6187_v22 = vadd.f32 %v2842_v59, %v2754_v28  ;;  %v4769_v28 = vor.u32 %v5109_v14, %v4768_v17  ;;  %v5107_v17 = vld [vmem:[#allocation2 + $0x124] sm:$0xf]  ;;  %v4762_v14 = vld [vmem:[#allocation2 + $0x12c] sm:$0xf0] }
 0x212   : > { %3679 = vmatmul.bf16.gmra.mxu0 %v4757_v37  ;;  %v2857_v37 = vadd.f32 %v2856_v27, %v6025_v30 }
 0x213   : > { %3585 = vmatmul.bf16.gmra.mxu3 %v4741_v45 }
 0x214   : > { %v2859_v15 = vpop.f32.mrf.mxu1 }
 0x215   : > { %v2860_v30 = vadd.f32 %v2859_v15, %v6035_v33 }
 0x216   : > { %v3546_v7 = vpop.f32.mrf.mxu3 }
 0x217   : > { %v3547_v19 = vadd.f32 %v3546_v7, %v3457_v25  ;;  %2898 = vmatmul.bf16.gmra.mxu1 %v4421_v32  ;;  %v3642_v10 = vpop.f32.mrf.mxu0  ;;  %v4965_v32 = vld [vmem:[#allocation2 + $0x100] sm:$0xf0] }
 0x219   : > { %v3636_v11 = vadd.f32 %v3635_v6, %v3547_v19  ;;  %v3459_v59 = vpop.f32.mrf.mxu2  ;;  %v4433_v19 = vor.u32 %v4965_v32, %v4432_v0  ;;  %v4444_v32 = vld [vmem:[#allocation2 + $0x110] sm:$0xf] }
 0x21b   : > { %v3715_v57 = vadd.f32 %v3636_v11, %v2855_v23 }
 0x21c   : > { %v2861_v6 = vpop.f32.mrf.mxu1 }
 0x21d   : > { %v3751_v13 = vadd.f32 %v6194_v62, %v3715_v57  ;;  %v2862_v33 = vadd.f32 %v2861_v6, %v6044_v4 }
 0x21e   : > { %v3548_v53 = vpop.f32.mrf.mxu3  ;;  %3501 = vmatmul.bf16.gmra.mxu2 %v4749_v50  ;;  %v5108_v50 = vld [vmem:[#allocation2 + $0x128] sm:$0xf0] }
 0x21f   : > { %3783 = vst [vmem:[%s6199_s8] sm:$0xff] %v3751_v13  ;;  %v3549_v47 = vadd.f32 %v3548_v53, %v3459_v59  ;;  %v3645_v45 = vpop.f32.mrf.mxu0  ;;  %v4760_v59 = vld [vmem:[#allocation2 + $0x120] sm:$0xf]  ;;  %v5112_v53 = vld [vmem:[#allocation2 + $0x148] sm:$0xf0] }
 0x220   : > { %v4761_v42 = vor.u32 %v5108_v50, %v4760_v59  ;;  %v4780_v13 = vld [vmem:[#allocation2 + $0x140] sm:$0xf] }
 0x221   : > { %v3638_v25 = vadd.f32 %v3637_v24, %v3549_v47  ;;  %v3462_v43 = vpop.f32.mrf.mxu2 }
 0x222   : > { %3684 = vmatmul.bf16.gmra.mxu0 %v4769_v28 }
 0x223   : > { %v3716_v7 = vadd.f32 %v3638_v25, %v2857_v37  ;;  %3590 = vmatmul.bf16.gmra.mxu3 %v4753_v12  ;;  %v4765_v25 = vor.u32 %v5107_v17, %v4762_v14  ;;  %v5110_v17 = vld [vmem:[#allocation2 + $0x13c] sm:$0xf]  ;;  %v4774_v14 = vld [vmem:[#allocation2 + $0x144] sm:$0xf0] }
 0x224   : > { %v2864_v41 = vpop.f32.mrf.mxu1 }
 0x225   : > { %v3752_v1 = vadd.f32 %v6194_v62, %v3716_v7  ;;  %v4968_v7 = vld [vmem:[#allocation2 + $0x118] sm:$0xf0] }
 0x226   : > { %v3551_v23 = vpop.f32.mrf.mxu3 }
 0x227   : > { %3784 = vst [vmem:[%s6199_s8 + $0x8] sm:$0xff] %v3752_v1  ;;  %v3552_v11 = vadd.f32 %v3551_v23, %v3462_v43  ;;  %2903 = vmatmul.bf16.gmra.mxu1 %v4433_v19  ;;  %v6206_v57 = vpop.f32.mrf.mxu0  ;;  %v4781_v43 = vor.u32 %v5112_v53, %v4780_v13  ;;  %v4445_v1 = vor.u32 %v4968_v7, %v4444_v32  ;;  %v4792_v13 = vld [vmem:[#allocation2 + $0x158] sm:$0xf]  ;;  %v5115_v53 = vld [vmem:[#allocation2 + $0x160] sm:$0xf0] }
 0x229   : > { %v3641_v24 = vadd.f32 %v3640_v46, %v3552_v11  ;;  %v3464_v27 = vpop.f32.mrf.mxu2 }
 0x22b   : > { %v3717_v38 = vadd.f32 %v3641_v24, %v2860_v30  ;;  %v4772_v30 = vld [vmem:[#allocation2 + $0x138] sm:$0xf]  ;;  %v5111_v24 = vld [vmem:[#allocation2 + $0x140] sm:$0xf0] }
 0x22c   : > { %v2866_v12 = vpop.f32.mrf.mxu1 }
 0x22d   : > { %v3753_v47 = vadd.f32 %v6194_v62, %v3717_v38 }
 0x22e   : > { %v3553_v28 = vpop.f32.mrf.mxu3  ;;  %3506 = vmatmul.bf16.gmra.mxu2 %v4761_v42  ;;  %v4773_v42 = vor.u32 %v5111_v24, %v4772_v30  ;;  %v5291_v30 = vld [vmem:[%s6350_s4] ss:$0 sm:$0xff] }
 0x22f   : > { %3785 = vst [vmem:[%s6199_s8 + $0x10] sm:$0xff] %v3753_v47  ;;  %v3554_v37 = vadd.f32 %v3553_v28, %v3464_v27  ;;  %v6211_v0 = vpop.f32.mrf.mxu0 }
 0x231   : > { %v3643_v46 = vadd.f32 %v3642_v10, %v3554_v37  ;;  %v3467_v15 = vpop.f32.mrf.mxu2  ;;  %v2865_v10 = vadd.f32 %v2864_v41, %v6066_v60  ;;  %v5218_v37 = vld [vmem:[%s431_s12] sm:$0xff]  }
 0x232   : > { %3689 = vmatmul.bf16.gmra.mxu0 %v4781_v43  ;;  %v5219_v60 = vunpack.c.l.bf16 %v5218_v37  ;;  %v4777_v43 = vor.u32 %v5110_v17, %v4774_v14 }
 0x233   : > { %v3718_v19 = vadd.f32 %v3643_v46, %v2862_v33  ;;  %3595 = vmatmul.bf16.gmra.mxu3 %v4765_v25  ;;  %v4793_v33 = vor.u32 %v5115_v53, %v4792_v13  ;;  %v4784_v53 = vld [vmem:[#allocation2 + $0x150] sm:$0xf] }
 0x234   : > { %v2869_v11 = vpop.f32.mrf.mxu1 }
 0x235   : > { %v3754_v23 = vadd.f32 %v6194_v62, %v3718_v19  ;;  %v2867_v19 = vadd.f32 %v2866_v12, %v6074_v8 }
 0x236   : > { %v3556_v59 = vpop.f32.mrf.mxu3 }
 0x237   : > { %3786 = vst [vmem:[%s6199_s8 + $0x18] sm:$0xff] %v3754_v23  ;;  %v3557_v50 = vadd.f32 %v3556_v59, %v3467_v15  ;;  %2908 = vmatmul.bf16.gmra.mxu1 %v4445_v1  ;;  %v6217_v4 = vpop.f32.mrf.mxu0  ;;  %v5290_v15 = vld [vmem:[%s6349_s3] ss:$0 sm:$0xff]  ;;  %v4456_v59 = vld [vmem:[#allocation2 + $0x128] sm:$0xf] }
 0x238   : > { %v673_v32 = vmul.f32 %v5290_v15, %v5219_v60 }
 0x239   : > { %v3646_v6 = vadd.f32 %v3645_v45, %v3557_v50  ;;  %v3469_v27 = vpop.f32.mrf.mxu2  ;;  %v5220_v45 = vunpack.c.h.bf16 %v5218_v37  ;;  %v4971_v50 = vld [vmem:[#allocation2 + $0x130] sm:$0xf0] }
 0x23a   : > { %v675_v24 = vadd.f32 %v5291_v30, %v673_v32 }
 0x23b   : > { %v3719_v38 = vadd.f32 %v3646_v6, %v2865_v10  ;;  %v674_v7 = vmul.f32 %v5290_v15, %v5220_v45  ;;  %v2870_v45 = vadd.f32 %v2869_v11, %v6083_v63 }
 0x23c   : > { %v6224_v28 = vpop.f32.mrf.mxu1 }
 0x23d   : > { %v3755_v47 = vadd.f32 %v6194_v62, %v3719_v38  ;;  %v676_v10 = vadd.f32 %v5291_v30, %v674_v7 }
 0x23e   : > { %v3558_v25 = vpop.f32.mrf.mxu3  ;;  %3511 = vmatmul.bf16.gmra.mxu2 %v4773_v42  ;;  %v677_v42 = vmax.f32 %v675_v24, 0.0 }
 0x23f   : > { %3787 = vst [vmem:[%s6199_s8 + $0x20] sm:$0xff] %v3755_v47  ;;  %v3559_v41 = vadd.f32 %v3558_v25, %v3469_v27  ;;  %v6227_v46 = vpop.f32.mrf.mxu0  ;;  %v4457_v27 = vor.u32 %v4971_v50, %v4456_v59  ;;  %v678_v38 = vmax.f32 %v676_v10, 0.0  ;;  %v5114_v47 = vld [vmem:[#allocation2 + $0x158] sm:$0xf0] }
 0x240   : > { %v680_v17 = vmul.f32 0.0, %v677_v42  ;;  %v5118_v59 = vld [vmem:[#allocation2 + $0x178] sm:$0xf0] }
 0x241   : > { %v3648_v1 = vadd.f32 %v6206_v57, %v3559_v41  ;;  %v3472_v23 = vpop.f32.mrf.mxu2  ;;  %v681_v14 = vmul.f32 0.0, %v678_v38  ;;  %v2872_v38 = vadd.f32 %v6224_v28, %v6091_v48 }
 0x242   : > { %3694 = vmatmul.bf16.gmra.mxu0 %v4793_v33  ;;  %v682_v25 = vpack.c.bf16 %v680_v17, %v680_v17  ;;  %v4785_v33 = vor.u32 %v5114_v47, %v4784_v53  ;;  %v4468_v17 = vld [vmem:[#allocation2 + $0x140] sm:$0xf] }
 0x243   : > { %v3720_v6 = vadd.f32 %v3648_v1, %v2867_v19  ;;  %3600 = vmatmul.bf16.gmra.mxu3 %v4777_v43  ;;  %v683_v60 = vpack.c.bf16 %v681_v14, %v681_v14  ;;  %v5113_v19 = vld [vmem:[#allocation2 + $0x154] sm:$0xf]  ;;  %v4786_v1 = vld [vmem:[#allocation2 + $0x15c] sm:$0xf0]  ;;  %v4974_v14 = vld [vmem:[#allocation2 + $0x148] sm:$0xf0] }
 0x244   : > { %v2874_v12 = vpop.f32.mrf.mxu1  ;;  %v754_v15 = vunpack.c.l.b16 %v682_v25  ;;  %1210 = vst [vmem:[#allocation2 + $0x19c] sm:$0xf] %v682_v25  ;;  %v4469_v25 = vor.u32 %v4974_v14, %v4468_v17 }
 0x245   : > { %v3756_v8 = vadd.f32 %v6194_v62, %v3720_v6  ;;  %v755_v32 = vunpack.c.l.b16 %v683_v60  ;;  %1211 = vst [vmem:[#allocation2 + $0x1a8] sm:$0xf] %v683_v60  ;;  %v4789_v6 = vor.u32 %v5113_v19, %v4786_v1 }
 0x246   : > { %v3561_v57 = vpop.f32.mrf.mxu3 }
 0x247   : > { %3788 = vst [vmem:[%s6199_s8 + $0x28] sm:$0xff] %v3756_v8  ;;  %v3562_v13 = vadd.f32 %v3561_v57, %v3472_v23  ;;  %2913 = vmatmul.bf16.gmra.mxu1 %v4457_v27  ;;  %v6239_v37 = vpop.f32.mrf.mxu0  ;;  %v4804_v23 = vld [vmem:[#allocation2 + $0x170] sm:$0xf]  ;;  %v773_v50 = vpack.c.b16 %v755_v32, %v754_v15  ;;  %v4796_v15 = vld [vmem:[#allocation2 + $0x168] sm:$0xf] }
 0x248   : > { %v4805_v27 = vor.u32 %v5118_v59, %v4804_v23  ;;  %v5117_v32 = vld [vmem:[#allocation2 + $0x170] sm:$0xf0]  ;;  %v2875_v23 = vadd.f32 %v2874_v12, %v6113_v9 }
 0x249   : > { %v3651_v41 = vadd.f32 %v6211_v0, %v3562_v13  ;;  %v3474_v43 = vpop.f32.mrf.mxu2  ;;  %v894_v0 = vshrl.u32 %v773_v50, 16  ;;  %v897_v11 = vshll.u32 %v773_v50, 16 }
 0x24b   : > { %v3721_v7 = vadd.f32 %v3651_v41, %v2870_v45  ;;  %v896_v13 = vrot.slane %v894_v0, 7  ;;  %v973_v53 = vrot.slane %v897_v11, 1 }
 0x24c   : > { %v6244_v24 = vpop.f32.mrf.mxu1 }
 0x24d   : > { %v3757_v30 = vadd.f32 %v6194_v62, %v3721_v7  ;;  %v899_v60 = vor.u32 %v897_v11, %v896_v13  ;;  %v974_v45 = vor.u32 %v973_v53, %v894_v0  ;;  %v4797_v11 = vor.u32 %v5117_v32, %v4796_v15 }
 0x24e   : > { %v3563_v63 = vpop.f32.mrf.mxu3  ;;  %3516 = vmatmul.bf16.gmra.mxu2 %v4785_v33 }
 0x24f   : > { %3789 = vst [vmem:[%s6199_s8 + $0x30] sm:$0xff] %v3757_v30  ;;  %v3564_v10 = vadd.f32 %v3563_v63, %v3474_v43  ;;  %v6247_v42 = vpop.f32.mrf.mxu0  ;;  %v938_v48 = vsel %vm5466_vm2, 0, %v899_v60 }
 0x250   : > { %v1066_v7 = vunpack.c.l.b16 %v938_v48  ;;  %v1067_v19 = vunpack.c.h.b16 %v938_v48 }
 0x251   : > { %v3653_v8 = vadd.f32 %v6217_v4, %v3564_v10  ;;  %v3477_v57 = vpop.f32.mrf.mxu2  ;;  %v1013_v4 = vsel %vm5786_vm5, %v974_v45, 0  ;;  %v4480_v45 = vld [vmem:[#allocation2 + $0x158] sm:$0xf] }
 0x252   : > { %3699 = vmatmul.bf16.gmra.mxu0 %v4805_v27  ;;  %v1264_v1 = vunpack.c.l.b16 %v1013_v4  ;;  %v1265_v50 = vunpack.c.h.b16 %v1013_v4  ;;  %v1102_v63 = vpack.c.b16 %v1066_v7, %v1066_v7  ;;  %v1103_v0 = vpack.c.b16 %v1067_v19, %v1067_v19  ;;  %v5116_v27 = vld [vmem:[#allocation2 + $0x16c] sm:$0xf]  ;;  %v4808_v7 = vld [vmem:[#allocation2 + $0x180] sm:$0xf] }
 0x253   : > { %v3722_v47 = vadd.f32 %v3653_v8, %v2872_v38  ;;  %3605 = vmatmul.bf16.gmra.mxu3 %v4789_v6  ;;  %v4798_v38 = vld [vmem:[#allocation2 + $0x174] sm:$0xf0]  ;;  %v4816_v8 = vld [vmem:[#allocation2 + $0x188] sm:$0xf]  ;;  %v5120_v19 = vld [vmem:[#allocation2 + $0x188] sm:$0xf0] }
 0x254   : > { %v2879_v43 = vpop.f32.mrf.mxu1  ;;  %v1300_v52 = vpack.c.b16 %v1264_v1, %v1264_v1  ;;  %v1301_v10 = vpack.c.b16 %v1265_v50, %v1265_v50  ;;  %1174 = vst [vmem:[#allocation2 + $0x198] sm:$0xf] %v1102_v63  ;;  %v4801_v14 = vor.u32 %v5116_v27, %v4798_v38 }
 0x255   : > { %v3758_v41 = vadd.f32 %v6194_v62, %v3722_v47  ;;  %1175 = vst [vmem:[#allocation2 + $0x1a4] sm:$0xf] %v1103_v0  ;;  %v2877_v47 = vadd.f32 %v6244_v24, %v6117_v36 }
 0x256   : > { %v3566_v33 = vpop.f32.mrf.mxu3  ;;  %1372 = vst [vmem:[#allocation2 + $0x1a0] sm:$0xf] %v1300_v52 }
 0x257   : > { %3790 = vst [vmem:[%s6199_s8 + $0x38] sm:$0xff] %v3758_v41  ;;  %v3567_v28 = vadd.f32 %v3566_v33, %v3477_v57  ;;  %2918 = vmatmul.bf16.gmra.mxu1 %v4469_v25  ;;  %v6259_v59 = vpop.f32.mrf.mxu0  ;;  %v5121_v57 = vld [vmem:[#allocation2 + $0x190] sm:$0xf0]  ;;  %v4977_v41 = vld [vmem:[#allocation2 + $0x160] sm:$0xf0] }
 0x258   : > { %1373 = vst [vmem:[#allocation2 + $0x1ac] sm:$0xf] %v1301_v10  ;;  %v4817_v13 = vor.u32 %v5121_v57, %v4816_v8  ;;  %v4481_v48 = vor.u32 %v4977_v41, %v4480_v45  ;;  %v4492_v57 = vld [vmem:[#allocation2 + $0x170] sm:$0xf] }
 0x259   : > { %v3656_v30 = vadd.f32 %v6227_v46, %v3567_v28  ;;  %v3479_v18 = vpop.f32.mrf.mxu2 }
 0x25b   : > { %v3723_v6 = vadd.f32 %v3656_v30, %v2875_v23  ;;  %v4809_v23 = vor.u32 %v5120_v19, %v4808_v7  ;;  %v5119_v30 = vld [vmem:[#allocation2 + $0x184] sm:$0xf] }
 0x25c   : > { %v2881_v12 = vpop.f32.mrf.mxu1  ;;  %v5123_v45 = vld [vmem:[#allocation2 + $0x1a0] sm:$0xf0] }
 0x25d   : > { %v3759_v9 = vadd.f32 %v6194_v62, %v3723_v6  ;;  %v4828_v63 = vld [vmem:[#allocation2 + $0x1a0] sm:$0xf] }
 0x25e   : > { %v3568_v17 = vpop.f32.mrf.mxu3  ;;  %3521 = vmatmul.bf16.gmra.mxu2 %v4797_v11 }
 0x25f   : > { %3791 = vst [vmem:[%s6199_s8 + $0x40] sm:$0xff] %v3759_v9  ;;  %v3569_v46 = vadd.f32 %v3568_v17, %v3479_v18  ;;  %v3665_v53 = vpop.f32.mrf.mxu0  ;;  %v4810_v18 = vld [vmem:[#allocation2 + $0x18c] sm:$0xf0]  ;;  %v5124_v0 = vld [vmem:[#allocation2 + $0x1a8] sm:$0xf0] }
 0x260   : > { %v4813_v27 = vor.u32 %v5119_v30, %v4810_v18  ;;  %v4829_v38 = vor.u32 %v5124_v0, %v4828_v63  ;;  %v4980_v9 = vld [vmem:[#allocation2 + $0x178] sm:$0xf0] }
 0x261   : > { %v3658_v25 = vadd.f32 %v6239_v37, %v3569_v46  ;;  %v3482_v60 = vpop.f32.mrf.mxu2  ;;  %v2880_v37 = vadd.f32 %v2879_v43, %v6124_v54  ;;  %v4493_v46 = vor.u32 %v4980_v9, %v4492_v57 }
 0x262   : > { %3704 = vmatmul.bf16.gmra.mxu0 %v4817_v13 }
 0x263   : > { %v3724_v33 = vadd.f32 %v3658_v25, %v2877_v47  ;;  %3610 = vmatmul.bf16.gmra.mxu3 %v4801_v14 }
 0x264   : > { %v2884_v28 = vpop.f32.mrf.mxu1 }
 0x265   : > { %v3760_v4 = vadd.f32 %v6194_v62, %v3724_v33 }
 0x266   : > { %v3571_v15 = vpop.f32.mrf.mxu3 }
 0x267   : > { %3792 = vst [vmem:[%s6199_s8 + $0x48] sm:$0xff] %v3760_v4  ;;  %v3572_v32 = vadd.f32 %v3571_v15, %v3482_v60  ;;  %2923 = vmatmul.bf16.gmra.mxu1 %v4481_v48  ;;  %v3667_v36 = vpop.f32.mrf.mxu0  ;;  %v4820_v60 = vld [vmem:[#allocation2 + $0x198] sm:$0xf]  ;;  %v5122_v4 = vld [vmem:[#allocation2 + $0x19c] sm:$0xf] }
 0x268   : > { %v4821_v33 = vor.u32 %v5123_v45, %v4820_v60  ;;  %v4822_v15 = vld [vmem:[#allocation2 + $0x1a4] sm:$0xf0] }
 0x269   : > { %v3661_v24 = vadd.f32 %v6247_v42, %v3572_v32  ;;  %v3484_v1 = vpop.f32.mrf.mxu2  ;;  %v2882_v42 = vadd.f32 %v2881_v12, %v6128_v3 }
 0x26b   : > { %v3725_v50 = vadd.f32 %v3661_v24, %v2880_v37  ;;  %v4825_v24 = vor.u32 %v5122_v4, %v4822_v15 }
 0x26c   : > { %v2886_v11 = vpop.f32.mrf.mxu1 }
 0x26d   : > { %v3761_v52 = vadd.f32 %v6194_v62, %v3725_v50 }
 0x26e   : > { %v3573_v10 = vpop.f32.mrf.mxu3  ;;  %3526 = vmatmul.bf16.gmra.mxu2 %v4809_v23  ;;  %v2887_v23 = vadd.f32 %v2886_v11, %v6134_v16 }
 0x26f   : > { %3793 = vst [vmem:[%s6199_s8 + $0x50] sm:$0xff] %v3761_v52  ;;  %v3574_v6 = vadd.f32 %v3573_v10, %v3484_v1  ;;  %v3670_v54 = vpop.f32.mrf.mxu0 }
 0x271   : > { %v3663_v43 = vadd.f32 %v6259_v59, %v3574_v6  ;;  %v3487_v8 = vpop.f32.mrf.mxu2  ;;  %v2885_v59 = vadd.f32 %v2884_v28, %v6131_v26 }
 0x272   : > { %3709 = vmatmul.bf16.gmra.mxu0 %v4829_v38 }
 0x273   : > { %v3726_v17 = vadd.f32 %v3663_v43, %v2882_v42  ;;  %3615 = vmatmul.bf16.gmra.mxu3 %v4813_v27 }
 0x274   : > { %v2889_v13 = vpop.f32.mrf.mxu1 }
 0x275   : > { %v3762_v14 = vadd.f32 %v6194_v62, %v3726_v17  ;;  %v2890_v52 = vadd.f32 %v2889_v13, %v6137_v61 }
 0x276   : > { %v3576_v47 = vpop.f32.mrf.mxu3 }
 0x277   : > { %3794 = vst [vmem:[%s6199_s8 + $0x58] sm:$0xff] %v3762_v14  ;;  %v3577_v25 = vadd.f32 %v3576_v47, %v3487_v8  ;;  %2928 = vmatmul.bf16.gmra.mxu1 %v4493_v46  ;;  %v3672_v3 = vpop.f32.mrf.mxu0 }
 0x279   : > { %v3666_v12 = vadd.f32 %v3665_v53, %v3577_v25  ;;  %v3489_v41 = vpop.f32.mrf.mxu2 }
 0x27b   : > { %v3727_v48 = vadd.f32 %v3666_v12, %v2885_v59 }
 0x27c   : > { %v2891_v7 = vpop.f32.mrf.mxu1 }
 0x27d   : > { %v3763_v32 = vadd.f32 %v6194_v62, %v3727_v48  ;;  %v2892_v43 = vadd.f32 %v2891_v7, %v6140_v40 }
 0x27e   : > { %v3578_v19 = vpop.f32.mrf.mxu3  ;;  %3531 = vmatmul.bf16.gmra.mxu2 %v4821_v33 }
 0x27f   : > { %3795 = vst [vmem:[%s6199_s8 + $0x60] sm:$0xff] %v3763_v32  ;;  %v3579_v37 = vadd.f32 %v3578_v19, %v3489_v41  ;;  %v3675_v1 = vpop.f32.mrf.mxu0 }
 0x281   : > { %v3668_v50 = vadd.f32 %v3667_v36, %v3579_v37  ;;  %v3492_v26 = vpop.f32.mrf.mxu2 }
 0x283   : > { %v3728_v53 = vadd.f32 %v3668_v50, %v2887_v23  ;;  %3620 = vmatmul.bf16.gmra.mxu3 %v4825_v24 }
 0x284   : > { %v2894_v30 = vpop.f32.mrf.mxu1 }
 0x285   : > { %v3764_v28 = vadd.f32 %v6194_v62, %v3728_v53  ;;  %v2895_v13 = vadd.f32 %v2894_v30, %v6143_v51 }
 0x286   : > { %v3581_v18 = vpop.f32.mrf.mxu3 }
 0x287   : > { %3796 = vst [vmem:[%s6199_s8 + $0x68] sm:$0xff] %v3764_v28  ;;  %v3582_v63 = vadd.f32 %v3581_v18, %v3492_v26  ;;  %v3677_v0 = vpop.f32.mrf.mxu0 }
 0x289   : > { %v3671_v10 = vadd.f32 %v3670_v54, %v3582_v63  ;;  %v3494_v6 = vpop.f32.mrf.mxu2 }
 0x28b   : > { %v3729_v27 = vadd.f32 %v3671_v10, %v2890_v52 }
 0x28c   : > { %v2896_v36 = vpop.f32.mrf.mxu1 }
 0x28d   : > { %v3765_v16 = vadd.f32 %v6194_v62, %v3729_v27  ;;  %v2897_v12 = vadd.f32 %v2896_v36, %v6146_v21 }
 0x28e   : > { %v3583_v11 = vpop.f32.mrf.mxu3 }
 0x28f   : > { %3797 = vst [vmem:[%s6199_s8 + $0x70] sm:$0xff] %v3765_v16  ;;  %v3584_v38 = vadd.f32 %v3583_v11, %v3494_v6  ;;  %v3680_v42 = vpop.f32.mrf.mxu0 }
 0x291   : > { %v3673_v8 = vadd.f32 %v3672_v3, %v3584_v38  ;;  %v3497_v57 = vpop.f32.mrf.mxu2 }
 0x293   : > { %v3730_v9 = vadd.f32 %v3673_v8, %v2892_v43 }
 0x294   : > { %v2899_v61 = vpop.f32.mrf.mxu1 }
 0x295   : > { %v3766_v17 = vadd.f32 %v6194_v62, %v3730_v9  ;;  %v2900_v19 = vadd.f32 %v2899_v61, %v6149_v58 }
 0x296   : > { %v3586_v54 = vpop.f32.mrf.mxu3 }
 0x297   : > { %3798 = vst [vmem:[%s6199_s8 + $0x78] sm:$0xff] %v3766_v17  ;;  %v3587_v46 = vadd.f32 %v3586_v54, %v3497_v57  ;;  %v3682_v14 = vpop.f32.mrf.mxu0 }
 0x299   : > { %v3676_v47 = vadd.f32 %v3675_v1, %v3587_v46  ;;  %v3499_v25 = vpop.f32.mrf.mxu2 }
 0x29b   : > { %v3731_v60 = vadd.f32 %v3676_v47, %v2895_v13 }
 0x29c   : > { %v2901_v40 = vpop.f32.mrf.mxu1 }
 0x29d   : > { %v3767_v45 = vadd.f32 %v6194_v62, %v3731_v60  ;;  %v2902_v28 = vadd.f32 %v2901_v40, %v6152_v55 }
 0x29e   : > { %v3588_v3 = vpop.f32.mrf.mxu3 }
 0x29f   : > { %3799 = vst [vmem:[%s6199_s8 + $0x80] sm:$0xff] %v3767_v45  ;;  %v3589_v59 = vadd.f32 %v3588_v3, %v3499_v25  ;;  %v3685_v48 = vpop.f32.mrf.mxu0 }
 0x2a1   : > { %v3678_v41 = vadd.f32 %v3677_v0, %v3589_v59  ;;  %v3502_v33 = vpop.f32.mrf.mxu2 }
 0x2a3   : > { %v3732_v4 = vadd.f32 %v3678_v41, %v2897_v12 }
 0x2a4   : > { %v2904_v51 = vpop.f32.mrf.mxu1 }
 0x2a5   : > { %v3768_v15 = vadd.f32 %v6194_v62, %v3732_v4  ;;  %v2905_v27 = vadd.f32 %v2904_v51, %v6155_v39 }
 0x2a6   : > { %v3591_v32 = vpop.f32.mrf.mxu3 }
 0x2a7   : > { %3800 = vst [vmem:[%s6199_s8 + $0x88] sm:$0xff] %v3768_v15  ;;  %v3592_v7 = vadd.f32 %v3591_v32, %v3502_v33  ;;  %v3687_v23 = vpop.f32.mrf.mxu0 }
 0x2a9   : > { %v3681_v37 = vadd.f32 %v3680_v42, %v3592_v7  ;;  %v3504_v24 = vpop.f32.mrf.mxu2 }
 0x2ab   : > { %v3733_v1 = vadd.f32 %v3681_v37, %v2900_v19 }
 0x2ac   : > { %v2906_v50 = vpop.f32.mrf.mxu1 }
 0x2ad   : > { %v3769_v21 = vadd.f32 %v6194_v62, %v3733_v1  ;;  %v2907_v57 = vadd.f32 %v2906_v50, %v6158_v5 }
 0x2ae   : > { %v3593_v26 = vpop.f32.mrf.mxu3 }
 0x2af   : > { %3801 = vst [vmem:[%s6199_s8 + $0x90] sm:$0xff] %v3769_v21  ;;  %v3594_v53 = vadd.f32 %v3593_v26, %v3504_v24  ;;  %v3690_v10 = vpop.f32.mrf.mxu0 }
 0x2b1   : > { %v3683_v30 = vadd.f32 %v3682_v14, %v3594_v53  ;;  %v3507_v18 = vpop.f32.mrf.mxu2 }
 0x2b3   : > { %v3734_v63 = vadd.f32 %v3683_v30, %v2902_v28 }
 0x2b4   : > { %v2909_v58 = vpop.f32.mrf.mxu1 }
 0x2b5   : > { %v3770_v0 = vadd.f32 %v6194_v62, %v3734_v63  ;;  %v2910_v13 = vadd.f32 %v2909_v58, %v6161_v29 }
 0x2b6   : > { %v3596_v52 = vpop.f32.mrf.mxu3 }
 0x2b7   : > { %3802 = vst [vmem:[%s6199_s8 + $0x98] sm:$0xff] %v3770_v0  ;;  %v3597_v6 = vadd.f32 %v3596_v52, %v3507_v18  ;;  %v3692_v8 = vpop.f32.mrf.mxu0 }
 0x2b9   : > { %v3686_v16 = vadd.f32 %v3685_v48, %v3597_v6  ;;  %v3509_v36 = vpop.f32.mrf.mxu2 }
 0x2bb   : > { %v3735_v11 = vadd.f32 %v3686_v16, %v2905_v27 }
 0x2bc   : > { %v2911_v42 = vpop.f32.mrf.mxu1 }
 0x2bd   : > { %v3771_v38 = vadd.f32 %v6194_v62, %v3735_v11  ;;  %v2912_v59 = vadd.f32 %v2911_v42, %v6164_v49 }
 0x2be   : > { %v3598_v55 = vpop.f32.mrf.mxu3 }
 0x2bf   : > { %3803 = vst [vmem:[%s6199_s8 + $0xa0] sm:$0xff] %v3771_v38  ;;  %v3599_v43 = vadd.f32 %v3598_v55, %v3509_v36  ;;  %v3695_v60 = vpop.f32.mrf.mxu0 }
 0x2c1   : > { %v3688_v9 = vadd.f32 %v3687_v23, %v3599_v43  ;;  %v3512_v17 = vpop.f32.mrf.mxu2 }
 0x2c3   : > { %v3736_v61 = vadd.f32 %v3688_v9, %v2907_v57 }
 0x2c4   : > { %v2914_v14 = vpop.f32.mrf.mxu1 }
 0x2c5   : > { %v3772_v54 = vadd.f32 %v6194_v62, %v3736_v61  ;;  %v2915_v32 = vadd.f32 %v2914_v14, %v6167_v35 }
 0x2c6   : > { %v3601_v39 = vpop.f32.mrf.mxu3 }
 0x2c7   : > { %3804 = vst [vmem:[%s6199_s8 + $0xa8] sm:$0xff] %v3772_v54  ;;  %v3602_v46 = vadd.f32 %v3601_v39, %v3512_v17  ;;  %v3697_v4 = vpop.f32.mrf.mxu0 }
 0x2c9   : > { %v3691_v47 = vadd.f32 %v3690_v10, %v3602_v46  ;;  %v3514_v25 = vpop.f32.mrf.mxu2 }
 0x2cb   : > { %v3737_v45 = vadd.f32 %v3691_v47, %v2910_v13 }
 0x2cc   : > { %v2916_v33 = vpop.f32.mrf.mxu1 }
 0x2cd   : > { %v3773_v40 = vadd.f32 %v6194_v62, %v3737_v45  ;;  %v2917_v50 = vadd.f32 %v2916_v33, %v6170_v2 }
 0x2ce   : > { %v3603_v5 = vpop.f32.mrf.mxu3 }
 0x2cf   : > { %3805 = vst [vmem:[%s6199_s8 + $0xb0] sm:$0xff] %v3773_v40  ;;  %v3604_v3 = vadd.f32 %v3603_v5, %v3514_v25  ;;  %v3700_v23 = vpop.f32.mrf.mxu0 }
 0x2d1   : > { %v3693_v12 = vadd.f32 %v3692_v8, %v3604_v3  ;;  %v3517_v41 = vpop.f32.mrf.mxu2 }
 0x2d3   : > { %v3738_v48 = vadd.f32 %v3693_v12, %v2912_v59 }
 0x2d4   : > { %v2919_v24 = vpop.f32.mrf.mxu1 }
 0x2d5   : > { %v3774_v29 = vadd.f32 %v6194_v62, %v3738_v48  ;;  %v2920_v58 = vadd.f32 %v2919_v24, %v6173_v20 }
 0x2d6   : > { %v3606_v15 = vpop.f32.mrf.mxu3 }
 0x2d7   : > { %3806 = vst [vmem:[%s6199_s8 + $0xb8] sm:$0xff] %v3774_v29  ;;  %v3607_v51 = vadd.f32 %v3606_v15, %v3517_v41  ;;  %v3702_v0 = vpop.f32.mrf.mxu0 }
 0x2d9   : > { %v3696_v7 = vadd.f32 %v3695_v60, %v3607_v51  ;;  %v3519_v19 = vpop.f32.mrf.mxu2 }
 0x2db   : > { %v3739_v37 = vadd.f32 %v3696_v7, %v2915_v32 }
 0x2dc   : > { %v2921_v18 = vpop.f32.mrf.mxu1 }
 0x2dd   : > { %v3775_v49 = vadd.f32 %v6194_v62, %v3739_v37  ;;  %v2922_v11 = vadd.f32 %v2921_v18, %v6176_v34 }
 0x2de   : > { %v3608_v1 = vpop.f32.mrf.mxu3 }
 0x2df   : > { %3807 = vst [vmem:[%s6199_s8 + $0xc0] sm:$0xff] %v3775_v49  ;;  %v3609_v21 = vadd.f32 %v3608_v1, %v3519_v19  ;;  %v3705_v42 = vpop.f32.mrf.mxu0 }
 0x2e1   : > { %v3698_v26 = vadd.f32 %v3697_v4, %v3609_v21  ;;  %v3522_v53 = vpop.f32.mrf.mxu2 }
 0x2e3   : > { %v3740_v28 = vadd.f32 %v3698_v26, %v2917_v50 }
 0x2e4   : > { %v2924_v36 = vpop.f32.mrf.mxu1 }
 0x2e5   : > { %v3776_v30 = vadd.f32 %v6194_v62, %v3740_v28  ;;  %v2925_v9 = vadd.f32 %v2924_v36, %v6179_v31 }
 0x2e6   : > { %v3611_v35 = vpop.f32.mrf.mxu3 }
 0x2e7   : > { %3808 = vst [vmem:[%s6199_s8 + $0xc8] sm:$0xff] %v3776_v30  ;;  %v3612_v63 = vadd.f32 %v3611_v35, %v3522_v53  ;;  %v3707_v46 = vpop.f32.mrf.mxu0 }
 0x2e9   : > { %v3701_v52 = vadd.f32 %v3700_v23, %v3612_v63  ;;  %v3524_v10 = vpop.f32.mrf.mxu2 }
 0x2eb   : > { %v3741_v6 = vadd.f32 %v3701_v52, %v2920_v58 }
 0x2ec   : > { %v2926_v54 = vpop.f32.mrf.mxu1 }
 0x2ed   : > { %v3777_v27 = vadd.f32 %v6194_v62, %v3741_v6  ;;  %v2927_v47 = vadd.f32 %v2926_v54, %v6182_v56 }
 0x2ee   : > { %v3613_v2 = vpop.f32.mrf.mxu3 }
 0x2ef   : > { %3809 = vst [vmem:[%s6199_s8 + $0xd0] sm:$0xff] %v3777_v27  ;;  %v3614_v16 = vadd.f32 %v3613_v2, %v3524_v10  ;;  %v3710_v5 = vpop.f32.mrf.mxu0 }
 0x2f1   : > { %v3703_v38 = vadd.f32 %v3702_v0, %v3614_v16  ;;  %v3527_v55 = vpop.f32.mrf.mxu2 }
 0x2f3   : > { %v3742_v43 = vadd.f32 %v3703_v38, %v2922_v11 }
 0x2f4   : > { %v2929_v40 = vpop.f32.mrf.mxu1 }
 0x2f5   : > { %v3778_v8 = vadd.f32 %v6194_v62, %v3742_v43  ;;  %v2930_v12 = vadd.f32 %v2929_v40, %v6185_v44 }
 0x2f6   : > { %v3616_v20 = vpop.f32.mrf.mxu3 }
 0x2f7   : > { %3810 = vst [vmem:[%s6199_s8 + $0xd8] sm:$0xff] %v3778_v8  ;;  %v3617_v57 = vadd.f32 %v3616_v20, %v3527_v55  ;;  %v3712_v51 = vpop.f32.mrf.mxu0 }
 0x2f9   : > { %v3706_v17 = vadd.f32 %v3705_v42, %v3617_v57  ;;  %v3529_v61 = vpop.f32.mrf.mxu2 }
 0x2fb   : > { %v3743_v39 = vadd.f32 %v3706_v17, %v2925_v9 }
 0x2fc   : > { %v2931_v56 = vpop.f32.mrf.mxu1 }
 0x2fd   : > { %v3779_v34 = vadd.f32 %v6194_v62, %v3743_v39  ;;  %v2932_v32 = vadd.f32 %v2931_v56, %v6187_v22 }
 0x2fe   : > { %v3618_v14 = vpop.f32.mrf.mxu3 }
 0x2ff   : > { %3811 = vst [vmem:[%s6199_s8 + $0xe0] sm:$0xff] %v3779_v34  ;;  %v3619_v13 = vadd.f32 %v3618_v14, %v3529_v61 }
 0x301   : > { %v3708_v25 = vadd.f32 %v3707_v46, %v3619_v13  ;;  %v3532_v60 = vpop.f32.mrf.mxu2 }
 0x303   : > { %v3744_v45 = vadd.f32 %v3708_v25, %v2927_v47 }
 0x305   : > { %v3780_v31 = vadd.f32 %v6194_v62, %v3744_v45 }
 0x306   : > { %v3621_v3 = vpop.f32.mrf.mxu3 }
 0x307   : > { %3812 = vst [vmem:[%s6199_s8 + $0xe8] sm:$0xff] %v3780_v31  ;;  %v3622_v59 = vadd.f32 %v3621_v3, %v3532_v60 }
 0x309   : > { %v3711_v41 = vadd.f32 %v3710_v5, %v3622_v59  ;;  %v3534_v48 = vpop.f32.mrf.mxu2 }
 0x30b   : > { %v3745_v33 = vadd.f32 %v3711_v41, %v2930_v12 }
 0x30d   : > { %v3781_v4 = vadd.f32 %v6194_v62, %v3745_v33 }
 0x30e   : > { %v3623_v29 = vpop.f32.mrf.mxu3 }
 0x30f   : > { %3813 = vst [vmem:[%s6199_s8 + $0xf0] sm:$0xff] %v3781_v4  ;;  %v3624_v15 = vadd.f32 %v3623_v29, %v3534_v48 }
 0x311   : > { %v3713_v7 = vadd.f32 %v3712_v51, %v3624_v15 }
 0x313   : > { %v3746_v19 = vadd.f32 %v3713_v7, %v2932_v32 }
 0x315   : > { %v3782_v37 = vadd.f32 %v6194_v62, %v3746_v19 }
 0x317   : > { %3814 = vst [vmem:[%s6199_s8 + $0xf8] sm:$0xff] %v3782_v37 }
 0x318 PF: > { %s17_s26 = sadd.s32 1, %s5314_s26   ;;  %s6372_s24 = smov %s5310_s25 }
 0x319   : > { %p14_p5 = scmp.ge.s32.totalorder %s17_s26, 4   ;;  %s6373_s25 = smov %s6375_s27 }
 0x31b   :  { %16 = sbr.rel (!%p14_p5) target bundleno = 2 (0x2), region = 88 }

</bundles_post_ra>
